<compile_context>
chip_gen: v7x
topology: tpu7x:2x2x1
jax: 0.10.0
libtpu: 0.0.40
codegen_flags: <defaults>
</compile_context>

<pallas_src>
import math

import jax
import jax.numpy as jnp
import numpy as np
from jax.experimental import pallas as pl
from jax.experimental.pallas import tpu as pltpu

# ---- hyper-params fixed by the PyTorch module ----------------------------------------------
D_MODEL = 128                      # hidden_dim == d_model == d_embed
NUM_HEAD = 4
D_HEAD = D_MODEL // NUM_HEAD       # 32
D_C = 32                           # KV compression dim
D_C1 = 32                          # Q compression dim
D_ROT = 32                         # rotary dim
MLP_DIM = 256
EPS = 1e-6
SCALER = 1.0 / math.sqrt(D_HEAD + D_ROT)

# fused stage-2 projection column layout (grouped by activation, 128-lane aligned):
#   [  0:128) cos  : UQ_p(32) UK_p(32) UV_p(32) pad(32)
#   [128:256) sin  : UQ_p(32) UK_p(32) UV_p(32) pad(32)
#   [256:512) gelu : UQ_g(64) UK_g(64) UV_g(64) pad(64)
#   [512:768) id   : RQ(128)  RQ@pairswap(128)          (scaler folded in)
_ST2_COLS = 768


# ---- RoPE tables / pair-swap permutations (offline) ------------------------------------------
def rope_tables(S):
    freqs = 1.0 / (10000.0 ** (np.arange(0, D_ROT, 2)[: D_ROT // 2].astype(np.float64) / D_ROT))
    ang = np.outer(np.arange(S, dtype=np.float64), freqs)          # (S, d_rot/2)
    cos_k = np.repeat(np.cos(ang), 2, axis=1).astype(np.float32)   # (S, d_rot) interleaved layout
    sin_k = np.repeat(np.sin(ang), 2, axis=1).astype(np.float32)
    cos_q = np.tile(cos_k, (1, NUM_HEAD))                          # (S, num_head*d_rot)
    sin_q = np.tile(sin_k, (1, NUM_HEAD))

    def pair_swap(n):                                              # y @ P == [-y1, y0, -y3, y2, ...]
        Pm = np.zeros((n, n), np.float32)
        idx = np.arange(0, n, 2)
        Pm[idx + 1, idx] = -1.0
        Pm[idx, idx + 1] = 1.0
        return Pm

    pk = pair_swap(D_ROT)
    pq = np.kron(np.eye(NUM_HEAD, dtype=np.float32), pk)
    return cos_q, sin_q, cos_k, sin_k, pq, pk


# ---- the fused Pallas kernel (one batch tile of b_tile sequences per grid step) ----------------
def make_encoder_kernel(b_tile, S, nope_scales):
    rows = b_tile * S

    def kernel(x_ref, w1_ref, w2_ref,
               cosq_ref, sinq_ref, cosk_ref, sink_ref,
               wop_ref, opscale_ref,
               wm1_ref, bm1_ref, wm2_ref, bm2_ref,
               out_ref):

        def mm(a, b):          # (m,k)@(k,n): bf16 operands, f32 accumulation (single MXU pass)
            return jax.lax.dot_general(a.astype(jnp.bfloat16), b.astype(jnp.bfloat16),
                                       (((1,), (0,)), ((), ())),
                                       preferred_element_type=jnp.float32)

        def bmm_qk(q, k):      # (b,s,d),(b,s,d) -> (b,s,s): per-sequence scores, no cross-batch work
            return jax.lax.dot_general(q.astype(jnp.bfloat16), k.astype(jnp.bfloat16),
                                       (((2,), (2,)), ((0,), (0,))),
                                       preferred_element_type=jnp.float32)

        def bmm_av(a, v):      # (b,s,s),(b,s,d) -> (b,s,d)
            return jax.lax.dot_general(a.astype(jnp.bfloat16), v.astype(jnp.bfloat16),
                                       (((2,), (1,)), ((0,), (0,))),
                                       preferred_element_type=jnp.float32)

        def gelu(v):           # tanh GELU -> EUP (differs from torch's exact-erf GELU by < ~1e-3)
            return 0.5 * v * (1.0 + jnp.tanh(0.7978845608028654 * (v + 0.044715 * (v * v * v))))

        def rms_row_scale(v):  # RMSNorm row scale; the per-feature ln weight is folded into next matmul
            return v * jax.lax.rsqrt(jnp.mean(v * v, axis=-1, keepdims=True) + EPS)

        def r3(a):             # (rows, c) -> (b_tile, S, c)
            return a.reshape(b_tile, S, a.shape[-1])

        lane = jax.lax.broadcasted_iota(jnp.int32, (1, D_MODEL), 1)

        x_in = x_ref[...]                                 # (rows, 128), rows = b_tile * S (batch-major)
        xn = rms_row_scale(x_in)                          # ln_1 weight folded into w_stage1

        # ---- stage 1: x -> [p_dq(8) p_dkv(8) p_dq(8) p_dkv(8) g_dq(16) g_dkv(16) rk(32) rk@P(32)]
        # lane groups: [0:16) cos, [16:32) sin, [32:64) gelu, [64:128) identity (selected, not blended)
        h1 = mm(xn, w1_ref[...])                          # (rows, 128)
        cs1 = jnp.where(lane < 16, jnp.cos(h1), jnp.sin(h1))
        act1 = jnp.where(lane < 32, cs1, jnp.where(lane < 64, gelu(h1), h1))
        # decoupled RoPE on K (shared by all heads)
        k_rot = act1[:, 64:96] * cosk_ref[...] + act1[:, 96:128] * sink_ref[...]     # (rows, 32)

        # ---- stage 2: act1 -> 768 cols grouped by activation (one transcendental per group) -----
        h2 = mm(act1, w2_ref[...])                        # (rows, 768)
        cosg = jnp.cos(h2[:, 0:128])                      # [UQcos UKcos UVcos pad] (gates NOT applied)
        sing = jnp.sin(h2[:, 128:256])
        gelg = gelu(h2[:, 256:512])                       # [UQg(64) UKg(64) UVg(64) pad]
        q_rot = h2[:, 512:640] * cosq_ref[...] + h2[:, 640:768] * sinq_ref[...]      # RoPE'd, scaled

        # per-head slices (FAN head layout: head0=cos, head1=sin, head2/3=gelu halves)
        q_nope = (cosg[:, 0:32], sing[:, 0:32], gelg[:, 0:32], gelg[:, 32:64])
        k_nope = (cosg[:, 32:64], sing[:, 32:64], gelg[:, 64:96], gelg[:, 96:128])
        v_head = (cosg[:, 64:96], sing[:, 64:96], gelg[:, 128:160], gelg[:, 160:192])

        # ---- attention: per-sequence softmax (no cross-batch mask / wasted exp) ------------------
        # TODO(synk): flash-style KV tiling for long S (rows^2 per sequence stays in VMEM here).
        k_rot3 = r3(k_rot)
        heads = []
        for h in range(NUM_HEAD):                         # static unroll over heads
            s = (bmm_qk(r3(q_nope[h] * nope_scales[h]), r3(k_nope[h]))
                 + bmm_qk(r3(q_rot[:, h * D_ROT:(h + 1) * D_ROT]), k_rot3))           # (b, S, S)
            e = jnp.exp(s - jnp.max(s, axis=-1, keepdims=True))
            att = e * pl.reciprocal(jnp.sum(e, axis=-1, keepdims=True), approx=True)
            heads.append(bmm_av(att, r3(v_head[h])).reshape(rows, D_HEAD))
        att_o = jnp.concatenate(heads, axis=1)            # (rows, 128), UV gate folded into w_op rows

        # ---- output projection (FAN) + residual ---------------------------------------------------
        h3 = mm(att_o, wop_ref[...])                      # [p(32) p(32) g(64)]
        cs3 = jnp.where(lane < 32, jnp.cos(h3), jnp.sin(h3))
        att_proj = jnp.where(lane < 64, cs3, gelu(h3)) * opscale_ref[...]
        x2 = att_proj + x_in                              # residual (dropout == identity)

        # ---- MLP block + residual ------------------------------------------------------------------
        yn = rms_row_scale(x2)                            # ln_2 weight folded into wm1
        yh = gelu(mm(yn, wm1_ref[...]) + bm1_ref[...])
        out_ref[...] = (x2 + mm(yh, wm2_ref[...]) + bm2_ref[...]).astype(out_ref.dtype)

    return kernel


# ---- offline parameter packing --------------------------------------------------------------------
def pack_kernel_args(P, S, b_tile):
    def npy(a):
        return np.asarray(a, dtype=np.float32)

    def gate_val(g):
        return float(jax.nn.sigmoid(g))

    dq_wp, dq_wg, g_dq = npy(P["dq"][0]), npy(P["dq"][1]), gate_val(P["dq"][2])
    dkv_wp, dkv_wg, g_dkv = npy(P["dkv"][0]), npy(P["dkv"][1]), gate_val(P["dkv"][2])
    uq_wp, uq_wg, g_uq = npy(P["uq"][0]), npy(P["uq"][1]), gate_val(P["uq"][2])
    uk_wp, uk_wg, g_uk = npy(P["uk"][0]), npy(P["uk"][1]), gate_val(P["uk"][2])
    uv_wp, uv_wg, g_uv = npy(P["uv"][0]), npy(P["uv"][1]), gate_val(P["uv"][2])
    op_wp, op_wg, g_op = npy(P["op"][0]), npy(P["op"][1]), gate_val(P["op"][2])
    rq_w, rk_w = npy(P["rq"]), npy(P["rk"])

    cos_q, sin_q, cos_k, sin_k, pq, pk = rope_tables(S)

    ln1 = npy(P["ln1"]).reshape(-1, 1)     # fold ln weights as a left-diagonal into the next matmul
    ln2 = npy(P["ln2"]).reshape(-1, 1)

    # ---- stage 1: x(128) -> [p_dq p_dkv p_dq p_dkv g_dq g_dkv rk rk@P]  (128 cols, ln1 folded)
    w_stage1 = ln1 * np.concatenate(
        [dq_wp, dkv_wp, dq_wp, dkv_wp, dq_wg, dkv_wg, rk_w, rk_w @ pk], axis=1)      # (128, 128)

    # ---- stage 2 expansion: (32, n) weights on C_Q / C_KV -> (128, n) on act1, DQ/DKV gates folded
    def expand_q(W):
        out = np.zeros((128, W.shape[1]), np.float32)
        out[0:8] = g_dq * W[0:8]
        out[16:24] = g_dq * W[8:16]
        out[32:48] = (1.0 - g_dq) * W[16:32]
        return out

    def expand_kv(W):
        out = np.zeros((128, W.shape[1]), np.float32)
        out[8:16] = g_dkv * W[0:8]
        out[24:32] = g_dkv * W[8:16]
        out[48:64] = (1.0 - g_dkv) * W[16:32]
        return out

    zpad32 = np.zeros((128, 32), np.float32)
    zpad64 = np.zeros((128, 64), np.float32)
    w_stage2 = np.concatenate([
        expand_q(uq_wp), expand_kv(uk_wp), expand_kv(uv_wp), zpad32,                 # cos  [0:128)
        expand_q(uq_wp), expand_kv(uk_wp), expand_kv(uv_wp), zpad32,                 # sin  [128:256)
        expand_q(uq_wg), expand_kv(uk_wg), expand_kv(uv_wg), zpad64,                 # gelu [256:512)
        expand_q(rq_w) * SCALER, expand_q(rq_w @ pq) * SCALER,                       # id   [512:768)
    ], axis=1)
    assert w_stage2.shape == (128, _ST2_COLS)

    # per-head no-pe score scale: q-gate * k-gate * 1/sqrt(d_head + d_rot)
    nope_scales = (g_uq * g_uk * SCALER, g_uq * g_uk * SCALER,
                   (1.0 - g_uq) * (1.0 - g_uk) * SCALER, (1.0 - g_uq) * (1.0 - g_uk) * SCALER)

    # ---- output projection: UV gate folded into rows, OP gate applied as one per-lane scale -------
    v_scale = np.concatenate([np.full(64, g_uv), np.full(64, 1.0 - g_uv)]).astype(np.float32)
    w_op = v_scale[:, None] * np.concatenate([op_wp, op_wp, op_wg], axis=1)          # (128, 128)
    op_scale = np.concatenate([np.full(64, g_op), np.full(64, 1.0 - g_op)]).astype(np.float32)[None, :]

    # ---- MLP (ln_2 folded into first weight) --------------------------------------------------------
    wm1 = ln2 * npy(P["w1"])                                                          # (128, 256)

    # ---- RoPE tables per row of the flattened (b_tile*S) tile ---------------------------------------
    cos_q_t = np.tile(cos_q, (b_tile, 1)); sin_q_t = np.tile(sin_q, (b_tile, 1))      # (rows, 128)
    cos_k_t = np.tile(cos_k, (b_tile, 1)); sin_k_t = np.tile(sin_k, (b_tile, 1))      # (rows, 32)

    bf16 = jnp.bfloat16
    args = [
        jnp.asarray(w_stage1, bf16), jnp.asarray(w_stage2, bf16),
        jnp.asarray(cos_q_t), jnp.asarray(sin_q_t), jnp.asarray(cos_k_t), jnp.asarray(sin_k_t),
        jnp.asarray(w_op, bf16), jnp.asarray(op_scale),
        jnp.asarray(wm1, bf16), jnp.asarray(npy(P["b1"])),
        jnp.asarray(npy(P["w2"]), bf16), jnp.asarray(npy(P["b2"])),
    ]
    return args, nope_scales


# ---- tiling heuristic ------------------------------------------------------------------------------
def _pick_b_tile(B, S, target_rows=256, min_rows=64):
    # target ~256 rows/step (fills v6e/v7x MXU M-dim, amortizes ~0.35us/step); keep >=2 grid steps
    # when possible so the "parallel" axis can shard across the two v7x TensorCores.
    divs = [d for d in range(1, B + 1) if B % d == 0]
    fit = [d for d in divs if d * S <= target_rows] or [1]
    b_tile = max(fit)
    if B // b_tile < 2:
        smaller = [d for d in fit if d < b_tile and d * S >= min_rows]
        if smaller:
            b_tile = max(smaller)
    return b_tile


# ---- wrapper ---------------------------------------------------------------------------------------
def seq_level_encoder(x, P, b_tile=None):
    B, S, D = x.shape
    assert D == D_MODEL
    assert S % 8 == 0, "S must be a multiple of 8 (f32 sublane); pad upstream"
    if b_tile is None:
        b_tile = _pick_b_tile(B, S)
    assert B % b_tile == 0
    rows = b_tile * S

    args, nope_scales = pack_kernel_args(P, S, b_tile)
    kernel = make_encoder_kernel(b_tile, S, nope_scales)
    x2d = x.reshape(B * S, D)

    in_specs = [pl.BlockSpec((rows, D), lambda b: (b, 0))]
    for a in args:   # parameters / tables: full-array blocks, replicated across the grid
        in_specs.append(pl.BlockSpec(a.shape, (lambda b, _n=a.ndim: (0,) * _n)))

    out = pl.pallas_call(
        kernel,
        out_shape=jax.ShapeDtypeStruct((B * S, D), jnp.float32),
        grid=(B // b_tile,),
        in_specs=in_specs,
        out_specs=pl.BlockSpec((rows, D), lambda b: (b, 0)),
        compiler_params=pltpu.CompilerParams(
            dimension_semantics=("parallel",),
            vmem_limit_bytes=32 * 1024 * 1024),
    )(x2d, *args)
    return out.reshape(B, S, D)


# ---- deterministic parameter construction ------------------------------------------------------------
def init_params(key):
    keys = iter(jax.random.split(key, 32))

    def lin(i, o):  # (in, out) transposed weight so y = x @ W
        return (jax.random.normal(next(keys), (i, o), jnp.float32) / np.sqrt(i)).astype(jnp.float32)

    def fan_params(i, o):  # FANLayer(i, o, bias=False, with_gate=True)
        wp = lin(i, o // 4)
        wg = lin(i, o - o // 2)
        gate = jax.random.normal(next(keys), (), jnp.float32)
        return wp, wg, gate

    return {
        "ln1": jnp.ones((1, D_MODEL), jnp.float32),
        "ln2": jnp.ones((1, D_MODEL), jnp.float32),
        "dq": fan_params(D_MODEL, D_C1),
        "dkv": fan_params(D_MODEL, D_C),
        "uq": fan_params(D_C1, D_MODEL),
        "uk": fan_params(D_C, D_MODEL),
        "uv": fan_params(D_C, D_MODEL),
        "op": fan_params(D_MODEL, D_MODEL),
        "rq": lin(D_C1, NUM_HEAD * D_ROT),
        "rk": lin(D_MODEL, D_ROT),
        "w1": lin(D_MODEL, MLP_DIM),
        "b1": jax.random.normal(next(keys), (1, MLP_DIM), jnp.float32) * 1e-6,
        "w2": lin(MLP_DIM, D_MODEL),
        "b2": jax.random.normal(next(keys), (1, D_MODEL), jnp.float32) * 1e-6,
    }


# ---- pure-JAX f32 reference (torch-faithful math) for a correctness check ----------------------------
def _gelu_exact(x):  # torch.nn.GELU default (erf formulation)
    return 0.5 * x * (1.0 + jax.lax.erf(x * (1.0 / math.sqrt(2.0))))


def reference_forward(x, P):
    B, S, D = x.shape
    cos_q, sin_q, cos_k, sin_k, pq, pk = rope_tables(S)

    def fan(h, wp, wg, gate):
        g = jax.nn.sigmoid(gate)
        p = h @ wp
        a = _gelu_exact(h @ wg)
        return jnp.concatenate([g * jnp.cos(p), g * jnp.sin(p), (1.0 - g) * a], axis=-1)

    def rmsnorm(v, w):
        return v * jax.lax.rsqrt(jnp.mean(v * v, axis=-1, keepdims=True) + EPS) * w

    def one(xb):  # (S, D)
        x1 = rmsnorm(xb, P["ln1"])
        cq = fan(x1, *P["dq"])
        qs = fan(cq, *P["uq"])
        qr = cq @ P["rq"]
        ckv = fan(x1, *P["dkv"])
        ks = fan(ckv, *P["uk"])
        vs = fan(ckv, *P["uv"])
        kr = x1 @ P["rk"]
        qr = qr * cos_q + (qr @ pq) * sin_q
        kr = kr * cos_k + (kr @ pk) * sin_k
        outs = []
        for h in range(NUM_HEAD):
            qh = jnp.concatenate([qs[:, h * D_HEAD:(h + 1) * D_HEAD],
                                  qr[:, h * D_ROT:(h + 1) * D_ROT]], -1) * SCALER
            kh = jnp.concatenate([ks[:, h * D_HEAD:(h + 1) * D_HEAD], kr], -1)
            vh = vs[:, h * D_HEAD:(h + 1) * D_HEAD]
            att = jax.nn.softmax(qh @ kh.T, axis=-1)
            outs.append(att @ vh)
        ao = fan(jnp.concatenate(outs, -1), *P["op"])
        x2 = ao + xb
        y = rmsnorm(x2, P["ln2"])
        y = _gelu_exact(y @ P["w1"] + P["b1"])
        y = y @ P["w2"] + P["b2"]
        return x2 + y

    return jax.vmap(one)(x)


if __name__ == "__main__":
    key = jax.random.PRNGKey(0)
    kp, kx = jax.random.split(key)
    B, S = 2, 8
    x = jax.random.normal(kx, (B, S, D_MODEL), jnp.float32)

    P = init_params(kp)

    out = jax.block_until_ready(seq_level_encoder(x, P))
    with jax.default_matmul_precision("highest"):
        ref = jax.block_until_ready(reference_forward(x, P))

    assert out.shape == (B, S, D_MODEL)
    assert bool(jnp.all(jnp.isfinite(out)))
    # bf16 MXU operands + tanh-GELU + approx reciprocal introduce ~1e-2-level deviation vs the f32 ref
    err = float(jnp.max(jnp.abs(out - ref)))
    assert err < 1.5e-1, f"kernel/reference mismatch: max abs err = {err}"
    print("KERNEL_OK")
</pallas_src>

<mosaic_0001>
module attributes {stable_mosaic.version = 11 : i64} {
  func.func @kernel(%arg0: i32, %arg1: memref<16x128xf32, #tpu.memory_space<vmem>>, %arg2: memref<128x128xbf16, #tpu.memory_space<vmem>>, %arg3: memref<128x768xbf16, #tpu.memory_space<vmem>>, %arg4: memref<16x128xf32, #tpu.memory_space<vmem>>, %arg5: memref<16x128xf32, #tpu.memory_space<vmem>>, %arg6: memref<16x32xf32, #tpu.memory_space<vmem>>, %arg7: memref<16x32xf32, #tpu.memory_space<vmem>>, %arg8: memref<128x128xbf16, #tpu.memory_space<vmem>>, %arg9: memref<1x128xf32, #tpu.memory_space<vmem>>, %arg10: memref<128x256xbf16, #tpu.memory_space<vmem>>, %arg11: memref<1x256xf32, #tpu.memory_space<vmem>>, %arg12: memref<256x128xbf16, #tpu.memory_space<vmem>>, %arg13: memref<1x128xf32, #tpu.memory_space<vmem>>, %arg14: memref<16x128xf32, #tpu.memory_space<vmem>>) attributes {dimension_semantics = [#tpu.dimension_semantics<parallel>], iteration_bounds = array<i64: 1>, scalar_prefetch = 0 : i64, scratch_operands = 0 : i64, tpu.core_type = #tpu.core_type<tc>, window_params = [{transform_indices = @transform_0, window_bounds = array<i64: 16, 128>}, {pipeline_mode = #tpu.pipeline_mode<synchronous>, transform_indices = @transform_1, window_bounds = array<i64: 128, 128>}, {pipeline_mode = #tpu.pipeline_mode<synchronous>, transform_indices = @transform_2, window_bounds = array<i64: 128, 768>}, {pipeline_mode = #tpu.pipeline_mode<synchronous>, transform_indices = @transform_3, window_bounds = array<i64: 16, 128>}, {pipeline_mode = #tpu.pipeline_mode<synchronous>, transform_indices = @transform_4, window_bounds = array<i64: 16, 128>}, {pipeline_mode = #tpu.pipeline_mode<synchronous>, transform_indices = @transform_5, window_bounds = array<i64: 16, 32>}, {pipeline_mode = #tpu.pipeline_mode<synchronous>, transform_indices = @transform_6, window_bounds = array<i64: 16, 32>}, {pipeline_mode = #tpu.pipeline_mode<synchronous>, transform_indices = @transform_7, window_bounds = array<i64: 128, 128>}, {pipeline_mode = #tpu.pipeline_mode<synchronous>, transform_indices = @transform_8, window_bounds = array<i64: 1, 128>}, {pipeline_mode = #tpu.pipeline_mode<synchronous>, transform_indices = @transform_9, window_bounds = array<i64: 128, 256>}, {pipeline_mode = #tpu.pipeline_mode<synchronous>, transform_indices = @transform_10, window_bounds = array<i64: 1, 256>}, {pipeline_mode = #tpu.pipeline_mode<synchronous>, transform_indices = @transform_11, window_bounds = array<i64: 256, 128>}, {pipeline_mode = #tpu.pipeline_mode<synchronous>, transform_indices = @transform_12, window_bounds = array<i64: 1, 128>}, {transform_indices = @transform_13, window_bounds = array<i64: 16, 128>}]} {
    %0 = tpu.iota {dimensions = array<i32: 1>} : vector<1x128xi32>
    %c0 = arith.constant 0 : index
    %c0_0 = arith.constant 0 : index
    %1 = vector.load %arg1[%c0, %c0_0] : memref<16x128xf32, #tpu.memory_space<vmem>>, vector<16x128xf32>
    %2 = arith.mulf %1, %1 : vector<16x128xf32>
    %cst = arith.constant dense<0.000000e+00> : vector<16xf32>
    %3 = vector.multi_reduction <add>, %2, %cst [1] : vector<16x128xf32> to vector<16xf32>
    %4 = vector.shape_cast %3 : vector<16xf32> to vector<16x1xf32>
    %cst_1 = arith.constant 1.280000e+02 : f32
    %5 = vector.broadcast %cst_1 : f32 to vector<16x1xf32>
    %6 = arith.divf %4, %5 : vector<16x1xf32>
    %cst_2 = arith.constant 9.99999997E-7 : f32
    %7 = vector.broadcast %cst_2 : f32 to vector<16x1xf32>
    %8 = arith.addf %6, %7 : vector<16x1xf32>
    %9 = math.rsqrt %8 : vector<16x1xf32>
    %10 = vector.broadcast %9 : vector<16x1xf32> to vector<16x128xf32>
    %11 = arith.mulf %1, %10 : vector<16x128xf32>
    %c0_3 = arith.constant 0 : index
    %c0_4 = arith.constant 0 : index
    %12 = vector.load %arg2[%c0_3, %c0_4] : memref<128x128xbf16, #tpu.memory_space<vmem>>, vector<128x128xbf16>
    %13 = arith.truncf %11 : vector<16x128xf32> to vector<16x128xbf16>
    %cst_5 = arith.constant dense<0.000000e+00> : vector<16x128xf32>
    %14 = tpu.matmul %13, %12, %cst_5 {dimension_numbers = #tpu.dot_dimension_numbers<[1], [0], [0], [1], [0, 0, 1, 1], [], []>} : vector<16x128xbf16>, vector<128x128xbf16>, vector<16x128xf32> -> vector<16x128xf32>
    %c16_i32 = arith.constant 16 : i32
    %15 = vector.broadcast %c16_i32 : i32 to vector<1x128xi32>
    %16 = arith.cmpi slt, %0, %15 : vector<1x128xi32>
    %17 = math.cos %14 : vector<16x128xf32>
    %18 = math.sin %14 : vector<16x128xf32>
    %19 = vector.shape_cast %16 : vector<1x128xi1> to vector<1x128xi1>
    %20 = vector.broadcast %19 : vector<1x128xi1> to vector<16x128xi1>
    %21 = arith.select %20, %17, %18 : vector<16x128xi1>, vector<16x128xf32>
    %c32_i32 = arith.constant 32 : i32
    %22 = vector.broadcast %c32_i32 : i32 to vector<1x128xi32>
    %23 = arith.cmpi slt, %0, %22 : vector<1x128xi32>
    %c64_i32 = arith.constant 64 : i32
    %24 = vector.broadcast %c64_i32 : i32 to vector<1x128xi32>
    %25 = arith.cmpi slt, %0, %24 : vector<1x128xi32>
    %cst_6 = arith.constant 5.000000e-01 : f32
    %26 = vector.broadcast %cst_6 : f32 to vector<16x128xf32>
    %27 = arith.mulf %26, %14 : vector<16x128xf32>
    %28 = arith.mulf %14, %14 : vector<16x128xf32>
    %29 = arith.mulf %28, %14 : vector<16x128xf32>
    %cst_7 = arith.constant 4.471500e-02 : f32
    %30 = vector.broadcast %cst_7 : f32 to vector<16x128xf32>
    %31 = arith.mulf %30, %29 : vector<16x128xf32>
    %32 = arith.addf %14, %31 : vector<16x128xf32>
    %cst_8 = arith.constant 0.797884583 : f32
    %33 = vector.broadcast %cst_8 : f32 to vector<16x128xf32>
    %34 = arith.mulf %33, %32 : vector<16x128xf32>
    %35 = math.tanh %34 : vector<16x128xf32>
    %cst_9 = arith.constant 1.000000e+00 : f32
    %36 = vector.broadcast %cst_9 : f32 to vector<16x128xf32>
    %37 = arith.addf %36, %35 : vector<16x128xf32>
    %38 = arith.mulf %27, %37 : vector<16x128xf32>
    %39 = vector.shape_cast %25 : vector<1x128xi1> to vector<1x128xi1>
    %40 = vector.broadcast %39 : vector<1x128xi1> to vector<16x128xi1>
    %41 = arith.select %40, %38, %14 : vector<16x128xi1>, vector<16x128xf32>
    %42 = vector.shape_cast %23 : vector<1x128xi1> to vector<1x128xi1>
    %43 = vector.broadcast %42 : vector<1x128xi1> to vector<16x128xi1>
    %44 = arith.select %43, %21, %41 : vector<16x128xi1>, vector<16x128xf32>
    %45 = vector.extract_strided_slice %44 {offsets = [0, 64], sizes = [16, 32], strides = [1, 1]} : vector<16x128xf32> to vector<16x32xf32>
    %c0_10 = arith.constant 0 : index
    %c0_11 = arith.constant 0 : index
    %46 = vector.load %arg6[%c0_10, %c0_11] : memref<16x32xf32, #tpu.memory_space<vmem>>, vector<16x32xf32>
    %47 = arith.mulf %45, %46 : vector<16x32xf32>
    %48 = vector.extract_strided_slice %44 {offsets = [0, 96], sizes = [16, 32], strides = [1, 1]} : vector<16x128xf32> to vector<16x32xf32>
    %c0_12 = arith.constant 0 : index
    %c0_13 = arith.constant 0 : index
    %49 = vector.load %arg7[%c0_12, %c0_13] : memref<16x32xf32, #tpu.memory_space<vmem>>, vector<16x32xf32>
    %50 = arith.mulf %48, %49 : vector<16x32xf32>
    %51 = arith.addf %47, %50 : vector<16x32xf32>
    %c0_14 = arith.constant 0 : index
    %c0_15 = arith.constant 0 : index
    %52 = vector.load %arg3[%c0_14, %c0_15] : memref<128x768xbf16, #tpu.memory_space<vmem>>, vector<128x768xbf16>
    %53 = arith.truncf %44 : vector<16x128xf32> to vector<16x128xbf16>
    %cst_16 = arith.constant dense<0.000000e+00> : vector<16x768xf32>
    %54 = tpu.matmul %53, %52, %cst_16 {dimension_numbers = #tpu.dot_dimension_numbers<[1], [0], [0], [1], [0, 0, 1, 1], [], []>} : vector<16x128xbf16>, vector<128x768xbf16>, vector<16x768xf32> -> vector<16x768xf32>
    %55 = vector.extract_strided_slice %54 {offsets = [0, 0], sizes = [16, 128], strides = [1, 1]} : vector<16x768xf32> to vector<16x128xf32>
    %56 = math.cos %55 : vector<16x128xf32>
    %57 = vector.extract_strided_slice %54 {offsets = [0, 128], sizes = [16, 128], strides = [1, 1]} : vector<16x768xf32> to vector<16x128xf32>
    %58 = math.sin %57 : vector<16x128xf32>
    %59 = vector.extract_strided_slice %54 {offsets = [0, 256], sizes = [16, 256], strides = [1, 1]} : vector<16x768xf32> to vector<16x256xf32>
    %cst_17 = arith.constant 5.000000e-01 : f32
    %60 = vector.broadcast %cst_17 : f32 to vector<16x256xf32>
    %61 = arith.mulf %60, %59 : vector<16x256xf32>
    %62 = arith.mulf %59, %59 : vector<16x256xf32>
    %63 = arith.mulf %62, %59 : vector<16x256xf32>
    %cst_18 = arith.constant 4.471500e-02 : f32
    %64 = vector.broadcast %cst_18 : f32 to vector<16x256xf32>
    %65 = arith.mulf %64, %63 : vector<16x256xf32>
    %66 = arith.addf %59, %65 : vector<16x256xf32>
    %cst_19 = arith.constant 0.797884583 : f32
    %67 = vector.broadcast %cst_19 : f32 to vector<16x256xf32>
    %68 = arith.mulf %67, %66 : vector<16x256xf32>
    %69 = math.tanh %68 : vector<16x256xf32>
    %cst_20 = arith.constant 1.000000e+00 : f32
    %70 = vector.broadcast %cst_20 : f32 to vector<16x256xf32>
    %71 = arith.addf %70, %69 : vector<16x256xf32>
    %72 = arith.mulf %61, %71 : vector<16x256xf32>
    %73 = vector.extract_strided_slice %54 {offsets = [0, 512], sizes = [16, 128], strides = [1, 1]} : vector<16x768xf32> to vector<16x128xf32>
    %c0_21 = arith.constant 0 : index
    %c0_22 = arith.constant 0 : index
    %74 = vector.load %arg4[%c0_21, %c0_22] : memref<16x128xf32, #tpu.memory_space<vmem>>, vector<16x128xf32>
    %75 = arith.mulf %73, %74 : vector<16x128xf32>
    %76 = vector.extract_strided_slice %54 {offsets = [0, 640], sizes = [16, 128], strides = [1, 1]} : vector<16x768xf32> to vector<16x128xf32>
    %c0_23 = arith.constant 0 : index
    %c0_24 = arith.constant 0 : index
    %77 = vector.load %arg5[%c0_23, %c0_24] : memref<16x128xf32, #tpu.memory_space<vmem>>, vector<16x128xf32>
    %78 = arith.mulf %76, %77 : vector<16x128xf32>
    %79 = arith.addf %75, %78 : vector<16x128xf32>
    %80 = vector.extract_strided_slice %56 {offsets = [0, 0], sizes = [16, 32], strides = [1, 1]} : vector<16x128xf32> to vector<16x32xf32>
    %81 = vector.extract_strided_slice %58 {offsets = [0, 0], sizes = [16, 32], strides = [1, 1]} : vector<16x128xf32> to vector<16x32xf32>
    %82 = vector.extract_strided_slice %72 {offsets = [0, 0], sizes = [16, 32], strides = [1, 1]} : vector<16x256xf32> to vector<16x32xf32>
    %83 = vector.extract_strided_slice %72 {offsets = [0, 32], sizes = [16, 32], strides = [1, 1]} : vector<16x256xf32> to vector<16x32xf32>
    %84 = vector.extract_strided_slice %56 {offsets = [0, 32], sizes = [16, 32], strides = [1, 1]} : vector<16x128xf32> to vector<16x32xf32>
    %85 = vector.extract_strided_slice %58 {offsets = [0, 32], sizes = [16, 32], strides = [1, 1]} : vector<16x128xf32> to vector<16x32xf32>
    %86 = vector.extract_strided_slice %72 {offsets = [0, 64], sizes = [16, 32], strides = [1, 1]} : vector<16x256xf32> to vector<16x32xf32>
    %87 = vector.extract_strided_slice %72 {offsets = [0, 96], sizes = [16, 32], strides = [1, 1]} : vector<16x256xf32> to vector<16x32xf32>
    %88 = vector.extract_strided_slice %56 {offsets = [0, 64], sizes = [16, 32], strides = [1, 1]} : vector<16x128xf32> to vector<16x32xf32>
    %89 = vector.extract_strided_slice %58 {offsets = [0, 64], sizes = [16, 32], strides = [1, 1]} : vector<16x128xf32> to vector<16x32xf32>
    %90 = vector.extract_strided_slice %72 {offsets = [0, 128], sizes = [16, 32], strides = [1, 1]} : vector<16x256xf32> to vector<16x32xf32>
    %91 = vector.extract_strided_slice %72 {offsets = [0, 160], sizes = [16, 32], strides = [1, 1]} : vector<16x256xf32> to vector<16x32xf32>
    %92 = vector.shape_cast %51 : vector<16x32xf32> to vector<2x8x32xf32>
    %cst_25 = arith.constant 0.0372423045 : f32
    %93 = vector.broadcast %cst_25 : f32 to vector<16x32xf32>
    %94 = arith.mulf %80, %93 : vector<16x32xf32>
    %95 = vector.shape_cast %94 : vector<16x32xf32> to vector<2x8x32xf32>
    %96 = vector.shape_cast %84 : vector<16x32xf32> to vector<2x8x32xf32>
    %97 = arith.truncf %95 : vector<2x8x32xf32> to vector<2x8x32xbf16>
    %98 = arith.truncf %96 : vector<2x8x32xf32> to vector<2x8x32xbf16>
    %cst_26 = arith.constant dense<0.000000e+00> : vector<2x8x8xf32>
    %99 = tpu.matmul %97, %98, %cst_26 {dimension_numbers = #tpu.dot_dimension_numbers<[2], [2], [1], [1], [0, 0, 0, 1, 1, 1], [0], [0]>} : vector<2x8x32xbf16>, vector<2x8x32xbf16>, vector<2x8x8xf32> -> vector<2x8x8xf32>
    %100 = vector.extract_strided_slice %79 {offsets = [0, 0], sizes = [16, 32], strides = [1, 1]} : vector<16x128xf32> to vector<16x32xf32>
    %101 = vector.shape_cast %100 : vector<16x32xf32> to vector<2x8x32xf32>
    %102 = arith.truncf %101 : vector<2x8x32xf32> to vector<2x8x32xbf16>
    %103 = arith.truncf %92 : vector<2x8x32xf32> to vector<2x8x32xbf16>
    %cst_27 = arith.constant dense<0.000000e+00> : vector<2x8x8xf32>
    %104 = tpu.matmul %102, %103, %cst_27 {dimension_numbers = #tpu.dot_dimension_numbers<[2], [2], [1], [1], [0, 0, 0, 1, 1, 1], [0], [0]>} : vector<2x8x32xbf16>, vector<2x8x32xbf16>, vector<2x8x8xf32> -> vector<2x8x8xf32>
    %105 = arith.addf %99, %104 : vector<2x8x8xf32>
    %cst_28 = arith.constant dense<0xFF800000> : vector<2x8xf32>
    %106 = vector.multi_reduction <maximumf>, %105, %cst_28 [2] : vector<2x8x8xf32> to vector<2x8xf32>
    %107 = vector.shape_cast %106 : vector<2x8xf32> to vector<2x8x1xf32>
    %108 = vector.broadcast %107 : vector<2x8x1xf32> to vector<2x8x8xf32>
    %109 = arith.subf %105, %108 : vector<2x8x8xf32>
    %110 = math.exp %109 : vector<2x8x8xf32>
    %cst_29 = arith.constant dense<0.000000e+00> : vector<2x8xf32>
    %111 = vector.multi_reduction <add>, %110, %cst_29 [2] : vector<2x8x8xf32> to vector<2x8xf32>
    %112 = vector.shape_cast %111 : vector<2x8xf32> to vector<2x8x1xf32>
    %113 = tpu.reciprocal %112 {approx = true} : vector<2x8x1xf32> -> vector<2x8x1xf32>
    %114 = vector.broadcast %113 : vector<2x8x1xf32> to vector<2x8x8xf32>
    %115 = arith.mulf %110, %114 : vector<2x8x8xf32>
    %116 = vector.shape_cast %88 : vector<16x32xf32> to vector<2x8x32xf32>
    %117 = arith.truncf %115 : vector<2x8x8xf32> to vector<2x8x8xbf16>
    %118 = arith.truncf %116 : vector<2x8x32xf32> to vector<2x8x32xbf16>
    %cst_30 = arith.constant dense<0.000000e+00> : vector<2x8x32xf32>
    %119 = tpu.matmul %117, %118, %cst_30 {dimension_numbers = #tpu.dot_dimension_numbers<[2], [1], [1], [2], [0, 0, 0, 1, 1, 2], [0], [0]>} : vector<2x8x8xbf16>, vector<2x8x32xbf16>, vector<2x8x32xf32> -> vector<2x8x32xf32>
    %120 = vector.shape_cast %119 : vector<2x8x32xf32> to vector<16x32xf32>
    %cst_31 = arith.constant 0.0372423045 : f32
    %121 = vector.broadcast %cst_31 : f32 to vector<16x32xf32>
    %122 = arith.mulf %81, %121 : vector<16x32xf32>
    %123 = vector.shape_cast %122 : vector<16x32xf32> to vector<2x8x32xf32>
    %124 = vector.shape_cast %85 : vector<16x32xf32> to vector<2x8x32xf32>
    %125 = arith.truncf %123 : vector<2x8x32xf32> to vector<2x8x32xbf16>
    %126 = arith.truncf %124 : vector<2x8x32xf32> to vector<2x8x32xbf16>
    %cst_32 = arith.constant dense<0.000000e+00> : vector<2x8x8xf32>
    %127 = tpu.matmul %125, %126, %cst_32 {dimension_numbers = #tpu.dot_dimension_numbers<[2], [2], [1], [1], [0, 0, 0, 1, 1, 1], [0], [0]>} : vector<2x8x32xbf16>, vector<2x8x32xbf16>, vector<2x8x8xf32> -> vector<2x8x8xf32>
    %128 = vector.extract_strided_slice %79 {offsets = [0, 32], sizes = [16, 32], strides = [1, 1]} : vector<16x128xf32> to vector<16x32xf32>
    %129 = vector.shape_cast %128 : vector<16x32xf32> to vector<2x8x32xf32>
    %130 = arith.truncf %129 : vector<2x8x32xf32> to vector<2x8x32xbf16>
    %131 = arith.truncf %92 : vector<2x8x32xf32> to vector<2x8x32xbf16>
    %cst_33 = arith.constant dense<0.000000e+00> : vector<2x8x8xf32>
    %132 = tpu.matmul %130, %131, %cst_33 {dimension_numbers = #tpu.dot_dimension_numbers<[2], [2], [1], [1], [0, 0, 0, 1, 1, 1], [0], [0]>} : vector<2x8x32xbf16>, vector<2x8x32xbf16>, vector<2x8x8xf32> -> vector<2x8x8xf32>
    %133 = arith.addf %127, %132 : vector<2x8x8xf32>
    %cst_34 = arith.constant dense<0xFF800000> : vector<2x8xf32>
    %134 = vector.multi_reduction <maximumf>, %133, %cst_34 [2] : vector<2x8x8xf32> to vector<2x8xf32>
    %135 = vector.shape_cast %134 : vector<2x8xf32> to vector<2x8x1xf32>
    %136 = vector.broadcast %135 : vector<2x8x1xf32> to vector<2x8x8xf32>
    %137 = arith.subf %133, %136 : vector<2x8x8xf32>
    %138 = math.exp %137 : vector<2x8x8xf32>
    %cst_35 = arith.constant dense<0.000000e+00> : vector<2x8xf32>
    %139 = vector.multi_reduction <add>, %138, %cst_35 [2] : vector<2x8x8xf32> to vector<2x8xf32>
    %140 = vector.shape_cast %139 : vector<2x8xf32> to vector<2x8x1xf32>
    %141 = tpu.reciprocal %140 {approx = true} : vector<2x8x1xf32> -> vector<2x8x1xf32>
    %142 = vector.broadcast %141 : vector<2x8x1xf32> to vector<2x8x8xf32>
    %143 = arith.mulf %138, %142 : vector<2x8x8xf32>
    %144 = vector.shape_cast %89 : vector<16x32xf32> to vector<2x8x32xf32>
    %145 = arith.truncf %143 : vector<2x8x8xf32> to vector<2x8x8xbf16>
    %146 = arith.truncf %144 : vector<2x8x32xf32> to vector<2x8x32xbf16>
    %cst_36 = arith.constant dense<0.000000e+00> : vector<2x8x32xf32>
    %147 = tpu.matmul %145, %146, %cst_36 {dimension_numbers = #tpu.dot_dimension_numbers<[2], [1], [1], [2], [0, 0, 0, 1, 1, 2], [0], [0]>} : vector<2x8x8xbf16>, vector<2x8x32xbf16>, vector<2x8x32xf32> -> vector<2x8x32xf32>
    %148 = vector.shape_cast %147 : vector<2x8x32xf32> to vector<16x32xf32>
    %cst_37 = arith.constant 0.0168602802 : f32
    %149 = vector.broadcast %cst_37 : f32 to vector<16x32xf32>
    %150 = arith.mulf %82, %149 : vector<16x32xf32>
    %151 = vector.shape_cast %150 : vector<16x32xf32> to vector<2x8x32xf32>
    %152 = vector.shape_cast %86 : vector<16x32xf32> to vector<2x8x32xf32>
    %153 = arith.truncf %151 : vector<2x8x32xf32> to vector<2x8x32xbf16>
    %154 = arith.truncf %152 : vector<2x8x32xf32> to vector<2x8x32xbf16>
    %cst_38 = arith.constant dense<0.000000e+00> : vector<2x8x8xf32>
    %155 = tpu.matmul %153, %154, %cst_38 {dimension_numbers = #tpu.dot_dimension_numbers<[2], [2], [1], [1], [0, 0, 0, 1, 1, 1], [0], [0]>} : vector<2x8x32xbf16>, vector<2x8x32xbf16>, vector<2x8x8xf32> -> vector<2x8x8xf32>
    %156 = vector.extract_strided_slice %79 {offsets = [0, 64], sizes = [16, 32], strides = [1, 1]} : vector<16x128xf32> to vector<16x32xf32>
    %157 = vector.shape_cast %156 : vector<16x32xf32> to vector<2x8x32xf32>
    %158 = arith.truncf %157 : vector<2x8x32xf32> to vector<2x8x32xbf16>
    %159 = arith.truncf %92 : vector<2x8x32xf32> to vector<2x8x32xbf16>
    %cst_39 = arith.constant dense<0.000000e+00> : vector<2x8x8xf32>
    %160 = tpu.matmul %158, %159, %cst_39 {dimension_numbers = #tpu.dot_dimension_numbers<[2], [2], [1], [1], [0, 0, 0, 1, 1, 1], [0], [0]>} : vector<2x8x32xbf16>, vector<2x8x32xbf16>, vector<2x8x8xf32> -> vector<2x8x8xf32>
    %161 = arith.addf %155, %160 : vector<2x8x8xf32>
    %cst_40 = arith.constant dense<0xFF800000> : vector<2x8xf32>
    %162 = vector.multi_reduction <maximumf>, %161, %cst_40 [2] : vector<2x8x8xf32> to vector<2x8xf32>
    %163 = vector.shape_cast %162 : vector<2x8xf32> to vector<2x8x1xf32>
    %164 = vector.broadcast %163 : vector<2x8x1xf32> to vector<2x8x8xf32>
    %165 = arith.subf %161, %164 : vector<2x8x8xf32>
    %166 = math.exp %165 : vector<2x8x8xf32>
    %cst_41 = arith.constant dense<0.000000e+00> : vector<2x8xf32>
    %167 = vector.multi_reduction <add>, %166, %cst_41 [2] : vector<2x8x8xf32> to vector<2x8xf32>
    %168 = vector.shape_cast %167 : vector<2x8xf32> to vector<2x8x1xf32>
    %169 = tpu.reciprocal %168 {approx = true} : vector<2x8x1xf32> -> vector<2x8x1xf32>
    %170 = vector.broadcast %169 : vector<2x8x1xf32> to vector<2x8x8xf32>
    %171 = arith.mulf %166, %170 : vector<2x8x8xf32>
    %172 = vector.shape_cast %90 : vector<16x32xf32> to vector<2x8x32xf32>
    %173 = arith.truncf %171 : vector<2x8x8xf32> to vector<2x8x8xbf16>
    %174 = arith.truncf %172 : vector<2x8x32xf32> to vector<2x8x32xbf16>
    %cst_42 = arith.constant dense<0.000000e+00> : vector<2x8x32xf32>
    %175 = tpu.matmul %173, %174, %cst_42 {dimension_numbers = #tpu.dot_dimension_numbers<[2], [1], [1], [2], [0, 0, 0, 1, 1, 2], [0], [0]>} : vector<2x8x8xbf16>, vector<2x8x32xbf16>, vector<2x8x32xf32> -> vector<2x8x32xf32>
    %176 = vector.shape_cast %175 : vector<2x8x32xf32> to vector<16x32xf32>
    %cst_43 = arith.constant 0.0168602802 : f32
    %177 = vector.broadcast %cst_43 : f32 to vector<16x32xf32>
    %178 = arith.mulf %83, %177 : vector<16x32xf32>
    %179 = vector.shape_cast %178 : vector<16x32xf32> to vector<2x8x32xf32>
    %180 = vector.shape_cast %87 : vector<16x32xf32> to vector<2x8x32xf32>
    %181 = arith.truncf %179 : vector<2x8x32xf32> to vector<2x8x32xbf16>
    %182 = arith.truncf %180 : vector<2x8x32xf32> to vector<2x8x32xbf16>
    %cst_44 = arith.constant dense<0.000000e+00> : vector<2x8x8xf32>
    %183 = tpu.matmul %181, %182, %cst_44 {dimension_numbers = #tpu.dot_dimension_numbers<[2], [2], [1], [1], [0, 0, 0, 1, 1, 1], [0], [0]>} : vector<2x8x32xbf16>, vector<2x8x32xbf16>, vector<2x8x8xf32> -> vector<2x8x8xf32>
    %184 = vector.extract_strided_slice %79 {offsets = [0, 96], sizes = [16, 32], strides = [1, 1]} : vector<16x128xf32> to vector<16x32xf32>
    %185 = vector.shape_cast %184 : vector<16x32xf32> to vector<2x8x32xf32>
    %186 = arith.truncf %185 : vector<2x8x32xf32> to vector<2x8x32xbf16>
    %187 = arith.truncf %92 : vector<2x8x32xf32> to vector<2x8x32xbf16>
    %cst_45 = arith.constant dense<0.000000e+00> : vector<2x8x8xf32>
    %188 = tpu.matmul %186, %187, %cst_45 {dimension_numbers = #tpu.dot_dimension_numbers<[2], [2], [1], [1], [0, 0, 0, 1, 1, 1], [0], [0]>} : vector<2x8x32xbf16>, vector<2x8x32xbf16>, vector<2x8x8xf32> -> vector<2x8x8xf32>
    %189 = arith.addf %183, %188 : vector<2x8x8xf32>
    %cst_46 = arith.constant dense<0xFF800000> : vector<2x8xf32>
    %190 = vector.multi_reduction <maximumf>, %189, %cst_46 [2] : vector<2x8x8xf32> to vector<2x8xf32>
    %191 = vector.shape_cast %190 : vector<2x8xf32> to vector<2x8x1xf32>
    %192 = vector.broadcast %191 : vector<2x8x1xf32> to vector<2x8x8xf32>
    %193 = arith.subf %189, %192 : vector<2x8x8xf32>
    %194 = math.exp %193 : vector<2x8x8xf32>
    %cst_47 = arith.constant dense<0.000000e+00> : vector<2x8xf32>
    %195 = vector.multi_reduction <add>, %194, %cst_47 [2] : vector<2x8x8xf32> to vector<2x8xf32>
    %196 = vector.shape_cast %195 : vector<2x8xf32> to vector<2x8x1xf32>
    %197 = tpu.reciprocal %196 {approx = true} : vector<2x8x1xf32> -> vector<2x8x1xf32>
    %198 = vector.broadcast %197 : vector<2x8x1xf32> to vector<2x8x8xf32>
    %199 = arith.mulf %194, %198 : vector<2x8x8xf32>
    %200 = vector.shape_cast %91 : vector<16x32xf32> to vector<2x8x32xf32>
    %201 = arith.truncf %199 : vector<2x8x8xf32> to vector<2x8x8xbf16>
    %202 = arith.truncf %200 : vector<2x8x32xf32> to vector<2x8x32xbf16>
    %cst_48 = arith.constant dense<0.000000e+00> : vector<2x8x32xf32>
    %203 = tpu.matmul %201, %202, %cst_48 {dimension_numbers = #tpu.dot_dimension_numbers<[2], [1], [1], [2], [0, 0, 0, 1, 1, 2], [0], [0]>} : vector<2x8x8xbf16>, vector<2x8x32xbf16>, vector<2x8x32xf32> -> vector<2x8x32xf32>
    %204 = vector.shape_cast %203 : vector<2x8x32xf32> to vector<16x32xf32>
    %205 = tpu.concatenate %120, %148, %176, %204 in 1 : vector<16x32xf32>, vector<16x32xf32>, vector<16x32xf32>, vector<16x32xf32> -> vector<16x128xf32>
    %c0_49 = arith.constant 0 : index
    %c0_50 = arith.constant 0 : index
    %206 = vector.load %arg8[%c0_49, %c0_50] : memref<128x128xbf16, #tpu.memory_space<vmem>>, vector<128x128xbf16>
    %207 = arith.truncf %205 : vector<16x128xf32> to vector<16x128xbf16>
    %cst_51 = arith.constant dense<0.000000e+00> : vector<16x128xf32>
    %208 = tpu.matmul %207, %206, %cst_51 {dimension_numbers = #tpu.dot_dimension_numbers<[1], [0], [0], [1], [0, 0, 1, 1], [], []>} : vector<16x128xbf16>, vector<128x128xbf16>, vector<16x128xf32> -> vector<16x128xf32>
    %c32_i32_52 = arith.constant 32 : i32
    %209 = vector.broadcast %c32_i32_52 : i32 to vector<1x128xi32>
    %210 = arith.cmpi slt, %0, %209 : vector<1x128xi32>
    %211 = math.cos %208 : vector<16x128xf32>
    %212 = math.sin %208 : vector<16x128xf32>
    %213 = vector.shape_cast %210 : vector<1x128xi1> to vector<1x128xi1>
    %214 = vector.broadcast %213 : vector<1x128xi1> to vector<16x128xi1>
    %215 = arith.select %214, %211, %212 : vector<16x128xi1>, vector<16x128xf32>
    %c64_i32_53 = arith.constant 64 : i32
    %216 = vector.broadcast %c64_i32_53 : i32 to vector<1x128xi32>
    %217 = arith.cmpi slt, %0, %216 : vector<1x128xi32>
    %cst_54 = arith.constant 5.000000e-01 : f32
    %218 = vector.broadcast %cst_54 : f32 to vector<16x128xf32>
    %219 = arith.mulf %218, %208 : vector<16x128xf32>
    %220 = arith.mulf %208, %208 : vector<16x128xf32>
    %221 = arith.mulf %220, %208 : vector<16x128xf32>
    %cst_55 = arith.constant 4.471500e-02 : f32
    %222 = vector.broadcast %cst_55 : f32 to vector<16x128xf32>
    %223 = arith.mulf %222, %221 : vector<16x128xf32>
    %224 = arith.addf %208, %223 : vector<16x128xf32>
    %cst_56 = arith.constant 0.797884583 : f32
    %225 = vector.broadcast %cst_56 : f32 to vector<16x128xf32>
    %226 = arith.mulf %225, %224 : vector<16x128xf32>
    %227 = math.tanh %226 : vector<16x128xf32>
    %cst_57 = arith.constant 1.000000e+00 : f32
    %228 = vector.broadcast %cst_57 : f32 to vector<16x128xf32>
    %229 = arith.addf %228, %227 : vector<16x128xf32>
    %230 = arith.mulf %219, %229 : vector<16x128xf32>
    %231 = vector.shape_cast %217 : vector<1x128xi1> to vector<1x128xi1>
    %232 = vector.broadcast %231 : vector<1x128xi1> to vector<16x128xi1>
    %233 = arith.select %232, %215, %230 : vector<16x128xi1>, vector<16x128xf32>
    %c0_58 = arith.constant 0 : index
    %c0_59 = arith.constant 0 : index
    %234 = vector.load %arg9[%c0_58, %c0_59] : memref<1x128xf32, #tpu.memory_space<vmem>>, vector<1x128xf32>
    %235 = vector.broadcast %234 : vector<1x128xf32> to vector<16x128xf32>
    %236 = arith.mulf %233, %235 : vector<16x128xf32>
    %237 = arith.addf %236, %1 : vector<16x128xf32>
    %238 = arith.mulf %237, %237 : vector<16x128xf32>
    %cst_60 = arith.constant dense<0.000000e+00> : vector<16xf32>
    %239 = vector.multi_reduction <add>, %238, %cst_60 [1] : vector<16x128xf32> to vector<16xf32>
    %240 = vector.shape_cast %239 : vector<16xf32> to vector<16x1xf32>
    %cst_61 = arith.constant 1.280000e+02 : f32
    %241 = vector.broadcast %cst_61 : f32 to vector<16x1xf32>
    %242 = arith.divf %240, %241 : vector<16x1xf32>
    %cst_62 = arith.constant 9.99999997E-7 : f32
    %243 = vector.broadcast %cst_62 : f32 to vector<16x1xf32>
    %244 = arith.addf %242, %243 : vector<16x1xf32>
    %245 = math.rsqrt %244 : vector<16x1xf32>
    %246 = vector.broadcast %245 : vector<16x1xf32> to vector<16x128xf32>
    %247 = arith.mulf %237, %246 : vector<16x128xf32>
    %c0_63 = arith.constant 0 : index
    %c0_64 = arith.constant 0 : index
    %248 = vector.load %arg10[%c0_63, %c0_64] : memref<128x256xbf16, #tpu.memory_space<vmem>>, vector<128x256xbf16>
    %249 = arith.truncf %247 : vector<16x128xf32> to vector<16x128xbf16>
    %cst_65 = arith.constant dense<0.000000e+00> : vector<16x256xf32>
    %250 = tpu.matmul %249, %248, %cst_65 {dimension_numbers = #tpu.dot_dimension_numbers<[1], [0], [0], [1], [0, 0, 1, 1], [], []>} : vector<16x128xbf16>, vector<128x256xbf16>, vector<16x256xf32> -> vector<16x256xf32>
    %c0_66 = arith.constant 0 : index
    %c0_67 = arith.constant 0 : index
    %251 = vector.load %arg11[%c0_66, %c0_67] : memref<1x256xf32, #tpu.memory_space<vmem>>, vector<1x256xf32>
    %252 = vector.broadcast %251 : vector<1x256xf32> to vector<16x256xf32>
    %253 = arith.addf %250, %252 : vector<16x256xf32>
    %cst_68 = arith.constant 5.000000e-01 : f32
    %254 = vector.broadcast %cst_68 : f32 to vector<16x256xf32>
    %255 = arith.mulf %254, %253 : vector<16x256xf32>
    %256 = arith.mulf %253, %253 : vector<16x256xf32>
    %257 = arith.mulf %256, %253 : vector<16x256xf32>
    %cst_69 = arith.constant 4.471500e-02 : f32
    %258 = vector.broadcast %cst_69 : f32 to vector<16x256xf32>
    %259 = arith.mulf %258, %257 : vector<16x256xf32>
    %260 = arith.addf %253, %259 : vector<16x256xf32>
    %cst_70 = arith.constant 0.797884583 : f32
    %261 = vector.broadcast %cst_70 : f32 to vector<16x256xf32>
    %262 = arith.mulf %261, %260 : vector<16x256xf32>
    %263 = math.tanh %262 : vector<16x256xf32>
    %cst_71 = arith.constant 1.000000e+00 : f32
    %264 = vector.broadcast %cst_71 : f32 to vector<16x256xf32>
    %265 = arith.addf %264, %263 : vector<16x256xf32>
    %266 = arith.mulf %255, %265 : vector<16x256xf32>
    %c0_72 = arith.constant 0 : index
    %c0_73 = arith.constant 0 : index
    %267 = vector.load %arg12[%c0_72, %c0_73] : memref<256x128xbf16, #tpu.memory_space<vmem>>, vector<256x128xbf16>
    %268 = arith.truncf %266 : vector<16x256xf32> to vector<16x256xbf16>
    %cst_74 = arith.constant dense<0.000000e+00> : vector<16x128xf32>
    %269 = tpu.matmul %268, %267, %cst_74 {dimension_numbers = #tpu.dot_dimension_numbers<[1], [0], [0], [1], [0, 0, 1, 1], [], []>} : vector<16x256xbf16>, vector<256x128xbf16>, vector<16x128xf32> -> vector<16x128xf32>
    %270 = arith.addf %237, %269 : vector<16x128xf32>
    %c0_75 = arith.constant 0 : index
    %c0_76 = arith.constant 0 : index
    %271 = vector.load %arg13[%c0_75, %c0_76] : memref<1x128xf32, #tpu.memory_space<vmem>>, vector<1x128xf32>
    %272 = vector.broadcast %271 : vector<1x128xf32> to vector<16x128xf32>
    %273 = arith.addf %270, %272 : vector<16x128xf32>
    %c0_77 = arith.constant 0 : index
    %c0_78 = arith.constant 0 : index
    %274 = vector.load %arg14[%c0_77, %c0_78] : memref<16x128xf32, #tpu.memory_space<vmem>>, vector<16x128xf32>
    tpu.vector_store %arg14[%c0_77, %c0_78], %273 {strides = array<i32>} : memref<16x128xf32, #tpu.memory_space<vmem>>, vector<16x128xf32>,
    return
  }
  func.func @transform_0(%arg0: i32) -> (i32, i32) {
    %c0_i32 = arith.constant 0 : i32
    %c0_i32_0 = arith.constant 0 : i32
    return %arg0, %c0_i32 : i32, i32
  }
  func.func @transform_1(%arg0: i32) -> (i32, i32) {
    %c0_i32 = arith.constant 0 : i32
    %c0_i32_0 = arith.constant 0 : i32
    %c0_i32_1 = arith.constant 0 : i32
    return %c0_i32, %c0_i32_0 : i32, i32
  }
  func.func @transform_2(%arg0: i32) -> (i32, i32) {
    %c0_i32 = arith.constant 0 : i32
    %c0_i32_0 = arith.constant 0 : i32
    %c0_i32_1 = arith.constant 0 : i32
    return %c0_i32, %c0_i32_0 : i32, i32
  }
  func.func @transform_3(%arg0: i32) -> (i32, i32) {
    %c0_i32 = arith.constant 0 : i32
    %c0_i32_0 = arith.constant 0 : i32
    %c0_i32_1 = arith.constant 0 : i32
    return %c0_i32, %c0_i32_0 : i32, i32
  }
  func.func @transform_4(%arg0: i32) -> (i32, i32) {
    %c0_i32 = arith.constant 0 : i32
    %c0_i32_0 = arith.constant 0 : i32
    %c0_i32_1 = arith.constant 0 : i32
    return %c0_i32, %c0_i32_0 : i32, i32
  }
  func.func @transform_5(%arg0: i32) -> (i32, i32) {
    %c0_i32 = arith.constant 0 : i32
    %c0_i32_0 = arith.constant 0 : i32
    %c0_i32_1 = arith.constant 0 : i32
    return %c0_i32, %c0_i32_0 : i32, i32
  }
  func.func @transform_6(%arg0: i32) -> (i32, i32) {
    %c0_i32 = arith.constant 0 : i32
    %c0_i32_0 = arith.constant 0 : i32
    %c0_i32_1 = arith.constant 0 : i32
    return %c0_i32, %c0_i32_0 : i32, i32
  }
  func.func @transform_7(%arg0: i32) -> (i32, i32) {
    %c0_i32 = arith.constant 0 : i32
    %c0_i32_0 = arith.constant 0 : i32
    %c0_i32_1 = arith.constant 0 : i32
    return %c0_i32, %c0_i32_0 : i32, i32
  }
  func.func @transform_8(%arg0: i32) -> (i32, i32) {
    %c0_i32 = arith.constant 0 : i32
    %c0_i32_0 = arith.constant 0 : i32
    %c0_i32_1 = arith.constant 0 : i32
    return %c0_i32, %c0_i32_0 : i32, i32
  }
  func.func @transform_9(%arg0: i32) -> (i32, i32) {
    %c0_i32 = arith.constant 0 : i32
    %c0_i32_0 = arith.constant 0 : i32
    %c0_i32_1 = arith.constant 0 : i32
    return %c0_i32, %c0_i32_0 : i32, i32
  }
  func.func @transform_10(%arg0: i32) -> (i32, i32) {
    %c0_i32 = arith.constant 0 : i32
    %c0_i32_0 = arith.constant 0 : i32
    %c0_i32_1 = arith.constant 0 : i32
    return %c0_i32, %c0_i32_0 : i32, i32
  }
  func.func @transform_11(%arg0: i32) -> (i32, i32) {
    %c0_i32 = arith.constant 0 : i32
    %c0_i32_0 = arith.constant 0 : i32
    %c0_i32_1 = arith.constant 0 : i32
    return %c0_i32, %c0_i32_0 : i32, i32
  }
  func.func @transform_12(%arg0: i32) -> (i32, i32) {
    %c0_i32 = arith.constant 0 : i32
    %c0_i32_0 = arith.constant 0 : i32
    %c0_i32_1 = arith.constant 0 : i32
    return %c0_i32, %c0_i32_0 : i32, i32
  }
  func.func @transform_13(%arg0: i32) -> (i32, i32) {
    %c0_i32 = arith.constant 0 : i32
    %c0_i32_0 = arith.constant 0 : i32
    return %arg0, %c0_i32 : i32, i32
  }
}

</mosaic_0001>

<bundles_post_ra>
// kernel: tpu_custom_call.1
= control target key start
LH: loop header
LB: loop body
LE: loop exit
PB: predicated region body
PF: predicated region fallthrough
CT: control target
= control target key end

     0   :  { %18 = vsyncpa [#allocation3], 0  ;;  %s5998_s0 = inlined_call_operand.hbm [shape: f32[16,128], index: 0, kind: input, shape index: {}]   ;;  %s5999_s1 = inlined_call_operand.hbm [shape: bf16[128,128], index: 1, kind: input, shape index: {}]   ;;  %s6000_s2 = inlined_call_operand.hbm [shape: bf16[128,768], index: 2, kind: input, shape index: {}]   ;;  %s6001_s3 = inlined_call_operand.hbm [shape: f32[16,128], index: 3, kind: input, shape index: {}]   ;;  %s6002_s4 = inlined_call_operand.hbm [shape: f32[16,128], index: 4, kind: input, shape index: {}]   ;;  %s6003_s5 = inlined_call_operand.vmem [shape: f32[16,32], index: 5, kind: input, shape index: {}]   ;;  %s6004_s6 = inlined_call_operand.hbm [shape: f32[16,32], index: 6, kind: input, shape index: {}]   ;;  %s6005_s7 = inlined_call_operand.hbm [shape: bf16[128,128], index: 7, kind: input, shape index: {}]   ;;  %s6006_s8 = inlined_call_operand.vmem [shape: f32[1,128], index: 8, kind: input, shape index: {}]   ;;  %s6007_s9 = inlined_call_operand.hbm [shape: bf16[128,256], index: 9, kind: input, shape index: {}]   ;;  %s6008_s10 = inlined_call_operand.vmem [shape: f32[1,256], index: 10, kind: input, shape index: {}]   ;;  %s6009_s11 = inlined_call_operand.hbm [shape: bf16[256,128], index: 11, kind: input, shape index: {}]   ;;  %s6010_s12 = inlined_call_operand.vmem [shape: f32[1,128], index: 12, kind: input, shape index: {}]   ;;  %s6011_s13 = inlined_call_operand.hbm [shape: f32[16,128], index: 13, kind: output, shape index: {}]  }
   0x1   :  { %19 = vsyncpa [#allocation6], 0 }
   0x2   :  { %20 = vsyncpa [#allocation9], 0 }
   0x3   :  { %21 = vsyncpa [#allocation12], 0 }
   0x4   :  { %22 = vsyncpa [#allocation15], 0 }
   0x5   :  { %23 = vsyncpa [#allocation4], 0  ;;  %s4921_s25 = smov [#allocation5]   ;;  %s4689_s29 = scalar_lea.hbm %s5999_s1, 1024 }
   0x6   :  { %s41_s26 = sshll.u32 %s4921_s25, 4  ;;  %p4690_p0 = scmp.ne.s32.totalorder %s5999_s1, %s4689_s29  ;;  %s42_s26 = int_to_ptr.vmem [resolvable:$true] %s41_s26 }
   0x7   :  { %p4693_p1 = scmp.lt.u32.totalorder %s4689_s29, %s5999_s1 }
   0x9   :  { %p4695_p2 = pnand %p4693_p1, %p4690_p0 }
   0xb   :  { %4698 = shalt.err (!%p4695_p2)
}
   0xc   :  { %s4699_s17 = scalar_lea.vmem %s42_s26, 1024  ;;  %p4704_p4 = scmp.lt.s32.totalorder %s42_s26, %s42_s26 }
   0xd   :  { %p4700_p3 = scmp.ne.s32.totalorder %s42_s26, %s4699_s17  ;;  %p4705_p5 = scmp.lt.s32.totalorder %s4699_s17, %s4699_s17 }
   0xf   :  { %p4706_p6 = por %p4705_p5, %p4704_p4 }
  0x11   :  { %p4707_p7 = pnand %p4706_p6, %p4700_p3 }
  0x13   :  { %4710 = shalt.err (!%p4707_p7)
}
  0x14   :  { %s4922_s18 = smov 64   ;;  %s4923_s19 = smov 4  }
  0x15   :  { %47 = dma.hbm_to_vmem [thread:$0]  %s5999_s1, 1024, %s42_s26, [#allocation6], %s4922_s18, %s4922_s18, %s4923_s19  }
  0x16   :  { %s4924_s22 = smov [#allocation8]   ;;  %s4925_s24 = smov [#allocation11]  }
  0x17   :  { %s65_s23 = sshll.u32 %s4924_s22, 4  ;;  %s91_s25 = sshll.u32 %s4925_s24, 4  ;;  %s66_s23 = int_to_ptr.vmem [resolvable:$true] %s65_s23  ;;  %s92_s25 = int_to_ptr.vmem [resolvable:$true] %s91_s25 }
  0x18   :  { %s4711_s29 = scalar_lea.hbm %s6001_s3, 256 }
  0x19   :  { %p4712_p8 = scmp.ne.s32.totalorder %s6001_s3, %s4711_s29  ;;  %p4715_p9 = scmp.lt.u32.totalorder %s4711_s29, %s6001_s3 }
  0x1b   :  { %p4717_p10 = pnand %p4715_p9, %p4712_p8 }
  0x1d   :  { %4720 = shalt.err (!%p4717_p10)
}
  0x1e   :  { %s4721_s1 = scalar_lea.vmem %s66_s23, 256  ;;  %p4726_p12 = scmp.lt.s32.totalorder %s66_s23, %s66_s23 }
  0x1f   :  { %p4722_p11 = scmp.ne.s32.totalorder %s66_s23, %s4721_s1  ;;  %p4727_p13 = scmp.lt.s32.totalorder %s4721_s1, %s4721_s1 }
  0x21   :  { %p4728_p0 = por %p4727_p13, %p4726_p12 }
  0x23   :  { %p4729_p1 = pnand %p4728_p0, %p4722_p11 }
  0x25   :  { %4732 = shalt.err (!%p4729_p1)
}
  0x26   :  { %s4926_s26 = smov 128   ;;  %s4927_s17 = smov 8  }
  0x27   :  { %71 = dma.hbm_to_vmem [thread:$0]  %s6001_s3, 256, %s66_s23, [#allocation9], %s4926_s26, %s4926_s26, %s4927_s17  }
  0x28   :  { %s4733_s27 = scalar_lea.hbm %s6004_s6, 256 }
  0x29   :  { %p4734_p2 = scmp.ne.s32.totalorder %s6004_s6, %s4733_s27  ;;  %p4737_p3 = scmp.lt.u32.totalorder %s4733_s27, %s6004_s6 }
  0x2b   :  { %p4739_p4 = pnand %p4737_p3, %p4734_p2 }
  0x2d   :  { %4742 = shalt.err (!%p4739_p4)
}
  0x2e   :  { %s4743_s15 = scalar_lea.vmem %s92_s25, 256  ;;  %p4748_p6 = scmp.lt.s32.totalorder %s92_s25, %s92_s25 }
  0x2f   :  { %p4744_p5 = scmp.ne.s32.totalorder %s92_s25, %s4743_s15  ;;  %p4749_p7 = scmp.lt.s32.totalorder %s4743_s15, %s4743_s15 }
  0x31   :  { %p4750_p8 = por %p4749_p7, %p4748_p6 }
  0x33   :  { %p4751_p9 = pnand %p4750_p8, %p4744_p5 }
  0x35   :  { %4754 = shalt.err (!%p4751_p9)
}
  0x36   :  { %97 = dma.hbm_to_vmem [thread:$0]  %s6004_s6, 256, %s92_s25, [#allocation12], %s4926_s26, %s4926_s26, %s4927_s17  }
  0x37   :  { %s4928_s16 = smov [#allocation14]   ;;  %s4929_s20 = smov [#allocation2]  }
  0x38   :  { %s117_s1 = sshll.u32 %s4928_s16, 4  ;;  %s29_s21 = sshll.u32 %s4929_s20, 4  ;;  %s118_s1 = int_to_ptr.vmem [resolvable:$true] %s117_s1  ;;  %s30_s21 = int_to_ptr.vmem [resolvable:$true] %s29_s21 }
  0x39   :  { %s4755_s27 = scalar_lea.hbm %s6007_s9, 2048 }
  0x3a   :  { %p4756_p10 = scmp.ne.s32.totalorder %s6007_s9, %s4755_s27  ;;  %p4759_p11 = scmp.lt.u32.totalorder %s4755_s27, %s6007_s9 }
  0x3c   :  { %p4761_p12 = pnand %p4759_p11, %p4756_p10 }
  0x3e   :  { %4764 = shalt.err (!%p4761_p12)
}
  0x3f   :  { %s4765_s6 = scalar_lea.vmem %s118_s1, 2048  ;;  %p4770_p0 = scmp.lt.s32.totalorder %s118_s1, %s118_s1 }
  0x40   :  { %p4766_p13 = scmp.ne.s32.totalorder %s118_s1, %s4765_s6  ;;  %p4771_p1 = scmp.lt.s32.totalorder %s4765_s6, %s4765_s6 }
  0x42   :  { %p4772_p2 = por %p4771_p1, %p4770_p0 }
  0x44   :  { %p4773_p3 = pnand %p4772_p2, %p4766_p13 }
  0x46   :  { %4776 = shalt.err (!%p4773_p3)
}
  0x47   :  { %123 = dma.hbm_to_vmem [thread:$0]  %s6007_s9, 2048, %s118_s1, [#allocation15], %s4926_s26, %s4926_s26, %s4927_s17  }
  0x48   :  { %s4777_s16 = scalar_lea.hbm %s5998_s0, 256 }
  0x49   :  { %p4778_p4 = scmp.ne.s32.totalorder %s5998_s0, %s4777_s16  ;;  %p4781_p5 = scmp.lt.u32.totalorder %s4777_s16, %s5998_s0 }
  0x4b   :  { %p4783_p6 = pnand %p4781_p5, %p4778_p4 }
  0x4d   :  { %4786 = shalt.err (!%p4783_p6)
}
  0x4e   :  { %s4787_s28 = scalar_lea.vmem %s30_s21, 256  ;;  %p4792_p8 = scmp.lt.s32.totalorder %s30_s21, %s30_s21 }
  0x4f   :  { %p4788_p7 = scmp.ne.s32.totalorder %s30_s21, %s4787_s28  ;;  %p4793_p9 = scmp.lt.s32.totalorder %s4787_s28, %s4787_s28 }
  0x51   :  { %p4794_p10 = por %p4793_p9, %p4792_p8 }
  0x53   :  { %p4795_p11 = pnand %p4794_p10, %p4788_p7 }
  0x55   :  { %4798 = shalt.err (!%p4795_p11)
}
  0x56   :  { %35 = dma.hbm_to_vmem [thread:$0]  %s5998_s0, 256, %s30_s21, [#allocation3], %s4926_s26, %s4926_s26, %s4927_s17  }
  0x57   :  { %s4930_s29 = smov [#allocation7]   ;;  %s4799_s25 = scalar_lea.hbm %s6000_s2, 6144 }
  0x58   :  { %s53_s30 = sshll.u32 %s4930_s29, 4  ;;  %p4800_p12 = scmp.ne.s32.totalorder %s6000_s2, %s4799_s25  ;;  %s54_s30 = int_to_ptr.vmem [resolvable:$true] %s53_s30 }
  0x59   :  { %p4803_p13 = scmp.lt.u32.totalorder %s4799_s25, %s6000_s2 }
  0x5b   :  { %p4805_p0 = pnand %p4803_p13, %p4800_p12 }
  0x5d   :  { %4808 = shalt.err (!%p4805_p0)
}
  0x5e   :  { %s4809_s20 = scalar_lea.vmem %s54_s30, 6144  ;;  %p4814_p2 = scmp.lt.s32.totalorder %s54_s30, %s54_s30 }
  0x5f   :  { %p4810_p1 = scmp.ne.s32.totalorder %s54_s30, %s4809_s20  ;;  %p4815_p3 = scmp.lt.s32.totalorder %s4809_s20, %s4809_s20 }
  0x61   :  { %p4816_p4 = por %p4815_p3, %p4814_p2 }
  0x63   :  { %p4817_p5 = pnand %p4816_p4, %p4810_p1 }
  0x65   :  { %4820 = shalt.err (!%p4817_p5)
}
  0x66   :  { %s4931_s0 = smov 384   ;;  %s4932_s21 = smov 24  }
  0x67   :  { %59 = dma.hbm_to_vmem [thread:$0]  %s6000_s2, 6144, %s54_s30, [#allocation6], %s4931_s0, %s4931_s0, %s4932_s21  }
  0x68   :  { %s4933_s27 = smov [#allocation10]   ;;  %s4934_s9 = smov [#allocation13]  }
  0x69   :  { %s77_s28 = sshll.u32 %s4933_s27, 4  ;;  %s103_s1 = sshll.u32 %s4934_s9, 4  ;;  %s78_s28 = int_to_ptr.vmem [resolvable:$true] %s77_s28  ;;  %s5105_s1 = int_to_ptr.vmem [resolvable:$true] %s103_s1 }
  0x6a   :  { %s4821_s6 = scalar_lea.hbm %s6002_s4, 256 }
  0x6b   :  { %p4822_p6 = scmp.ne.s32.totalorder %s6002_s4, %s4821_s6  ;;  %p4825_p7 = scmp.lt.u32.totalorder %s4821_s6, %s6002_s4 }
  0x6d   :  { %p4827_p8 = pnand %p4825_p7, %p4822_p6 }
  0x6f   :  { %4830 = shalt.err (!%p4827_p8)
}
  0x70   :  { %s4831_s2 = scalar_lea.vmem %s78_s28, 256  ;;  %p4836_p10 = scmp.lt.s32.totalorder %s78_s28, %s78_s28 }
  0x71   :  { %p4832_p9 = scmp.ne.s32.totalorder %s78_s28, %s4831_s2  ;;  %p4837_p11 = scmp.lt.s32.totalorder %s4831_s2, %s4831_s2 }
  0x73   :  { %p4838_p12 = por %p4837_p11, %p4836_p10 }
  0x75   :  { %p4839_p13 = pnand %p4838_p12, %p4832_p9 }
  0x77   :  { %4842 = shalt.err (!%p4839_p13)
}
  0x78   :  { %83 = dma.hbm_to_vmem [thread:$0]  %s6002_s4, 256, %s78_s28, [#allocation9], %s4926_s26, %s4926_s26, %s4927_s17  }
  0x79   :  { %s4843_s21 = scalar_lea.hbm %s6005_s7, 1024 }
  0x7a   :  { %p4844_p0 = scmp.ne.s32.totalorder %s6005_s7, %s4843_s21  ;;  %p4847_p1 = scmp.lt.u32.totalorder %s4843_s21, %s6005_s7 }
  0x7c   :  { %p4849_p2 = pnand %p4847_p1, %p4844_p0 }
  0x7e   :  { %4852 = shalt.err (!%p4849_p2)
}
  0x7f   :  { %s4853_s29 = scalar_lea.vmem %s5105_s1, 1024  ;;  %p4858_p4 = scmp.lt.s32.totalorder %s5105_s1, %s5105_s1 }
  0x80   :  { %p4854_p3 = scmp.ne.s32.totalorder %s5105_s1, %s4853_s29  ;;  %p4859_p5 = scmp.lt.s32.totalorder %s4853_s29, %s4853_s29 }
  0x82   :  { %p4860_p6 = por %p4859_p5, %p4858_p4 }
  0x84   :  { %p4861_p7 = pnand %p4860_p6, %p4854_p3 }
  0x86   :  { %4864 = shalt.err (!%p4861_p7)
}
  0x87   :  { %109 = dma.hbm_to_vmem [thread:$0]  %s6005_s7, 1024, %s5105_s1, [#allocation12], %s4922_s18, %s4922_s18, %s4923_s19  }
  0x88   :  { %s4935_s14 = smov [#allocation16]   ;;  %s4865_s3 = scalar_lea.hbm %s6009_s11, 2048 }
  0x89   :  { %s131_s6 = sshll.u32 %s4935_s14, 4  ;;  %p4866_p8 = scmp.ne.s32.totalorder %s6009_s11, %s4865_s3  ;;  %s132_s6 = int_to_ptr.vmem [resolvable:$true] %s131_s6 }
  0x8a   :  { %p4869_p9 = scmp.lt.u32.totalorder %s4865_s3, %s6009_s11 }
  0x8c   :  { %p4871_p10 = pnand %p4869_p9, %p4866_p8 }
  0x8e   :  { %4874 = shalt.err (!%p4871_p10)
}
  0x8f   :  { %s4875_s20 = scalar_lea.vmem %s132_s6, 2048  ;;  %p4880_p12 = scmp.lt.s32.totalorder %s132_s6, %s132_s6 }
  0x90   :  { %p4876_p11 = scmp.ne.s32.totalorder %s132_s6, %s4875_s20  ;;  %p4881_p13 = scmp.lt.s32.totalorder %s4875_s20, %s4875_s20 }
  0x92   :  { %p4882_p0 = por %p4881_p13, %p4880_p12 }
  0x94   :  { %p4883_p1 = pnand %p4882_p0, %p4876_p11 }
  0x96   :  { %4886 = shalt.err (!%p4883_p1)
}
  0x97   :  { %137 = dma.hbm_to_vmem [thread:$0]  %s6009_s11, 2048, %s132_s6, [#allocation15], %s4922_s18, %s4922_s18, %s4923_s19  }
  0x98   :  { %4909 = dma.done.wait [#allocation3], 256  }
  0x99   :  { %4910 = vsyncadd [#allocation3], 4294967040 }
  0x9a   :  { %4911 = dma.done.wait [#allocation6], 7168  }
  0x9b   :  { %4912 = vsyncadd [#allocation6], 4294960128 }
  0x9c   :  { %4913 = dma.done.wait [#allocation9], 512  }
  0x9d   :  { %4914 = vsyncadd [#allocation9], 4294966784 }
  0x9e   :  { %4915 = dma.done.wait [#allocation12], 1280  }
  0x9f   :  { %4916 = vsyncadd [#allocation12], 4294966016 }
  0xa0   :  { %4917 = dma.done.wait [#allocation15], 4096  }
  0xa1   :  { %4918 = vsyncadd [#allocation15], 4294963200  ;;  %v4936_v0 = vmov 0.0   ;;  %v170_v1 = vld [vmem:[#allocation2] sm:$0xff]  ;;  %v171_v2 = vld [vmem:[#allocation2 + $0x8] sm:$0xff]  ;;  %vm4937_vm0 = vmmov 0  }
  0xa2   :  { %4173 = vmatprep.subr.bf16.mxu0 %v4936_v0  ;;  %v172_v3 = vmul.f32 %v170_v1, %v170_v1  ;;  %v4463_v4 = vld [vmem:[#allocation5] sm:$0xff]   ;;  %v4464_v5 = vld [vmem:[#allocation5 + $0x8] sm:$0xff]   ;;  %v173_v6 = vmul.f32 %v171_v2, %v171_v2  ;;  %v4465_v7 = vld [vmem:[#allocation5 + $0x10] sm:$0xff]   ;;  %4189 = vmatprep.mubr.msk.bf16.mxu0 %vm4937_vm0, %v4936_v0  ;;  %s4938_s0 = smov 96   ;;  %v4939_v60 = vmov 0   ;;  %s4947_s29 = smov [#allocation17]  }
  0xa3   :  { %4174 = vmatpush3.bf16.msra.mxu0 %v4463_v4  ;;  %v4466_v8 = vld [vmem:[#allocation5 + $0x18] sm:$0xff]   ;;  %v4467_v9 = vld [vmem:[#allocation5 + $0x20] sm:$0xff]   ;;  %v4468_v10 = vld [vmem:[#allocation5 + $0x28] sm:$0xff]   ;;  %1095 = vmatprep.mubr.bf16.mxu1 %v4939_v60  ;;  %s3899_s4 = sshll.u32 %s4947_s29, 4  ;;  %s3900_s4 = int_to_ptr.vmem [resolvable:$true] %s3899_s4 }
  0xa4   :  { %174 = vadd.xlane.f32.xlu0 %v172_v3  ;;  %4175 = vmatprep.subr.bf16.mxu0 %v4936_v0  ;;  %v4469_v11 = vld [vmem:[#allocation5 + $0x30] sm:$0xff]   ;;  %v4470_v12 = vld [vmem:[#allocation5 + $0x38] sm:$0xff]   ;;  %v752_v13 = vld [vmem:[#allocation11] sm:$0xff]  ;;  %s4887_s28 = scalar_lea.vmem %s3900_s4, 256  ;;  %p4892_p3 = scmp.lt.s32.totalorder %s3900_s4, %s3900_s4 }
  0xa5   :  { %v740_v14 = vld [vmem:[%s6003_s5] sm:$0xff]  ;;  %v753_v15 = vld [vmem:[#allocation11 + $0x8] sm:$0xff]  ;;  %756 = vrot.lane.b32.xlu1 %v752_v13, %s4938_s0  ;;  %v4471_v27 = vld [vmem:[#allocation7 + $0x4] ss:$24 sps:$4 sm:$0xff]   ;;  %p4888_p2 = scmp.ne.s32.totalorder %s3900_s4, %s4887_s28  ;;  %p4893_p4 = scmp.lt.s32.totalorder %s4887_s28, %s4887_s28 }
  0xa6   :  { %v4473_v28 = vld [vmem:[#allocation7] ss:$24 sps:$4 sm:$0xff]   ;;  %v4476_v30 = vld [vmem:[#allocation7 + $0xc] ss:$24 sps:$4 sm:$0xff]   ;;  %1063 = vmatprep.subr.bf16.mxu1 %v4471_v27  ;;  %v4482_v32 = vld [vmem:[#allocation7 + $0x3c] ss:$24 sps:$4 sm:$0xff]  }
  0xa7   :  { %4176 = vmatpush3.bf16.msra.mxu0 %v4464_v5  ;;  %v4474_v29 = vld [vmem:[#allocation7 + $0x8] ss:$24 sps:$4 sm:$0xff]   ;;  %v4477_v31 = vld [vmem:[#allocation7 + $0x34] ss:$24 sps:$4 sm:$0xff]   ;;  %1064 = vmatpush1.bf16.msra.mxu1 %v4473_v28  ;;  %v4480_v34 = vld [vmem:[#allocation7 + $0x38] ss:$24 sps:$4 sm:$0xff]   ;;  %p4894_p5 = por %p4893_p4, %p4892_p3 }
  0xa8   :  { %176 = vadd.xlane.f32.xlu0 %v173_v6  ;;  %4177 = vmatprep.subr.bf16.mxu0 %v4936_v0  ;;  %v4479_v33 = vld [vmem:[#allocation7 + $0x30] ss:$24 sps:$4 sm:$0xff]   ;;  %v4483_v35 = vld [vmem:[#allocation7 + $0x64] ss:$24 sps:$4 sm:$0xff]   ;;  %v4485_v37 = vld [vmem:[#allocation7 + $0x60] ss:$24 sps:$4 sm:$0xff]  }
  0xa9   :  { %758 = vrot.lane.b32.xlu1 %v753_v15, %s4938_s0  ;;  %1065 = vmatprep.subr.bf16.mxu1 %v4477_v31  ;;  %v4488_v36 = vld [vmem:[#allocation7 + $0x6c] ss:$24 sps:$4 sm:$0xff]   ;;  %v4486_v38 = vld [vmem:[#allocation7 + $0x68] ss:$24 sps:$4 sm:$0xff]   ;;  %v4494_v40 = vld [vmem:[#allocation7 + $0x9c] ss:$24 sps:$4 sm:$0xff]   ;;  %p4895_p6 = pnand %p4894_p5, %p4888_p2 }
  0xaa   :  { %v4489_v39 = vld [vmem:[#allocation7 + $0x94] ss:$24 sps:$4 sm:$0xff]   ;;  %v4491_v41 = vld [vmem:[#allocation7 + $0x90] ss:$24 sps:$4 sm:$0xff]   ;;  %v4495_v43 = vld [vmem:[#allocation7 + $0xc4] ss:$24 sps:$4 sm:$0xff]  }
  0xab   :  { %4178 = vmatpush3.bf16.msra.mxu0 %v4465_v7  ;;  %1066 = vmatpush1.bf16.msra.mxu1 %v4479_v33  ;;  %v4492_v42 = vld [vmem:[#allocation7 + $0x98] ss:$24 sps:$4 sm:$0xff]   ;;  %v4500_v44 = vld [vmem:[#allocation7 + $0xcc] ss:$24 sps:$4 sm:$0xff]   ;;  %v4498_v46 = vld [vmem:[#allocation7 + $0xc8] ss:$24 sps:$4 sm:$0xff]  }
  0xac   :  { %4179 = vmatprep.subr.bf16.mxu0 %v4936_v0  ;;  %1067 = vmatprep.subr.bf16.mxu1 %v4483_v35  ;;  %v4497_v45 = vld [vmem:[#allocation7 + $0xc0] ss:$24 sps:$4 sm:$0xff]   ;;  %v4501_v47 = vld [vmem:[#allocation7 + $0xf4] ss:$24 sps:$4 sm:$0xff]   ;;  %v4503_v49 = vld [vmem:[#allocation7 + $0xf0] ss:$24 sps:$4 sm:$0xff]  }
  0xad   :  { %v4506_v48 = vld [vmem:[#allocation7 + $0xfc] ss:$24 sps:$4 sm:$0xff]   ;;  %v4504_v50 = vld [vmem:[#allocation7 + $0xf8] ss:$24 sps:$4 sm:$0xff]   ;;  %v4512_v52 = vld [vmem:[#allocation7 + $0x12c] ss:$24 sps:$4 sm:$0xff]  }
  0xae   :  { %v4507_v51 = vld [vmem:[#allocation7 + $0x124] ss:$24 sps:$4 sm:$0xff]   ;;  %v4509_v53 = vld [vmem:[#allocation7 + $0x120] ss:$24 sps:$4 sm:$0xff]   ;;  %v4513_v55 = vld [vmem:[#allocation7 + $0x154] ss:$24 sps:$4 sm:$0xff]  }
  0xaf   :  { %4180 = vmatpush3.bf16.msra.mxu0 %v4466_v8  ;;  %1068 = vmatpush1.bf16.msra.mxu1 %v4485_v37  ;;  %v4510_v54 = vld [vmem:[#allocation7 + $0x128] ss:$24 sps:$4 sm:$0xff]   ;;  %v4516_v57 = vld [vmem:[#allocation7 + $0x158] ss:$24 sps:$4 sm:$0xff]   ;;  %v4518_v58 = vld [vmem:[#allocation7 + $0x15c] ss:$24 sps:$4 sm:$0xff]  }
  0xb0   :  { %4181 = vmatprep.subr.bf16.mxu0 %v4936_v0  ;;  %1069 = vmatprep.subr.bf16.mxu1 %v4489_v39  ;;  %v4515_v56 = vld [vmem:[#allocation7 + $0x150] ss:$24 sps:$4 sm:$0xff]   ;;  %v4521_v59 = vld [vmem:[#allocation7 + $0x14] ss:$24 sps:$4 sm:$0xff]   ;;  %v4942_v28 = vmov 2131351028  }
  0xb1   :  { %v4943_v31 = vmov 2102212464   ;;  %v4945_v37 = vmov 1326507024  }
  0xb3   :  { %4182 = vmatpush3.bf16.msra.mxu0 %v4467_v9  ;;  %1070 = vmatpush1.bf16.msra.mxu1 %v4491_v41 }
  0xb4   :  { %4183 = vmatprep.subr.bf16.mxu0 %v4936_v0  ;;  %1071 = vmatprep.subr.bf16.mxu1 %v4495_v43 }
  0xb7   :  { %4184 = vmatpush3.bf16.msra.mxu0 %v4468_v10  ;;  %1072 = vmatpush1.bf16.msra.mxu1 %v4497_v45 }
  0xb8   :  { %4185 = vmatprep.subr.bf16.mxu0 %v4936_v0  ;;  %1073 = vmatprep.subr.bf16.mxu1 %v4501_v47 }
  0xbb   :  { %4186 = vmatpush3.bf16.msra.mxu0 %v4469_v11  ;;  %1074 = vmatpush1.bf16.msra.mxu1 %v4503_v49 }
  0xbc   :  { %4187 = vmatprep.subr.bf16.mxu0 %v4936_v0  ;;  %1075 = vmatprep.subr.bf16.mxu1 %v4507_v51 }
  0xbe   :  { %744 = vrot.lane.b32.xlu0 %v740_v14, %s4922_s18 }
  0xbf   :  { %4188 = vmatpush3.bf16.msra.mxu0 %v4470_v12  ;;  %1076 = vmatpush1.bf16.msra.mxu1 %v4509_v53 }
  0xc0   :  { %1106 = vmatprep.subr.bf16.mxu0 %v4476_v30  ;;  %1077 = vmatprep.subr.bf16.mxu1 %v4513_v55 }
  0xc3   :  { %1078 = vmatpush1.bf16.msra.mxu1 %v4515_v56 }
  0xc4   :  { %1149 = vmatprep.subr.bf16.mxu1 %v4521_v59 }
 0x131   :  { %v175_v16 = vpop.xlane.xlu0 %174 }
 0x132   :  { %v179_v17 = vmul.f32 0.0078125, %v175_v16 }
 0x134   :  { %v181_v18 = vadd.f32 1e-06, %v179_v17 }
 0x135   :  { %v177_v19 = vpop.xlane.xlu0 %176 }
 0x136   :  { %v180_v20 = vmul.f32 0.0078125, %v177_v19  ;;  %4591 = vrsqrt.f32 %v181_v18 }
 0x138   :  { %v182_v21 = vadd.f32 1e-06, %v180_v20 }
 0x13a   :  { %4593 = vrsqrt.f32 %v182_v21 }
 0x140   :  { %v4592_v22 = vpop.eup %4591 }
 0x141   :  { %v185_v24 = vmul.f32 %v4592_v22, %v170_v1  ;;  %v4940_v22 = vmov 683565275  }
 0x144   :  { %v4594_v23 = vpop.eup %4593 }
 0x145   :  { %v186_v25 = vmul.f32 %v4594_v23, %v171_v2 }
 0x147   :  { %v203_v26 = vpack.c.bf16 %v186_v25, %v185_v24  ;;  %v4941_v24 = vmov 2475754826  }
 0x149   :  { %4190 = vmatmul.mubr.bf16.vlgmr.msra.gmra.mrb[0].mxu0 %v203_v26 }
 0x14a   :  { %1107 = vmatpush1.bf16.msra.mxu0 %v4474_v29  ;;  %1138 = vmatprep.mubr.bf16.mxu0 %v4939_v60 }
 0x14b   :  { %1108 = vmatprep.subr.bf16.mxu0 %v4482_v32 }
 0x14e   :  { %1109 = vmatpush1.bf16.msra.mxu0 %v4480_v34  ;;  %v4944_v34 = vmov 920167782  }
 0x14f   :  { %1110 = vmatprep.subr.bf16.mxu0 %v4488_v36 }
 0x152   :  { %1111 = vmatpush1.bf16.msra.mxu0 %v4486_v38 }
 0x153   :  { %1112 = vmatprep.subr.bf16.mxu0 %v4494_v40 }
 0x156   :  { %1113 = vmatpush1.bf16.msra.mxu0 %v4492_v42 }
 0x157   :  { %1114 = vmatprep.subr.bf16.mxu0 %v4500_v44 }
 0x15a   :  { %1115 = vmatpush1.bf16.msra.mxu0 %v4498_v46 }
 0x15b   :  { %1116 = vmatprep.subr.bf16.mxu0 %v4506_v48 }
 0x15e   :  { %1117 = vmatpush1.bf16.msra.mxu0 %v4504_v50 }
 0x15f   :  { %1118 = vmatprep.subr.bf16.mxu0 %v4512_v52 }
 0x162   :  { %1119 = vmatpush1.bf16.msra.mxu0 %v4510_v54 }
 0x163   :  { %1120 = vmatprep.subr.bf16.mxu0 %v4518_v58 }
 0x166   :  { %1121 = vmatpush1.bf16.msra.mxu0 %v4516_v57 }
 0x167   :  { %4217 = vmatprep.subr.bf16.mxu0 %v4936_v0 }
 0x21c   :  { %v5176_v61 = vpop.f32.mrb[0].mxu0 }
 0x21d   :  { %v297_v62 = vand.u32 2139095040, %v5176_v61  ;;  %v4191_v63 = vpop.f32.mrb[1].mxu0  ;;  %v294_v1 = vand.u32 2147483647, %v5176_v61  ;;  %vm296_vm15 = vcmp.lt.s32.totalorder %v5176_v61, 0 }
 0x21e   :  { %v5180_v2 = vpop.f32.mrb[2].mxu0 }
 0x21f   :  { %v298_v3 = vshrl.u32 %v297_v62, 23  ;;  %v400_v4 = vand.u32 2139095040, %v5180_v2  ;;  %v4192_v5 = vpop.f32.mrb[3].mxu0  ;;  %v301_v8 = vand.u32 8388607, %v294_v1 }
 0x220   :  { %v397_v9 = vand.u32 2147483647, %v5180_v2 }
 0x221   :  { %v3923_v6 = vadd.s32 4294967169, %v298_v3  ;;  %v401_v7 = vshrl.u32 %v400_v4, 23  ;;  %v302_v13 = vor.u32 8388608, %v301_v8 }
 0x222   :  { %v5188_v15 = vand.u32 8388607, %v397_v9 }
 0x223   :  { %v304_v10 = vadd.s32 1, %v3923_v6  ;;  %v3927_v11 = vadd.s32 4294967169, %v401_v7  ;;  %v5190_v20 = vshll.u32 %v302_v13, 8 }
 0x224   :  { %v405_v26 = vor.u32 8388608, %v5188_v15 }
 0x225   :  { %vm305_vm1 = vcmp.gt.s32.totalorder %v304_v10, 0  ;;  %v407_v12 = vadd.s32 1, %v3927_v11 }
 0x226   :  { %v306_v14 = vsel %vm305_vm1, %v304_v10, 0  ;;  %vm295_vm1 = vcmp.le.f32.partialorder %v294_v1, 0.7853982 }
 0x227   :  { %v308_v16 = vand.u32 31, %v306_v14  ;;  %vm408_vm2 = vcmp.gt.s32.totalorder %v407_v12, 0  ;;  %v307_v18 = vshrl.u32 %v306_v14, 5 }
 0x228   :  { %v409_v17 = vsel %vm408_vm2, %v407_v12, 0 }
 0x229   :  { %v309_v19 = vsub.s32 32, %v308_v16  ;;  %v411_v21 = vand.u32 31, %v409_v17  ;;  %v311_v23 = vshll.u32 %v4940_v22, %v308_v16  ;;  %v314_v25 = vshll.u32 %v4941_v24, %v308_v16 }
 0x22a   :  { %v317_v30 = vshll.u32 %v4942_v28, %v308_v16  ;;  %v320_v33 = vshll.u32 %v4943_v31, %v308_v16  ;;  %v323_v36 = vshll.u32 %v4944_v34, %v308_v16  ;;  %vm326_vm3 = vcmp.lt.s32.totalorder %v307_v18, 1 }
 0x22b   :  { %v312_v27 = vshrl.u32 %v4941_v24, %v309_v19  ;;  %v315_v29 = vshrl.u32 %v4942_v28, %v309_v19  ;;  %v318_v32 = vshrl.u32 %v4943_v31, %v309_v19  ;;  %v321_v35 = vshrl.u32 %v4944_v34, %v309_v19 }
 0x22c   :  { %v324_v38 = vshrl.u32 %v4945_v37, %v309_v19  ;;  %vm329_vm4 = vcmp.lt.s32.totalorder %v307_v18, 4  ;;  %v412_v44 = vsub.s32 32, %v411_v21  ;;  %v310_v45 = vshrl.u32 %v4940_v22, %v309_v19 }
 0x22d   :  { %v313_v39 = vor.u32 %v312_v27, %v311_v23  ;;  %v316_v40 = vor.u32 %v315_v29, %v314_v25  ;;  %v319_v41 = vor.u32 %v318_v32, %v317_v30  ;;  %v322_v42 = vor.u32 %v321_v35, %v320_v33 }
 0x22e   :  { %v325_v43 = vor.u32 %v324_v38, %v323_v36  ;;  %vm327_vm5 = vcmp.lt.s32.totalorder %v307_v18, 2  ;;  %vm328_vm6 = vcmp.lt.s32.totalorder %v307_v18, 3  ;;  %v414_v57 = vshll.u32 %v4940_v22, %v411_v21 }
 0x22f   :  { %v331_v46 = vsel %vm329_vm4, %v319_v41, 2102212464  ;;  %v334_v47 = vsel %vm326_vm3, %v313_v39, %v316_v40  ;;  %v338_v48 = vsel %vm326_vm3, %v316_v40, %v319_v41  ;;  %v335_v49 = vsel %vm329_vm4, %v322_v42, 920167782 }
 0x230   :  { %v339_v50 = vsel %vm329_vm4, %v325_v43, 1326507024  ;;  %v330_v51 = vsel %vm326_vm3, %v310_v45, %v313_v39  ;;  %v332_v52 = vsel %vm328_vm6, %v316_v40, %v331_v46  ;;  %v336_v53 = vsel %vm328_vm6, %v319_v41, %v335_v49 }
 0x231   :  { %v340_v54 = vsel %vm328_vm6, %v322_v42, %v339_v50  ;;  %v337_v55 = vsel %vm327_vm5, %v334_v47, %v336_v53  ;;  %v415_v58 = vshrl.u32 %v4941_v24, %v412_v44  ;;  %v410_v4 = vshrl.u32 %v409_v17, 5 }
 0x232   :  { %v341_v56 = vsel %vm327_vm5, %v338_v48, %v340_v54  ;;  %v5211_v63 = vmul.u32.u64.low %v5190_v20, %v337_v55  ;;  %v5212_v3 = vmul.u32.u64.high %v5190_v20, %v337_v55, %v5211_v63  ;;  %v333_v5 = vsel %vm327_vm5, %v330_v51, %v332_v52 }
 0x233   :  { %v5207_v59 = vmul.u32.u64.low %v5190_v20, %v341_v56  ;;  %v5208_v62 = vmul.u32.u64.high %v5190_v20, %v341_v56, %v5207_v59  ;;  %v417_v6 = vshll.u32 %v4941_v24, %v411_v21  ;;  %v418_v7 = vshrl.u32 %v4942_v28, %v412_v44 }
 0x234   :  { %v416_v8 = vor.u32 %v415_v58, %v414_v57  ;;  %v420_v10 = vshll.u32 %v4942_v28, %v411_v21  ;;  %v421_v11 = vshrl.u32 %v4943_v31, %v412_v44  ;;  %v424_v12 = vshrl.u32 %v4944_v34, %v412_v44 }
 0x235   :  { %v419_v13 = vor.u32 %v418_v7, %v417_v6  ;;  %v423_v14 = vshll.u32 %v4943_v31, %v411_v21  ;;  %v426_v15 = vshll.u32 %v4944_v34, %v411_v21  ;;  %v427_v16 = vshrl.u32 %v4945_v37, %v412_v44 }
 0x236   :  { %vm351_vm7 = vc.u32 %v5208_v62, %v5211_v63  ;;  %v352_v17 = vadd.s32 1, %v5212_v3  ;;  %v422_v18 = vor.u32 %v421_v11, %v420_v10  ;;  %v349_v19 = vmul.u32 %v5190_v20, %v333_v5 }
 0x237   :  { %v425_v23 = vor.u32 %v424_v12, %v423_v14  ;;  %v428_v25 = vor.u32 %v427_v16, %v426_v15  ;;  %vm429_vm8 = vcmp.lt.s32.totalorder %v410_v4, 1  ;;  %v445_v29 = vshll.u32 %v405_v26, 8 }
 0x238   :  { %v353_v27 = vsel %vm351_vm7, %v352_v17, %v5212_v3  ;;  %vm430_vm9 = vcmp.lt.s32.totalorder %v410_v4, 2  ;;  %vm432_vm10 = vcmp.lt.s32.totalorder %v410_v4, 4  ;;  %v437_v21 = vsel %vm429_vm8, %v416_v8, %v419_v13 }
 0x239   :  { %v354_v30 = vadd.s32 %v353_v27, %v349_v19  ;;  %vm431_vm11 = vcmp.lt.s32.totalorder %v410_v4, 3  ;;  %v438_v32 = vsel %vm432_vm10, %v425_v23, 920167782  ;;  %v441_v33 = vsel %vm429_vm8, %v419_v13, %v422_v18 }
 0x23a   :  { %v442_v35 = vsel %vm432_vm10, %v428_v25, 1326507024  ;;  %v434_v38 = vsel %vm432_vm10, %v422_v18, 2102212464  ;;  %v439_v39 = vsel %vm431_vm11, %v422_v18, %v438_v32  ;;  %v413_v40 = vshrl.u32 %v4940_v22, %v412_v44 }
 0x23b   :  { %v355_v36 = vadd.s32 536870912, %v354_v30  ;;  %v443_v20 = vsel %vm431_vm11, %v425_v23, %v442_v35  ;;  %v440_v41 = vsel %vm430_vm9, %v437_v21, %v439_v39  ;;  %v435_v47 = vsel %vm431_vm11, %v419_v13, %v434_v38 }
 0x23c   :  { %v444_v26 = vsel %vm430_vm9, %v441_v33, %v443_v20  ;;  %v433_v46 = vsel %vm429_vm8, %v413_v40, %v416_v8  ;;  %v5237_v48 = vmul.u32.u64.low %v445_v29, %v440_v41  ;;  %v5238_v49 = vmul.u32.u64.high %v445_v29, %v440_v41, %v5237_v48 }
 0x23d   :  { %v356_v42 = vshrl.u32 %v355_v36, 30  ;;  %v5233_v43 = vmul.u32.u64.low %v445_v29, %v444_v26  ;;  %v5234_v45 = vmul.u32.u64.high %v445_v29, %v444_v26, %v5233_v43  ;;  %v436_v52 = vsel %vm430_vm9, %v433_v46, %v435_v47 }
 0x23e   :  { %v716_v44 = vmul.f32 %v5176_v61, %v5176_v61  ;;  %v455_v53 = vadd.s32 1, %v5238_v49  ;;  %v452_v55 = vmul.u32 %v445_v29, %v436_v52  ;;  %v350_v11 = vadd.s32 %v5211_v63, %v5208_v62 }
 0x23f   :  { %v357_v50 = vshll.u32 %v356_v42, 30  ;;  %vm454_vm12 = vc.u32 %v5234_v45, %v5237_v48  ;;  %v717_v27 = vmul.f32 %v5180_v2, %v5180_v2  ;;  %v380_v38 = vsub.s32 4, %v356_v42 }
 0x240   :  { %v456_v56 = vsel %vm454_vm12, %v455_v53, %v5238_v49  ;;  %v718_v58 = vmul.f32 %v716_v44, %v5176_v61  ;;  %v453_v41 = vadd.s32 %v5237_v48, %v5234_v45  ;;  %v168_v44 = vlaneseq }
 0x241   :  { %v358_v51 = vsub.s32 %v354_v30, %v357_v50  ;;  %v457_v59 = vadd.s32 %v456_v56, %v452_v55  ;;  %v719_v63 = vmul.f32 %v717_v27, %v5180_v2  ;;  %v381_v47 = vsel %vm296_vm15, %v380_v38, %v356_v42  ;;  %v757_v38 = vpop.permute.xlu1 %756 }
 0x242   :  { %v720_v4 = vmul.f32 0.044715, %v718_v58  ;;  %v5263_v1 = vand.u32 127, %v168_v44  ;;  %vm399_vm4 = vcmp.lt.s32.totalorder %v5180_v2, 0  ;;  %vm5272_vm7 = vcmp.le.f32.partialorder %v397_v9, 0.7853982 }
 0x243   :  { %v360_v54 = vsub.s32 0, %v358_v51  ;;  %v458_v5 = vadd.s32 536870912, %v457_v59  ;;  %v721_v40 = vmul.f32 0.044715, %v719_v63 }
 0x244   :  { %v722_v14 = vadd.f32 %v720_v4, %v5176_v61  ;;  %vm293_vm2 = vcmp.lt.s32.totalorder %v5263_v1, 16  ;;  %vm713_vm3 = vcmp.lt.s32.totalorder %v5263_v1, 64  ;;  %vm712_vm12 = vcmp.lt.s32.totalorder %v5263_v1, 32  ;;  %v4571_v1 = vld [vmem:[#allocation14 + $0x64] ss:$8 sps:$4 sm:$0xff]  }
 0x245   :  { %v3924_v57 = vmin.u32 %v360_v54, %v358_v51  ;;  %v5247_v7 = vshrl.u32 %v458_v5, 30  ;;  %v723_v53 = vadd.f32 %v721_v40, %v5180_v2  ;;  %v383_v54 = vsel %vm295_vm1, 0, %v381_v47 }
 0x246   :  { %v724_v29 = vmul.f32 0.7978846, %v722_v14  ;;  %v4533_v14 = vld [vmem:[#allocation7 + $0xd4] ss:$24 sps:$4 sm:$0xff]  }
 0x247   :  { %v362_v3 = vclz %v3924_v57  ;;  %v460_v10 = vshll.u32 %v5247_v7, 30  ;;  %v593_v57 = vadd.s32 3, %v383_v54  ;;  %v725_v58 = vmul.f32 0.7978846, %v723_v53 }
 0x248   :  { %4595 = vtanh.f32 %v724_v29  ;;  %v483_v4 = vsub.s32 4, %v5247_v7 }
 0x249   :  { %v3925_v6 = vadd.s32 4294967294, %v362_v3  ;;  %v461_v15 = vsub.s32 %v457_v59, %v460_v10  ;;  %v387_v3 = vand.u32 3, %v383_v54  ;;  %v714_v10 = vmul.f32 0.5, %v5176_v61 }
 0x24b   :  { %vm3926_vm13 = vcmp.lt.s32.totalorder %v3925_v6, 0  ;;  %v463_v19 = vsub.s32 0, %v461_v15  ;;  %vm388_vm5 = vcmp.lt.s32.totalorder %v387_v3, 2  ;;  %vm389_vm6 = vcmp.eq.s32.totalorder %v387_v3, 0 }
 0x24c   :  { %v365_v8 = vsel %vm3926_vm13, 0, %v3925_v6  ;;  %vm392_vm8 = vcmp.eq.s32.totalorder %v387_v3, 2  ;;  %vm386_vm13 = vweird.f32 %v5176_v61 }
 0x24d   :  { %v366_v12 = vsub.s32 32, %v365_v8  ;;  %v370_v13 = vsub.s32 4294967266, %v365_v8  ;;  %v367_v16 = vshll.u32 %v358_v51, %v365_v8  ;;  %v3928_v30 = vmin.u32 %v463_v19, %v461_v15 }
 0x24e   :  { %v594_v8 = vand.u32 3, %v593_v57 }
 0x24f   :  { %v368_v17 = vshrl.u32 %v350_v11, %v366_v12  ;;  %v371_v18 = vadd.s32 127, %v370_v13  ;;  %v465_v32 = vclz %v3928_v30 }
 0x250   :  { %vm595_vm9 = vcmp.lt.s32.totalorder %v594_v8, 2  ;;  %vm599_vm10 = vcmp.eq.s32.totalorder %v594_v8, 2  ;;  %vm596_vm11 = vcmp.eq.s32.totalorder %v594_v8, 0 }
 0x251   :  { %v369_v23 = vor.u32 %v368_v17, %v367_v16  ;;  %v372_v25 = vshll.u32 %v371_v18, 23  ;;  %v3929_v35 = vadd.s32 4294967294, %v465_v32  ;;  %v484_v18 = vsel %vm399_vm4, %v483_v4, %v5247_v7  ;;  %v4524_v4 = vld [vmem:[#allocation7 + $0x44] ss:$24 sps:$4 sm:$0xff]  }
 0x252   :  { %v4596_v48 = vpop.eup %4595  ;;  %v486_v30 = vsel %vm5272_vm7, 0, %v484_v18  ;;  %v4539_v18 = vld [vmem:[#allocation7 + $0x134] ss:$24 sps:$4 sm:$0xff]  }
 0x253   :  { %v373_v21 = vor.u32 4788187, %v372_v25  ;;  %v376_v62 = vcvt.s32.f32 %v369_v23  ;;  %vm3930_vm14 = vcmp.lt.s32.totalorder %v3929_v35, 0  ;;  %v728_v5 = vadd.f32 1.0, %v4596_v48 }
 0x254   :  { %v468_v20 = vsel %vm3930_vm14, 0, %v3929_v35  ;;  %v697_v35 = vadd.s32 3, %v486_v30  ;;  %v490_v40 = vand.u32 3, %v486_v30 }
 0x255   :  { %v374_v33 = vand.u32 2147483647, %v373_v21  ;;  %v469_v26 = vsub.s32 32, %v468_v20  ;;  %v473_v43 = vsub.s32 4294967266, %v468_v20  ;;  %v470_v50 = vshll.u32 %v461_v15, %v468_v20 }
 0x256   :  { %v730_v13 = vmul.f32 %v728_v5, %v714_v10  ;;  %vm495_vm14 = vcmp.eq.s32.totalorder %v490_v40, 2  ;;  %v4519_v5 = vld [vmem:[#allocation7 + $0x10] ss:$24 sps:$4 sm:$0xff]   ;;  %v4522_v10 = vld [vmem:[#allocation7 + $0x40] ss:$24 sps:$4 sm:$0xff]  }
 0x257   :  { %v377_v36 = vmul.f32 %v376_v62, %v374_v33  ;;  %v471_v51 = vshrl.u32 %v453_v41, %v469_v26  ;;  %v474_v52 = vadd.s32 127, %v473_v43  ;;  %v698_v41 = vand.u32 3, %v697_v35  ;;  %v741_v43 = vld [vmem:[%s6003_s5 + $0x8] sm:$0xff]  ;;  %s4946_s5 = smov 32  }
 0x258   :  { %v734_v63 = vsel %vm713_vm3, %v730_v13, %v5176_v61  ;;  %v4528_v13 = vld [vmem:[#allocation7 + $0xa0] ss:$24 sps:$4 sm:$0xff]  }
 0x259   :  { %v378_v39 = vxor.u32 2147483648, %v377_v36  ;;  %v472_v55 = vor.u32 %v471_v51, %v470_v50  ;;  %v475_v45 = vshll.u32 %v474_v52, 23 }
 0x25b   :  { %v379_v46 = vsel %vm296_vm15, %v378_v39, %v377_v36  ;;  %v476_v56 = vor.u32 4788187, %v475_v45  ;;  %v479_v59 = vcvt.s32.f32 %v472_v55  ;;  %vm703_vm15 = vcmp.eq.s32.totalorder %v698_v41, 2 }
 0x25c   :  { %v382_v49 = vsel %vm295_vm1, %v5176_v61, %v379_v46  ;;  %v715_v61 = vmul.f32 0.5, %v5180_v2  ;;  %vm492_vm1 = vcmp.eq.s32.totalorder %v490_v40, 0 }
 0x25d   :  { %4597 = vcosq.f32 %v382_v49  ;;  %v477_v42 = vand.u32 2147483647, %v476_v56 }
 0x25e   :  { %4599 = vsinq.f32 %v382_v49 }
 0x25f   :  { %v480_v6 = vmul.f32 %v479_v59, %v477_v42  ;;  %4601 = vtanh.f32 %v725_v58  ;;  %v759_v58 = vpop.permute.xlu1 %758 }
 0x261   :  { %v481_v11 = vxor.u32 2147483648, %v480_v6 }
 0x263   :  { %v482_v17 = vsel %vm399_vm4, %v481_v11, %v480_v6  ;;  %vm700_vm4 = vcmp.eq.s32.totalorder %v698_v41, 0  ;;  %v4527_v11 = vld [vmem:[#allocation7 + $0x74] ss:$24 sps:$4 sm:$0xff]  }
 0x264   :  { %v485_v23 = vsel %vm5272_vm7, %v5180_v2, %v482_v17  ;;  %vm489_vm7 = vweird.f32 %v5180_v2  ;;  %v4534_v17 = vld [vmem:[#allocation7 + $0x100] ss:$24 sps:$4 sm:$0xff]  }
 0x265   :  { %4603 = vcosq.f32 %v485_v23 }
 0x266   :  { %4605 = vsinq.f32 %v485_v23  ;;  %v4542_v23 = vld [vmem:[#allocation7 + $0x164] ss:$24 sps:$4 sm:$0xff]  }
 0x267   :  { %v4598_v12 = vpop.eup %4597 }
 0x268   :  { %v4600_v15 = vpop.eup %4599  ;;  %v393_v16 = vxor.u32 2147483648, %v4598_v12 }
 0x269   :  { %v390_v19 = vxor.u32 2147483648, %v4600_v15  ;;  %v4602_v36 = vpop.eup %4601 }
 0x26a   :  { %v394_v25 = vsel %vm392_vm8, %v393_v16, %v4600_v15  ;;  %v601_v27 = vsel %vm599_vm10, %v393_v16, %v4600_v15  ;;  %v729_v26 = vadd.f32 1.0, %v4602_v36  ;;  %v4531_v15 = vld [vmem:[#allocation7 + $0xd0] ss:$24 sps:$4 sm:$0xff]   ;;  %v4536_v16 = vld [vmem:[#allocation7 + $0x104] ss:$24 sps:$4 sm:$0xff]  }
 0x26b   :  { %v391_v9 = vsel %vm389_vm6, %v4598_v12, %v390_v19  ;;  %v598_v29 = vsel %vm596_vm11, %v4598_v12, %v390_v19  ;;  %vm699_vm6 = vcmp.lt.s32.totalorder %v698_v41, 2  ;;  %v4530_v12 = vld [vmem:[#allocation7 + $0xa4] ss:$24 sps:$4 sm:$0xff]   ;;  %v4537_v19 = vld [vmem:[#allocation7 + $0x130] ss:$24 sps:$4 sm:$0xff]  }
 0x26c   :  { %v395_v7 = vsel %vm388_vm5, %v391_v9, %v394_v25  ;;  %v602_v21 = vsel %vm595_vm9, %v598_v29, %v601_v27  ;;  %v731_v51 = vmul.f32 %v729_v26, %v715_v61  ;;  %vm491_vm5 = vcmp.lt.s32.totalorder %v490_v40, 2  ;;  %v4540_v25 = vld [vmem:[#allocation7 + $0x160] ss:$24 sps:$4 sm:$0xff]   ;;  %v745_v27 = vpop.permute.xlu0 %744 }
 0x26d   :  { %v396_v32 = vsel %vm386_vm13, nan, %v395_v7  ;;  %v603_v33 = vsel %vm386_vm13, nan, %v602_v21 }
 0x26e   :  { %v710_v62 = vsel %vm293_vm2, %v396_v32, %v603_v33  ;;  %v735_v59 = vsel %vm713_vm3, %v731_v51, %v5180_v2  ;;  %v4525_v2 = vld [vmem:[#allocation7 + $0x70] ss:$24 sps:$4 sm:$0xff]  }
 0x26f   :  { %v5293_v39 = vsel %vm712_vm12, %v710_v62, %v734_v63  ;;  %v4604_v46 = vpop.eup %4603 }
 0x270   :  { %v762_v20 = vmul.f32 %v757_v38, %v5293_v39  ;;  %v4606_v47 = vpop.eup %4605  ;;  %v496_v49 = vxor.u32 2147483648, %v4604_v46  ;;  %v750_v9 = vmul.f32 %v745_v27, %v5293_v39 }
 0x271   :  { %v493_v50 = vxor.u32 2147483648, %v4606_v47 }
 0x272   :  { %766 = vrot.lane.b32.xlu1 %v762_v20, %s4938_s0  ;;  %v497_v52 = vsel %vm495_vm14, %v496_v49, %v4606_v47  ;;  %v705_v53 = vsel %vm703_vm15, %v496_v49, %v4606_v47 }
 0x273   :  { %v494_v54 = vsel %vm492_vm1, %v4604_v46, %v493_v50  ;;  %v702_v55 = vsel %vm700_vm4, %v4604_v46, %v493_v50 }
 0x274   :  { %v498_v45 = vsel %vm491_vm5, %v494_v54, %v497_v52  ;;  %v706_v48 = vsel %vm699_vm6, %v702_v55, %v705_v53 }
 0x275   :  { %v499_v56 = vsel %vm489_vm7, nan, %v498_v45  ;;  %v707_v57 = vsel %vm489_vm7, nan, %v706_v48 }
 0x276   :  { %746 = vrot.lane.b32.xlu1 %v741_v43, %s4922_s18  ;;  %v711_v42 = vsel %vm293_vm2, %v499_v56, %v707_v57 }
 0x277   :  { %v739_v3 = vsel %vm712_vm12, %v711_v42, %v735_v59 }
 0x278   :  { %v822_v6 = vpack.c.bf16 %v739_v3, %v5293_v39  ;;  %v763_v8 = vmul.f32 %v759_v58, %v739_v3 }
 0x27a   :  { %1096 = vmatmul.mubr.bf16.vlgmr.msra.gmra.mrb[0].mxu1 %v822_v6  ;;  %1139 = vmatmul.mubr.bf16.vlgmr.msra.gmra.mrb[4].mxu0 %v822_v6 }
 0x27b   :  { %1150 = vmatpush1.bf16.msra.mxu1 %v4519_v5  ;;  %768 = vrot.lane.b32.xlu1 %v763_v8, %s4938_s0 }
 0x27c   :  { %1151 = vmatprep.subr.bf16.mxu1 %v4524_v4  ;;  %1181 = vmatprep.mubr.bf16.mxu1 %v4939_v60 }
 0x27d   :  { %4219 = vmatprep.mubr.msk.bf16.mxu0 %vm4937_vm0, %v4936_v0 }
 0x27f   :  { %1152 = vmatpush1.bf16.msra.mxu1 %v4522_v10 }
 0x280   :  { %1153 = vmatprep.subr.bf16.mxu1 %v4527_v11 }
 0x283   :  { %1154 = vmatpush1.bf16.msra.mxu1 %v4525_v2 }
 0x284   :  { %1155 = vmatprep.subr.bf16.mxu1 %v4530_v12 }
 0x287   :  { %1156 = vmatpush1.bf16.msra.mxu1 %v4528_v13 }
 0x288   :  { %1157 = vmatprep.subr.bf16.mxu1 %v4533_v14 }
 0x28b   :  { %1158 = vmatpush1.bf16.msra.mxu1 %v4531_v15 }
 0x28c   :  { %1159 = vmatprep.subr.bf16.mxu1 %v4536_v16 }
 0x28f   :  { %1160 = vmatpush1.bf16.msra.mxu1 %v4534_v17 }
 0x290   :  { %1161 = vmatprep.subr.bf16.mxu1 %v4539_v18 }
 0x293   :  { %1162 = vmatpush1.bf16.msra.mxu1 %v4537_v19 }
 0x294   :  { %1163 = vmatprep.subr.bf16.mxu1 %v4542_v23 }
 0x297   :  { %1164 = vmatpush1.bf16.msra.mxu1 %v4540_v25 }
 0x298   :  { %4193 = vmatprep.subr.bf16.mxu1 %v4936_v0 }
 0x29a   :  { %1182 = vmatmul.mubr.bf16.vlgmr.msra.gmra.mrb[4].mxu1 %v822_v6 }
 0x29b   :  { %4195 = vmatprep.mubr.msk.bf16.mxu1 %vm4937_vm0, %v4936_v0 }
 0x2e4   :  { %v767_v29 = vpop.permute.xlu1 %766 }
 0x2e5   :  { %v772_v30 = vadd.f32 %v767_v29, %v750_v9 }
 0x2e7   :  { %v1660_v7 = vpack.c.bf16 %v772_v30, %v772_v30 }
 0x2e8   :  { %v747_v21 = vpop.permute.xlu1 %746 }
 0x2e9   :  { %1663 = vrot.lane.b32.xlu1 %v1660_v7, %s4922_s18  ;;  %v751_v32 = vmul.f32 %v747_v21, %v739_v3 }
 0x2ed   :  { %v769_v33 = vpop.permute.xlu1 %768 }
 0x2ee   :  { %v773_v62 = vadd.f32 %v769_v33, %v751_v32 }
 0x2f0   :  { %v1661_v63 = vpack.c.bf16 %v773_v62, %v773_v62 }
 0x2f2   :  { %1713 = vrot.lane.b32.xlu1 %v1661_v63, %s4922_s18 }
 0x34d   :  { %v5321_v35 = vpop.f32.mrb[0].mxu1  ;;  %v5323_v36 = vpop.f32.mrb[4].mxu0 }
 0x34e   :  { %v1195_v38 = vand.u32 2139095040, %v5321_v35  ;;  %v5326_v20 = vpop.f32.mrb[1].mxu1  ;;  %v5328_v39 = vpop.f32.mrb[5].mxu0  ;;  %v1192_v61 = vand.u32 2147483647, %v5321_v35 }
 0x34f   :  { %v5330_v40 = vpop.f32.mrb[2].mxu1  ;;  %v5332_v26 = vpop.f32.mrb[6].mxu0 }
 0x350   :  { %v1196_v41 = vshrl.u32 %v1195_v38, 23  ;;  %v5334_v43 = vpop.f32.mrb[3].mxu1  ;;  %v5337_v47 = vpop.f32.mrb[7].mxu0  ;;  %v1199_v50 = vand.u32 8388607, %v1192_v61  ;;  %v1298_v25 = vand.u32 2139095040, %v5330_v40 }
 0x352   :  { %v3987_v46 = vadd.s32 4294967169, %v1196_v41  ;;  %v1200_v54 = vor.u32 8388608, %v1199_v50  ;;  %v1299_v63 = vshrl.u32 %v1298_v25, 23 }
 0x354   :  { %v1202_v49 = vadd.s32 1, %v3987_v46  ;;  %v1240_v15 = vshll.u32 %v1200_v54, 8  ;;  %v3991_v50 = vadd.s32 4294967169, %v1299_v63 }
 0x356   :  { %vm1203_vm2 = vcmp.gt.s32.totalorder %v1202_v49, 0 }
 0x357   :  { %v1204_v51 = vsel %vm1203_vm2, %v1202_v49, 0  ;;  %vm1665_vm2 = vcmask 261120  }
 0x358   :  { %v1206_v52 = vand.u32 31, %v1204_v51  ;;  %v1205_v55 = vshrl.u32 %v1204_v51, 5 }
 0x35a   :  { %v1207_v53 = vsub.s32 32, %v1206_v52  ;;  %v1209_v45 = vshll.u32 %v4940_v22, %v1206_v52  ;;  %v1212_v48 = vshll.u32 %v4941_v24, %v1206_v52  ;;  %v1215_v58 = vshll.u32 %v4942_v28, %v1206_v52 }
 0x35b   :  { %v1218_v59 = vshll.u32 %v4943_v31, %v1206_v52  ;;  %v1221_v5 = vshll.u32 %v4944_v34, %v1206_v52  ;;  %vm1224_vm8 = vcmp.lt.s32.totalorder %v1205_v55, 1  ;;  %vm1227_vm9 = vcmp.lt.s32.totalorder %v1205_v55, 4 }
 0x35c   :  { %v1210_v56 = vshrl.u32 %v4941_v24, %v1207_v53  ;;  %v1213_v57 = vshrl.u32 %v4942_v28, %v1207_v53  ;;  %v1216_v42 = vshrl.u32 %v4943_v31, %v1207_v53  ;;  %v1219_v3 = vshrl.u32 %v4944_v34, %v1207_v53 }
 0x35d   :  { %v1222_v6 = vshrl.u32 %v4945_v37, %v1207_v53  ;;  %v1208_v16 = vshrl.u32 %v4940_v22, %v1207_v53  ;;  %vm1226_vm10 = vcmp.lt.s32.totalorder %v1205_v55, 3  ;;  %vm1225_vm11 = vcmp.lt.s32.totalorder %v1205_v55, 2 }
 0x35e   :  { %v1211_v4 = vor.u32 %v1210_v56, %v1209_v45  ;;  %v1214_v8 = vor.u32 %v1213_v57, %v1212_v48  ;;  %v1217_v10 = vor.u32 %v1216_v42, %v1215_v58  ;;  %v1220_v11 = vor.u32 %v1219_v3, %v1218_v59 }
 0x35f   :  { %v1223_v2 = vor.u32 %v1222_v6, %v1221_v5  ;;  %v1305_v55 = vadd.s32 1, %v3991_v50  ;;  %v1295_v42 = vand.u32 2147483647, %v5330_v40 }
 0x360   :  { %v1229_v12 = vsel %vm1227_vm9, %v1217_v10, 2102212464  ;;  %v1232_v13 = vsel %vm1224_vm8, %v1211_v4, %v1214_v8  ;;  %v1236_v14 = vsel %vm1224_vm8, %v1214_v8, %v1217_v10  ;;  %v1233_v17 = vsel %vm1227_vm9, %v1220_v11, 920167782 }
 0x361   :  { %v1237_v18 = vsel %vm1227_vm9, %v1223_v2, 1326507024  ;;  %v1234_v19 = vsel %vm1226_vm10, %v1217_v10, %v1233_v17  ;;  %v1228_v27 = vsel %vm1224_vm8, %v1208_v16, %v1211_v4  ;;  %v1230_v9 = vsel %vm1226_vm10, %v1214_v8, %v1229_v12 }
 0x362   :  { %v1238_v23 = vsel %vm1226_vm10, %v1220_v11, %v1237_v18  ;;  %v1235_v29 = vsel %vm1225_vm11, %v1232_v13, %v1234_v19  ;;  %v1231_v62 = vsel %vm1225_vm11, %v1228_v27, %v1230_v9  ;;  %vm1306_vm14 = vcmp.gt.s32.totalorder %v1305_v55, 0 }
 0x363   :  { %v1239_v30 = vsel %vm1225_vm11, %v1236_v14, %v1238_v23  ;;  %v5356_v32 = vmul.u32.u64.low %v1240_v15, %v1235_v29  ;;  %v5357_v33 = vmul.u32.u64.high %v1240_v15, %v1235_v29, %v5356_v32  ;;  %v1247_v41 = vmul.u32 %v1240_v15, %v1231_v62 }
 0x364   :  { %v5353_v7 = vmul.u32.u64.low %v1240_v15, %v1239_v30  ;;  %v5354_v21 = vmul.u32.u64.high %v1240_v15, %v1239_v30, %v5353_v7  ;;  %v1307_v57 = vsel %vm1306_vm14, %v1305_v55, 0  ;;  %v1302_v4 = vand.u32 8388607, %v1295_v42 }
 0x365   :  { %v1250_v38 = vadd.s32 1, %v5357_v33  ;;  %v1309_v59 = vand.u32 31, %v1307_v57  ;;  %v1308_v8 = vshrl.u32 %v1307_v57, 5  ;;  %vm1194_vm8 = vcmp.lt.s32.totalorder %v5321_v35, 0 }
 0x366   :  { %vm1249_vm13 = vc.u32 %v5354_v21, %v5356_v32  ;;  %v1248_v30 = vadd.s32 %v5356_v32, %v5354_v21  ;;  %v1303_v7 = vor.u32 8388608, %v1302_v4  ;;  %vm5417_vm9 = vcmp.le.f32.partialorder %v1192_v61, 0.7853982 }
 0x367   :  { %v1251_v46 = vsel %vm1249_vm13, %v1250_v38, %v5357_v33  ;;  %v1310_v5 = vsub.s32 32, %v1309_v59  ;;  %v1312_v12 = vshll.u32 %v4940_v22, %v1309_v59  ;;  %v1315_v15 = vshll.u32 %v4941_v24, %v1309_v59 }
 0x368   :  { %v1252_v49 = vadd.s32 %v1251_v46, %v1247_v41  ;;  %v1318_v16 = vshll.u32 %v4942_v28, %v1309_v59  ;;  %v1321_v17 = vshll.u32 %v4943_v31, %v1309_v59  ;;  %v1324_v23 = vshll.u32 %v4944_v34, %v1309_v59 }
 0x369   :  { %v1313_v10 = vshrl.u32 %v4941_v24, %v1310_v5  ;;  %v1316_v11 = vshrl.u32 %v4942_v28, %v1310_v5  ;;  %v1319_v13 = vshrl.u32 %v4943_v31, %v1310_v5  ;;  %v1322_v14 = vshrl.u32 %v4944_v34, %v1310_v5 }
 0x36a   :  { %v1253_v51 = vadd.s32 536870912, %v1252_v49  ;;  %v1325_v18 = vshrl.u32 %v4945_v37, %v1310_v5  ;;  %vm1327_vm1 = vcmp.lt.s32.totalorder %v1308_v8, 1  ;;  %v1311_v62 = vshrl.u32 %v4940_v22, %v1310_v5 }
 0x36b   :  { %v1314_v25 = vor.u32 %v1313_v10, %v1312_v12  ;;  %v1317_v27 = vor.u32 %v1316_v11, %v1315_v15  ;;  %v1320_v9 = vor.u32 %v1319_v13, %v1318_v16  ;;  %v1323_v29 = vor.u32 %v1322_v14, %v1321_v17 }
 0x36c   :  { %v5366_v54 = vshrl.u32 %v1253_v51, 30  ;;  %v1326_v63 = vor.u32 %v1325_v18, %v1324_v23  ;;  %vm1328_vm4 = vcmp.lt.s32.totalorder %v1308_v8, 2  ;;  %vm1329_vm5 = vcmp.lt.s32.totalorder %v1308_v8, 3 }
 0x36d   :  { %v5362_v52 = vpop.f32.mrb[4].mxu1  ;;  %vm1330_vm6 = vcmp.lt.s32.totalorder %v1308_v8, 4  ;;  %v1335_v50 = vsel %vm1327_vm1, %v1314_v25, %v1317_v27  ;;  %v1339_v32 = vsel %vm1327_vm1, %v1317_v27, %v1320_v9  ;;  %v1331_v57 = vsel %vm1327_vm1, %v1311_v62, %v1314_v25 }
 0x36e   :  { %v5364_v53 = vpop.f32.mrb[5].mxu1  ;;  %v1255_v56 = vshll.u32 %v5366_v54, 30  ;;  %v1336_v51 = vsel %vm1330_vm6, %v1323_v29, 920167782  ;;  %v1343_v5 = vshll.u32 %v1303_v7, 8  ;;  %vm1297_vm1 = vcmp.lt.s32.totalorder %v5330_v40, 0 }
 0x36f   :  { %v5368_v45 = vpop.f32.mrb[6].mxu1  ;;  %v1337_v21 = vsel %vm1329_vm5, %v1320_v9, %v1336_v51 }
 0x370   :  { %v5370_v48 = vpop.f32.mrb[7].mxu1  ;;  %v1256_v58 = vsub.s32 %v1252_v49, %v1255_v56  ;;  %v1332_v49 = vsel %vm1330_vm6, %v1320_v9, 2102212464  ;;  %v1338_v59 = vsel %vm1328_vm4, %v1335_v50, %v1337_v21  ;;  %v1278_v50 = vsub.s32 4, %v5366_v54 }
 0x372   :  { %v1258_v3 = vsub.s32 0, %v1256_v58 }
 0x374   :  { %v3988_v6 = vmin.u32 %v1258_v3, %v1256_v58  ;;  %v1340_v3 = vsel %vm1330_vm6, %v1326_v63, 1326507024 }
 0x375   :  { %v1341_v10 = vsel %vm1329_vm5, %v1323_v29, %v1340_v3 }
 0x376   :  { %v1260_v2 = vclz %v3988_v6  ;;  %v1342_v11 = vsel %vm1328_vm4, %v1339_v32, %v1341_v10  ;;  %v1642_v32 = vld [vmem:[#allocation8] sm:$0xff] }
 0x377   :  { %v5399_v14 = vmul.u32.u64.low %v1343_v5, %v1342_v11  ;;  %v5400_v15 = vmul.u32.u64.high %v1343_v5, %v1342_v11, %v5399_v14  ;;  %v1644_v10 = vmul.f32 %v1642_v32, %v5362_v52 }
 0x378   :  { %v3989_v19 = vadd.s32 4294967294, %v1260_v2  ;;  %v5396_v2 = vmul.u32.u64.low %v1343_v5, %v1338_v59  ;;  %v5397_v12 = vmul.u32.u64.high %v1343_v5, %v1338_v59, %v5396_v2  ;;  %v1643_v59 = vld [vmem:[#allocation8 + $0x8] sm:$0xff] }
 0x37a   :  { %vm3990_vm15 = vcmp.lt.s32.totalorder %v3989_v19, 0  ;;  %vm1352_vm7 = vc.u32 %v5400_v15, %v5396_v2 }
 0x37b   :  { %v1263_v33 = vsel %vm3990_vm15, 0, %v3989_v19  ;;  %v1353_v19 = vadd.s32 1, %v5397_v12  ;;  %vm1284_vm15 = vweird.f32 %v5321_v35 }
 0x37c   :  { %v1264_v38 = vsub.s32 32, %v1263_v33  ;;  %v1268_v41 = vsub.s32 4294967266, %v1263_v33  ;;  %v1265_v46 = vshll.u32 %v1256_v58, %v1263_v33  ;;  %v1333_v58 = vsel %vm1329_vm5, %v1317_v27, %v1332_v49  ;;  %v1664_v27 = vpop.permute.xlu1 %1663 }
 0x37d   :  { %v1334_v16 = vsel %vm1328_vm4, %v1331_v57, %v1333_v58  ;;  %v1354_v9 = vsel %vm1352_vm7, %v1353_v19, %v5397_v12  ;;  %v5407_v7 = vsel %vm1665_vm2, %v1664_v27, 0  ;;  %v1646_v57 = vld [vmem:[#allocation10] sm:$0xff]  ;;  %vm1296_vm4 = vcmp.le.f32.partialorder %v1295_v42, 0.7853982 }
 0x37e   :  { %v1266_v55 = vshrl.u32 %v1248_v30, %v1264_v38  ;;  %v1269_v56 = vadd.s32 127, %v1268_v41  ;;  %v1350_v25 = vmul.u32 %v1343_v5, %v1334_v16  ;;  %4194 = vmatpush3.bf16.xpose.msra.mxu1 %v5407_v7  ;;  %v1647_v5 = vld [vmem:[#allocation10 + $0x8] sm:$0xff] }
 0x37f   :  { %4199 = vmatprep.subr.bf16.mxu1 %v4936_v0 }
 0x380   :  { %v1267_v6 = vor.u32 %v1266_v55, %v1265_v46  ;;  %v1270_v4 = vshll.u32 %v1269_v56, 23  ;;  %v1355_v29 = vadd.s32 %v1354_v9, %v1350_v25  ;;  %v1279_v56 = vsel %vm1194_vm8, %v1278_v50, %v5366_v54 }
 0x381   :  { %v1281_v61 = vsel %vm5417_vm9, 0, %v1279_v56  ;;  %v1648_v54 = vmul.f32 %v1646_v57, %v5364_v53 }
 0x382   :  { %v1271_v13 = vor.u32 4788187, %v1270_v4  ;;  %v1274_v18 = vcvt.s32.f32 %v1267_v6  ;;  %v1356_v33 = vadd.s32 536870912, %v1355_v29  ;;  %v1351_v6 = vadd.s32 %v5396_v2, %v5400_v15  ;;  %v1714_v2 = vpop.permute.xlu1 %1713 }
 0x383   :  { %v1285_v12 = vand.u32 3, %v1281_v61  ;;  %v1650_v19 = vadd.f32 %v1648_v54, %v1644_v10  ;;  %v5436_v53 = vsel %vm1665_vm2, %v1714_v2, 0 }
 0x384   :  { %v1272_v17 = vand.u32 2147483647, %v1271_v13  ;;  %v5412_v8 = vshrl.u32 %v1356_v33, 30  ;;  %v1645_v13 = vmul.f32 %v1643_v59, %v5368_v45 }
 0x385   :  { %vm1287_vm11 = vcmp.eq.s32.totalorder %v1285_v12, 0  ;;  %vm1290_vm13 = vcmp.eq.s32.totalorder %v1285_v12, 2  ;;  %vm1286_vm14 = vcmp.lt.s32.totalorder %v1285_v12, 2 }
 0x386   :  { %v1275_v23 = vmul.f32 %v1274_v18, %v1272_v17  ;;  %v1358_v63 = vshll.u32 %v5412_v8, 30  ;;  %v1649_v18 = vmul.f32 %v1647_v5, %v5370_v48 }
 0x388   :  { %v1276_v30 = vxor.u32 2147483648, %v1275_v23  ;;  %v1359_v46 = vsub.s32 %v1355_v29, %v1358_v63  ;;  %v1651_v15 = vadd.f32 %v1649_v18, %v1645_v13  ;;  %v5433_v29 = vpack.c.bf16 %v1650_v19, %v1650_v19 }
 0x38a   :  { %v1277_v62 = vsel %vm1194_vm8, %v1276_v30, %v1275_v23  ;;  %v1361_v49 = vsub.s32 0, %v1359_v46  ;;  %4196 = vmatmul.mubr.msk.bf16.vlgmr.msra.gmra.mrb[8].mxu1 %vm1665_vm2, %v5433_v29  ;;  %v5448_v50 = vpack.c.bf16 %v1651_v15, %v1651_v15  ;;  %vm1387_vm8 = vweird.f32 %v5330_v40 }
 0x38b   :  { %v1280_v41 = vsel %vm5417_vm9, %v5321_v35, %v1277_v62  ;;  %4200 = vmatpush3.bf16.xpose.msra.mxu1 %v5436_v53  ;;  %4201 = vmatprep.mubr.msk.bf16.mxu1 %vm4937_vm0, %v4936_v0  ;;  %vm1859_vm9 = vcmask 64512   ;;  %v1505_v15 = vand.u32 2139095040, %v5334_v43 }
 0x38c   :  { %4607 = vsinq.f32 %v1280_v41  ;;  %v3992_v51 = vmin.u32 %v1361_v49, %v1359_v46  ;;  %4205 = vmatprep.subr.bf16.mxu1 %v4936_v0 }
 0x38d   :  { %4609 = vcosq.f32 %v1280_v41 }
 0x38e   :  { %v1363_v55 = vclz %v3992_v51 }
 0x390   :  { %v3993_v21 = vadd.s32 4294967294, %v1363_v55  ;;  %v1381_v55 = vsub.s32 4, %v5412_v8 }
 0x392   :  { %vm3994_vm10 = vcmp.lt.s32.totalorder %v3993_v21, 0  ;;  %4202 = vmatmul.mubr.msk.bf16.vlgmr.msra.gmra.mrb[12].mxu1 %vm1665_vm2, %v5448_v50  ;;  %v1382_v56 = vsel %vm1297_vm1, %v1381_v55, %v5412_v8 }
 0x393   :  { %v1366_v3 = vsel %vm3994_vm10, 0, %v3993_v21  ;;  %4207 = vmatprep.mubr.msk.bf16.mxu1 %vm4937_vm0, %v4936_v0  ;;  %v1384_v21 = vsel %vm1296_vm4, 0, %v1382_v56  ;;  %v1502_v56 = vand.u32 2147483647, %v5334_v43 }
 0x394   :  { %v1367_v4 = vsub.s32 32, %v1366_v3  ;;  %v1371_v58 = vsub.s32 4294967266, %v1366_v3  ;;  %v1368_v14 = vshll.u32 %v1359_v46, %v1366_v3  ;;  %v1388_v42 = vand.u32 3, %v1384_v21 }
 0x396   :  { %v4608_v11 = vpop.eup %4607  ;;  %v1369_v16 = vshrl.u32 %v1351_v6, %v1367_v4  ;;  %v1372_v17 = vadd.s32 127, %v1371_v58  ;;  %vm1393_vm5 = vcmp.eq.s32.totalorder %v1388_v42, 2  ;;  %vm1390_vm6 = vcmp.eq.s32.totalorder %v1388_v42, 0 }
 0x397   :  { %v4610_v23 = vpop.eup %4609  ;;  %v1288_v9 = vxor.u32 2147483648, %v4608_v11  ;;  %vm1389_vm7 = vcmp.lt.s32.totalorder %v1388_v42, 2 }
 0x398   :  { %v1370_v25 = vor.u32 %v1369_v16, %v1368_v14  ;;  %v1373_v27 = vshll.u32 %v1372_v17, 23  ;;  %v1291_v30 = vxor.u32 2147483648, %v4610_v23 }
 0x399   :  { %v1289_v45 = vsel %vm1287_vm11, %v4610_v23, %v1288_v9 }
 0x39a   :  { %v1374_v52 = vor.u32 4788187, %v1373_v27  ;;  %v1377_v33 = vcvt.s32.f32 %v1370_v25  ;;  %v1292_v62 = vsel %vm1290_vm13, %v1291_v30, %v4608_v11 }
 0x39b   :  { %v1293_v38 = vsel %vm1286_vm14, %v1289_v45, %v1292_v62  ;;  %v1506_v45 = vshrl.u32 %v1505_v15, 23 }
 0x39c   :  { %v1375_v48 = vand.u32 2147483647, %v1374_v52  ;;  %v1294_v41 = vsel %vm1284_vm15, nan, %v1293_v38 }
 0x39d   :  { %v5445_v49 = vpack.c.bf16 %v1294_v41, %v1294_v41  ;;  %v1652_v11 = vmul.f32 0.037242305, %v1294_v41  ;;  %v3999_v30 = vadd.s32 4294967169, %v1506_v45 }
 0x39e   :  { %v1378_v63 = vmul.f32 %v1377_v33, %v1375_v48  ;;  %v1401_v33 = vand.u32 2139095040, %v5326_v20 }
 0x39f   :  { %1762 = vrot.lane.b32.xlu1 %v5445_v49, %s4938_s0  ;;  %v1654_v12 = vpack.c.bf16 %v1652_v11, %v1652_v11  ;;  %v1512_v48 = vadd.s32 1, %v3999_v30  ;;  %v1509_v11 = vand.u32 8388607, %v1502_v56 }
 0x3a0   :  { %v1379_v46 = vxor.u32 2147483648, %v1378_v63  ;;  %v1402_v62 = vshrl.u32 %v1401_v33, 23 }
 0x3a1   :  { %vm1513_vm10 = vcmp.gt.s32.totalorder %v1512_v48, 0 }
 0x3a2   :  { %v1380_v51 = vsel %vm1297_vm1, %v1379_v46, %v1378_v63  ;;  %v1514_v63 = vsel %vm1513_vm10, %v1512_v48, 0  ;;  %v3995_v41 = vadd.s32 4294967169, %v1402_v62  ;;  %v1398_v48 = vand.u32 2147483647, %v5326_v20 }
 0x3a3   :  { %v1383_v35 = vsel %vm1296_vm4, %v5330_v40, %v1380_v51  ;;  %v1516_v38 = vand.u32 31, %v1514_v63  ;;  %v5489_v21 = vshrl.u32 %v1514_v63, 5 }
 0x3a4   :  { %4611 = vcosq.f32 %v1383_v35  ;;  %v1408_v51 = vadd.s32 1, %v3995_v41 }
 0x3a5   :  { %4613 = vsinq.f32 %v1383_v35  ;;  %v1517_v46 = vsub.s32 32, %v1516_v38  ;;  %v1528_v42 = vshll.u32 %v4943_v31, %v1516_v38  ;;  %vm1537_vm13 = vcmp.lt.s32.totalorder %v5489_v21, 4 }
 0x3a6   :  { %vm1409_vm11 = vcmp.gt.s32.totalorder %v1408_v51, 0  ;;  %vm1534_vm14 = vcmp.lt.s32.totalorder %v5489_v21, 1  ;;  %vm1536_vm15 = vcmp.lt.s32.totalorder %v5489_v21, 3  ;;  %vm1535_vm1 = vcmp.lt.s32.totalorder %v5489_v21, 2 }
 0x3a7   :  { %v1529_v55 = vshrl.u32 %v4944_v34, %v1517_v46  ;;  %v1532_v35 = vshrl.u32 %v4945_v37, %v1517_v46 }
 0x3ae   :  { %v4612_v32 = vpop.eup %4611 }
 0x3af   :  { %v4614_v61 = vpop.eup %4613  ;;  %v1394_v57 = vxor.u32 2147483648, %v4612_v32 }
 0x3b0   :  { %v1391_v59 = vxor.u32 2147483648, %v4614_v61 }
 0x3b1   :  { %v1395_v3 = vsel %vm1393_vm5, %v1394_v57, %v4614_v61  ;;  %v1523_v61 = vshrl.u32 %v4942_v28, %v1517_v46  ;;  %v1526_v57 = vshrl.u32 %v4943_v31, %v1517_v46 }
 0x3b2   :  { %v1392_v5 = vsel %vm1390_vm6, %v4612_v32, %v1391_v59  ;;  %v1520_v32 = vshrl.u32 %v4941_v24, %v1517_v46  ;;  %v1531_v59 = vshll.u32 %v4944_v34, %v1516_v38 }
 0x3b3   :  { %v1396_v6 = vsel %vm1389_vm7, %v1392_v5, %v1395_v3  ;;  %v1410_v3 = vsel %vm1409_vm11, %v1408_v51, 0  ;;  %v1530_v5 = vor.u32 %v1529_v55, %v1528_v42 }
 0x3b4   :  { %v1397_v4 = vsel %vm1387_vm8, nan, %v1396_v6  ;;  %v1519_v6 = vshll.u32 %v4940_v22, %v1516_v38 }
 0x3b5   :  { %v5462_v58 = vpack.c.bf16 %v1397_v4, %v1397_v4  ;;  %v1653_v13 = vmul.f32 0.037242305, %v1397_v4  ;;  %v1522_v4 = vshll.u32 %v4941_v24, %v1516_v38 }
 0x3b7   :  { %1811 = vrot.lane.b32.xlu0 %v5462_v58, %s4938_s0  ;;  %v1655_v14 = vpack.c.bf16 %v1653_v13, %v1653_v13  ;;  %v1412_v13 = vand.u32 31, %v1410_v3 }
 0x3b9   :  { %v1424_v41 = vshll.u32 %v4943_v31, %v1412_v13 }
 0x411   :  { %v1763_v8 = vpop.permute.xlu1 %1762 }
 0x412   :  { %v1768_v10 = vsel %vm1665_vm2, %v1763_v8, 0  ;;  %v1525_v8 = vshll.u32 %v4942_v28, %v1516_v38  ;;  %v1411_v38 = vshrl.u32 %v1410_v3, 5  ;;  %v1421_v3 = vshll.u32 %v4942_v28, %v1412_v13 }
 0x413   :  { %4206 = vmatpush3.bf16.xpose.msra.mxu1 %v1768_v10  ;;  %v1533_v10 = vor.u32 %v1532_v35, %v1531_v59 }
 0x414   :  { %4211 = vmatprep.subr.bf16.mxu1 %v4936_v0  ;;  %vm1433_vm4 = vcmp.lt.s32.totalorder %v1411_v38, 4  ;;  %vm1430_vm5 = vcmp.lt.s32.totalorder %v1411_v38, 1  ;;  %vm1432_vm6 = vcmp.lt.s32.totalorder %v1411_v38, 3  ;;  %vm1431_vm8 = vcmp.lt.s32.totalorder %v1411_v38, 2 }
 0x41a   :  { %4208 = vmatmul.mubr.msk.bf16.vlgmr.msra.gmra.mrb[8].mxu1 %vm1665_vm2, %v1654_v12  ;;  %v1521_v12 = vor.u32 %v1520_v32, %v1519_v6 }
 0x41b   :  { %4213 = vmatprep.mubr.msk.bf16.mxu1 %vm4937_vm0, %v4936_v0 }
 0x429   :  { %v1812_v40 = vpop.permute.xlu0 %1811 }
 0x42a   :  { %v1817_v54 = vsel %vm1665_vm2, %v1812_v40, 0  ;;  %v1524_v40 = vor.u32 %v1523_v61, %v1522_v4  ;;  %v1427_v61 = vshll.u32 %v4944_v34, %v1412_v13 }
 0x42b   :  { %4212 = vmatpush3.bf16.xpose.msra.mxu1 %v1817_v54  ;;  %v1527_v54 = vor.u32 %v1526_v57, %v1525_v8  ;;  %v1415_v57 = vshll.u32 %v4940_v22, %v1412_v13  ;;  %v1405_v8 = vand.u32 8388607, %v1398_v48 }
 0x42c   :  { %4223 = vmatprep.subr.bf16.mxu1 %v4936_v0 }
 0x42d   :  { %v1539_v4 = vsel %vm1537_vm13, %v1527_v54, 2102212464 }
 0x432   :  { %4214 = vmatmul.mubr.msk.bf16.vlgmr.msra.gmra.mrb[12].mxu1 %vm1665_vm2, %v1655_v14  ;;  %v1543_v14 = vsel %vm1537_vm13, %v1530_v5, 920167782 }
 0x433   :  { %4225 = vmatprep.mubr.msk.bf16.mxu1 %vm4937_vm0, %v4936_v0 }
 0x4ed   :  { %v5476_v16 = vpop.f32.mrb[8].mxu1 }
 0x4ee   :  { %v4209_v17 = vpop.f32.mrb[9].mxu1  ;;  %v1860_v18 = vsel %vm1859_vm9, %v5476_v16, -inf }
 0x4ef   :  { %1861 = vmax.xlane.f32.xlu1 %v1860_v18  ;;  %v1807_v19 = vpop.f32.mrb[10].mxu1  ;;  %v1547_v17 = vsel %vm1537_vm13, %v1533_v10, 1326507024  ;;  %v1510_v18 = vor.u32 8388608, %v1509_v11  ;;  %v1518_v10 = vshrl.u32 %v4940_v22, %v1517_v46  ;;  %v1406_v46 = vor.u32 8388608, %v1405_v8 }
 0x4f0   :  { %v4210_v23 = vpop.f32.mrb[11].mxu1  ;;  %v1542_v19 = vsel %vm1534_vm14, %v1521_v12, %v1524_v40  ;;  %v1548_v15 = vsel %vm1536_vm15, %v1530_v5, %v1547_v17  ;;  %v1418_v5 = vshll.u32 %v4941_v24, %v1412_v13 }
 0x4f1   :  { %v1544_v23 = vsel %vm1536_vm15, %v1527_v54, %v1543_v14  ;;  %v1550_v45 = vshll.u32 %v1510_v18, 8 }
 0x505   :  { %v5480_v25 = vpop.f32.mrb[12].mxu1 }
 0x506   :  { %v4215_v27 = vpop.f32.mrb[13].mxu1  ;;  %v1863_v2 = vsel %vm1859_vm9, %v5480_v25, -inf }
 0x507   :  { %1864 = vmax.xlane.f32.xlu0 %v1863_v2  ;;  %v1856_v9 = vpop.f32.mrb[14].mxu1  ;;  %v1413_v27 = vsub.s32 32, %v1412_v13  ;;  %v1546_v2 = vsel %vm1534_vm14, %v1524_v40, %v1527_v54  ;;  %v1540_v13 = vsel %vm1536_vm15, %v1524_v40, %v1539_v4  ;;  %vm5591_vm15 = vcmp.le.f32.partialorder %v1502_v56, 0.7853982 }
 0x508   :  { %v4216_v52 = vpop.f32.mrb[15].mxu1  ;;  %v1545_v9 = vsel %vm1535_vm1, %v1542_v19, %v1544_v23  ;;  %v1538_v19 = vsel %vm1534_vm14, %v1518_v10, %v1521_v12  ;;  %vm1504_vm14 = vcmp.lt.s32.totalorder %v5334_v43, 0 }
 0x509   :  { %v1549_v52 = vsel %vm1535_vm1, %v1546_v2, %v1548_v15  ;;  %v1425_v30 = vshrl.u32 %v4944_v34, %v1413_v27  ;;  %v1428_v33 = vshrl.u32 %v4945_v37, %v1413_v27  ;;  %v1416_v35 = vshrl.u32 %v4941_v24, %v1413_v27 }
 0x50a   :  { %v5524_v62 = vmul.u32.u64.low %v1550_v45, %v1545_v9  ;;  %v5525_v63 = vmul.u32.u64.high %v1550_v45, %v1545_v9, %v5524_v62  ;;  %v5529_v51 = vmul.u32.u64.low %v1550_v45, %v1549_v52  ;;  %v5530_v55 = vmul.u32.u64.high %v1550_v45, %v1549_v52, %v5529_v51 }
 0x50b   :  { %v1419_v42 = vshrl.u32 %v4942_v28, %v1413_v27  ;;  %v1422_v32 = vshrl.u32 %v4943_v31, %v1413_v27  ;;  %v1426_v59 = vor.u32 %v1425_v30, %v1424_v41  ;;  %v1429_v6 = vor.u32 %v1428_v33, %v1427_v61 }
 0x50c   :  { %v1417_v11 = vor.u32 %v1416_v35, %v1415_v57  ;;  %v1560_v54 = vadd.s32 1, %v5525_v63  ;;  %vm1559_vm7 = vc.u32 %v5530_v55, %v5524_v62  ;;  %v1541_v12 = vsel %vm1535_vm1, %v1538_v19, %v1540_v13 }
 0x50d   :  { %v1420_v14 = vor.u32 %v1419_v42, %v1418_v5  ;;  %v1423_v17 = vor.u32 %v1422_v32, %v1421_v3  ;;  %v1439_v18 = vsel %vm1433_vm4, %v1426_v59, 920167782  ;;  %v1443_v23 = vsel %vm1433_vm4, %v1429_v6, 1326507024 }
 0x50e   :  { %v1444_v40 = vsel %vm1432_vm6, %v1426_v59, %v1443_v23  ;;  %v1561_v52 = vsel %vm1559_vm7, %v1560_v54, %v5525_v63  ;;  %v1557_v33 = vmul.u32 %v1550_v45, %v1541_v12  ;;  %v1446_v51 = vshll.u32 %v1406_v46, 8 }
 0x50f   :  { %v1438_v2 = vsel %vm1430_vm5, %v1417_v11, %v1420_v14  ;;  %v1440_v15 = vsel %vm1432_vm6, %v1423_v17, %v1439_v18  ;;  %v1442_v9 = vsel %vm1430_vm5, %v1420_v14, %v1423_v17  ;;  %v1435_v5 = vsel %vm1433_vm4, %v1423_v17, 2102212464 }
 0x510   :  { %v1441_v30 = vsel %vm1431_vm8, %v1438_v2, %v1440_v15  ;;  %v1445_v41 = vsel %vm1431_vm8, %v1442_v9, %v1444_v40  ;;  %v1562_v35 = vadd.s32 %v1561_v52, %v1557_v33  ;;  %v1414_v59 = vshrl.u32 %v4940_v22, %v1413_v27 }
 0x511   :  { %v5562_v42 = vmul.u32.u64.low %v1446_v51, %v1441_v30  ;;  %v5563_v32 = vmul.u32.u64.high %v1446_v51, %v1441_v30, %v5562_v42  ;;  %v5565_v61 = vmul.u32.u64.low %v1446_v51, %v1445_v41  ;;  %v5566_v21 = vmul.u32.u64.high %v1446_v51, %v1445_v41, %v5565_v61 }
 0x512   :  { %v1563_v57 = vadd.s32 536870912, %v1562_v35  ;;  %v1434_v63 = vsel %vm1430_vm5, %v1414_v59, %v1417_v11  ;;  %v1436_v3 = vsel %vm1432_vm6, %v1420_v14, %v1435_v5  ;;  %v1558_v41 = vadd.s32 %v5524_v62, %v5530_v55 }
 0x513   :  { %v1456_v6 = vadd.s32 1, %v5563_v32  ;;  %vm1455_vm10 = vc.u32 %v5566_v21, %v5562_v42  ;;  %v1437_v4 = vsel %vm1431_vm8, %v1434_v63, %v1436_v3  ;;  %v1454_v62 = vadd.s32 %v5562_v42, %v5566_v21 }
 0x514   :  { %v5572_v45 = vshrl.u32 %v1563_v57, 30  ;;  %v1453_v18 = vmul.u32 %v1446_v51, %v1437_v4  ;;  %vm1400_vm1 = vcmp.lt.s32.totalorder %v5326_v20, 0  ;;  %vm5614_vm4 = vcmp.le.f32.partialorder %v1398_v48, 0.7853982 }
 0x515   :  { %v1457_v10 = vsel %vm1455_vm10, %v1456_v6, %v5563_v32  ;;  %vm1594_vm8 = vweird.f32 %v5334_v43 }
 0x516   :  { %v1565_v8 = vshll.u32 %v5572_v45, 30  ;;  %v1458_v17 = vadd.s32 %v1457_v10, %v1453_v18 }
 0x518   :  { %v1566_v19 = vsub.s32 %v1562_v35, %v1565_v8  ;;  %v1459_v27 = vadd.s32 536870912, %v1458_v17 }
 0x51a   :  { %v1568_v13 = vsub.s32 0, %v1566_v19  ;;  %v5579_v11 = vshrl.u32 %v1459_v27, 30 }
 0x51c   :  { %v4000_v14 = vmin.u32 %v1568_v13, %v1566_v19  ;;  %v1461_v23 = vshll.u32 %v5579_v11, 30 }
 0x51e   :  { %v1570_v54 = vclz %v4000_v14  ;;  %v1462_v46 = vsub.s32 %v1458_v17, %v1461_v23 }
 0x520   :  { %v4001_v2 = vadd.s32 4294967294, %v1570_v54  ;;  %v1464_v15 = vsub.s32 0, %v1462_v46 }
 0x522   :  { %vm4002_vm11 = vcmp.lt.s32.totalorder %v4001_v2, 0  ;;  %v3996_v12 = vmin.u32 %v1464_v15, %v1462_v46  ;;  %v1588_v15 = vsub.s32 4, %v5572_v45 }
 0x523   :  { %v1573_v38 = vsel %vm4002_vm11, 0, %v4001_v2 }
 0x524   :  { %v1578_v9 = vsub.s32 4294967266, %v1573_v38  ;;  %v1466_v40 = vclz %v3996_v12  ;;  %v1574_v33 = vsub.s32 32, %v1573_v38  ;;  %v1575_v32 = vshll.u32 %v1566_v19, %v1573_v38 }
 0x525   :  { %v1589_v12 = vsel %vm1504_vm14, %v1588_v15, %v5572_v45 }
 0x526   :  { %v1579_v52 = vadd.s32 127, %v1578_v9  ;;  %v3997_v30 = vadd.s32 4294967294, %v1466_v40  ;;  %v1576_v35 = vshrl.u32 %v1558_v41, %v1574_v33 }
 0x528   :  { %v1580_v51 = vshll.u32 %v1579_v52, 23  ;;  %vm3998_vm13 = vcmp.lt.s32.totalorder %v3997_v30, 0  ;;  %v1577_v5 = vor.u32 %v1576_v35, %v1575_v32 }
 0x529   :  { %v1469_v57 = vsel %vm3998_vm13, 0, %v3997_v30  ;;  %v1591_v30 = vsel %vm5591_vm15, 0, %v1589_v12 }
 0x52a   :  { %v1581_v61 = vor.u32 4788187, %v1580_v51  ;;  %v1474_v59 = vsub.s32 4294967266, %v1469_v57  ;;  %v1584_v4 = vcvt.s32.f32 %v1577_v5  ;;  %v1470_v17 = vsub.s32 32, %v1469_v57 }
 0x52b   :  { %v1471_v19 = vshll.u32 %v1462_v46, %v1469_v57  ;;  %v1595_v41 = vadd.s32 3, %v1591_v30 }
 0x52c   :  { %v1582_v63 = vand.u32 2147483647, %v1581_v61  ;;  %v1475_v10 = vadd.s32 127, %v1474_v59  ;;  %v1472_v13 = vshrl.u32 %v1454_v62, %v1470_v17  ;;  %v1484_v59 = vsub.s32 4, %v5579_v11 }
 0x52d   :  { %v1596_v61 = vand.u32 3, %v1595_v41 }
 0x52e   :  { %v1585_v18 = vmul.f32 %v1584_v4, %v1582_v63  ;;  %v1476_v55 = vshll.u32 %v1475_v10, 23  ;;  %v1473_v54 = vor.u32 %v1472_v13, %v1471_v19  ;;  %v1485_v48 = vsel %vm1400_vm1, %v1484_v59, %v5579_v11 }
 0x52f   :  { %vm1598_vm5 = vcmp.eq.s32.totalorder %v1596_v61, 0  ;;  %vm1601_vm6 = vcmp.eq.s32.totalorder %v1596_v61, 2  ;;  %vm1597_vm7 = vcmp.lt.s32.totalorder %v1596_v61, 2  ;;  %v1487_v10 = vsel %vm5614_vm4, 0, %v1485_v48 }
 0x530   :  { %v1586_v27 = vxor.u32 2147483648, %v1585_v18  ;;  %v1477_v14 = vor.u32 4788187, %v1476_v55  ;;  %v1480_v38 = vcvt.s32.f32 %v1473_v54  ;;  %v1491_v17 = vadd.s32 3, %v1487_v10 }
 0x532   :  { %v1587_v23 = vsel %vm1504_vm14, %v1586_v27, %v1585_v18  ;;  %v1478_v21 = vand.u32 2147483647, %v1477_v14  ;;  %v1492_v27 = vand.u32 3, %v1491_v17  ;;  %vm1490_vm14 = vweird.f32 %v5326_v20 }
 0x533   :  { %v1590_v42 = vsel %vm5591_vm15, %v5334_v43, %v1587_v23  ;;  %vm1889_vm15 = vcmask 1043456  }
 0x534   :  { %v1481_v56 = vmul.f32 %v1480_v38, %v1478_v21  ;;  %vm1494_vm10 = vcmp.eq.s32.totalorder %v1492_v27, 0  ;;  %vm1497_vm11 = vcmp.eq.s32.totalorder %v1492_v27, 2  ;;  %vm1493_vm13 = vcmp.lt.s32.totalorder %v1492_v27, 2 }
 0x536   :  { %v1482_v52 = vxor.u32 2147483648, %v1481_v56 }
 0x538   :  { %v1483_v35 = vsel %vm1400_vm1, %v1482_v52, %v1481_v56 }
 0x57c   :  { %v1862_v3 = vpop.xlane.xlu1 %1861 }
 0x57d   :  { %v1866_v6 = vsub.f32 %v5476_v16, %v1862_v3 }
 0x57f   :  { %v1868_v8 = vmul.f32 1.442695, %v1866_v6 }
 0x581   :  { %4615 = vpow2.f32 %v1868_v8 }
 0x582   :  { %4617 = vcosq.f32 %v1590_v42 }
 0x583   :  { %4619 = vsinq.f32 %v1590_v42 }
 0x58b   :  { %v5595_v2 = vpop.eup %4615 }
 0x58c   :  { %v1872_v46 = vsel %vm1859_vm9, %v5595_v2, 0.0  ;;  %v4618_v51 = vpop.eup %4617 }
 0x58d   :  { %1873 = vadd.xlane.f32.xlu0 %v1872_v46  ;;  %v4620_v32 = vpop.eup %4619  ;;  %v1602_v5 = vxor.u32 2147483648, %v4618_v51 }
 0x58e   :  { %v1599_v57 = vxor.u32 2147483648, %v4620_v32 }
 0x58f   :  { %v1603_v6 = vsel %vm1601_vm6, %v1602_v5, %v4620_v32 }
 0x590   :  { %v1600_v3 = vsel %vm1598_vm5, %v4618_v51, %v1599_v57 }
 0x591   :  { %v1604_v8 = vsel %vm1597_vm7, %v1600_v3, %v1603_v6 }
 0x592   :  { %v5631_v18 = vsel %vm1594_vm8, nan, %v1604_v8 }
 0x593   :  { %v5637_v55 = vpack.c.bf16 %v5631_v18, %v5631_v18  ;;  %v1982_v45 = vmul.f32 0.037242305, %v5631_v18 }
 0x594   :  { %v1865_v9 = vpop.xlane.xlu0 %1864 }
 0x595   :  { %v1867_v40 = vsub.f32 %v5480_v25, %v1865_v9  ;;  %v1486_v25 = vsel %vm5614_vm4, %v5326_v20, %v1483_v35 }
 0x597   :  { %v1870_v33 = vmul.f32 1.442695, %v1867_v40 }
 0x599   :  { %4621 = vpow2.f32 %v1870_v33 }
 0x59a   :  { %4623 = vcosq.f32 %v1486_v25 }
 0x59b   :  { %4625 = vsinq.f32 %v1486_v25  ;;  %v1984_v25 = vpack.c.bf16 %v1982_v45, %v1982_v45 }
 0x5a3   :  { %v4622_v63 = vpop.eup %4621  ;;  %1884 = vrot.lane.b32.xlu0 %v5445_v49, %s4922_s18 }
 0x5a4   :  { %v1875_v4 = vsel %vm1859_vm9, %v4622_v63, 0.0  ;;  %v4624_v11 = vpop.eup %4623 }
 0x5a5   :  { %1876 = vadd.xlane.f32.xlu1 %v1875_v4  ;;  %v4626_v62 = vpop.eup %4625  ;;  %v1498_v13 = vxor.u32 2147483648, %v4624_v11 }
 0x5a6   :  { %v1495_v49 = vxor.u32 2147483648, %v4626_v62 }
 0x5a7   :  { %2034 = vrot.lane.b32.xlu0 %v5448_v50, %s4938_s0  ;;  %v1499_v19 = vsel %vm1497_vm11, %v1498_v13, %v4626_v62 }
 0x5a8   :  { %v1496_v43 = vsel %vm1494_vm10, %v4624_v11, %v1495_v49 }
 0x5a9   :  { %v1500_v14 = vsel %vm1493_vm13, %v1496_v43, %v1499_v19 }
 0x5aa   :  { %v1501_v23 = vsel %vm1490_vm14, nan, %v1500_v14 }
 0x5ab   :  { %2129 = vrot.lane.b32.xlu0 %v5637_v55, %s4938_s0  ;;  %v5646_v54 = vpack.c.bf16 %v1501_v23, %v1501_v23  ;;  %v1981_v33 = vmul.f32 0.037242305, %v1501_v23  ;;  %v1612_v23 = vmul.f32 %v5332_v26, %v5332_v26 }
 0x5ad   :  { %v1983_v51 = vpack.c.bf16 %v1981_v33, %v1981_v33 }
 0x5b6   :  { %1933 = vrot.lane.b32.xlu1 %v5462_v58, %s4922_s18 }
 0x5ba   :  { %1988 = vrot.lane.b32.xlu1 %v5433_v29, %s4938_s0 }
 0x5be   :  { %2080 = vrot.lane.b32.xlu1 %v5646_v54, %s4938_s0 }
 0x61a   :  { %v1874_v16 = vpop.xlane.xlu0 %1873 }
 0x61b   :  { %4627 = vrcp.f32 %v1874_v16  ;;  %v1616_v16 = vmul.f32 %v1612_v23, %v5332_v26 }
 0x61e   :  { %v1885_v42 = vpop.permute.xlu0 %1884 }
 0x61f   :  { %v1891_v21 = vsel %vm1889_vm15, %v1885_v42, 0  ;;  %v1620_v42 = vmul.f32 0.044715, %v1616_v16 }
 0x620   :  { %4218 = vmatpush3.bf16.msra.mxu0 %v1891_v21  ;;  %v1610_v21 = vmul.f32 %v5323_v36, %v5323_v36 }
 0x621   :  { %4229 = vmatprep.subr.bf16.mxu0 %v4936_v0 }
 0x622   :  { %v2035_v41 = vpop.permute.xlu0 %2034 }
 0x625   :  { %v4628_v58 = vpop.eup %4627 }
 0x626   :  { %v1880_v20 = vmul.f32 %v4628_v58, %v5595_v2  ;;  %v2130_v35 = vpop.permute.xlu0 %2129 }
 0x627   :  { %v2135_v32 = vsel %vm1665_vm2, %v2130_v35, 0  ;;  %v1608_v35 = vmul.f32 0.5, %v5332_v26 }
 0x628   :  { %v1882_v46 = vpack.c.bf16 %v1880_v20, %v1880_v20 }
 0x62a   :  { %4220 = vmatmul.mubr.msk.bf16.vlgmr.msra.gmra.mrb[8].mxu0 %vm1859_vm9, %v1882_v46  ;;  %v1624_v46 = vadd.f32 %v1620_v42, %v5332_v26 }
 0x62b   :  { %4230 = vmatpush3.bf16.xpose.msra.mxu0 %v5407_v7  ;;  %4231 = vmatprep.mubr.msk.bf16.mxu0 %vm4937_vm0, %v4936_v0 }
 0x62c   :  { %4241 = vmatprep.subr.bf16.mxu0 %v4936_v0 }
 0x632   :  { %v1877_v15 = vpop.xlane.xlu1 %1876 }
 0x633   :  { %4629 = vrcp.f32 %v1877_v15 }
 0x636   :  { %v1934_v38 = vpop.permute.xlu1 %1933 }
 0x637   :  { %v1939_v56 = vsel %vm1889_vm15, %v1934_v38, 0 }
 0x638   :  { %4224 = vmatpush3.bf16.msra.mxu1 %v1939_v56  ;;  %v1614_v56 = vmul.f32 %v1610_v21, %v5323_v36 }
 0x639   :  { %4235 = vmatprep.subr.bf16.mxu1 %v4936_v0 }
 0x63a   :  { %v1989_v12 = vpop.permute.xlu1 %1988 }
 0x63b   :  { %4232 = vmatmul.mubr.msk.bf16.vlgmr.msra.gmra.mrb[12].mxu0 %vm1665_vm2, %v1989_v12 }
 0x63c   :  { %4243 = vmatprep.mubr.msk.bf16.mxu0 %vm4937_vm0, %v4936_v0 }
 0x63d   :  { %v4630_v2 = vpop.eup %4629 }
 0x63e   :  { %v1881_v9 = vmul.f32 %v4630_v2, %v4622_v63  ;;  %v2081_v40 = vpop.permute.xlu1 %2080  ;;  %v1628_v2 = vmul.f32 0.7978846, %v1624_v46 }
 0x63f   :  { %v2086_v52 = vsel %vm1665_vm2, %v2081_v40, 0 }
 0x640   :  { %v1883_v30 = vpack.c.bf16 %v1881_v9, %v1881_v9  ;;  %4242 = vmatpush3.bf16.xpose.msra.mxu0 %v2086_v52  ;;  %v1618_v9 = vmul.f32 0.044715, %v1614_v56 }
 0x641   :  { %4253 = vmatprep.subr.bf16.mxu0 %v4936_v0 }
 0x642   :  { %4226 = vmatmul.mubr.msk.bf16.vlgmr.msra.gmra.mrb[16].mxu1 %vm1859_vm9, %v1883_v30  ;;  %v1622_v40 = vadd.f32 %v1618_v9, %v5323_v36 }
 0x643   :  { %4236 = vmatpush3.bf16.xpose.msra.mxu1 %v5436_v53  ;;  %4237 = vmatprep.mubr.msk.bf16.mxu1 %vm4937_vm0, %v4936_v0 }
 0x644   :  { %4247 = vmatprep.subr.bf16.mxu1 %v4936_v0  ;;  %v1626_v30 = vmul.f32 0.7978846, %v1622_v40 }
 0x647   :  { %4244 = vmatmul.mubr.msk.bf16.vlgmr.msra.gmra.mrb[12].mxu0 %vm1665_vm2, %v1983_v51 }
 0x648   :  { %4255 = vmatprep.mubr.msk.bf16.mxu0 %vm4937_vm0, %v4936_v0 }
 0x64a   :  { %4238 = vmatmul.mubr.msk.bf16.vlgmr.msra.gmra.mrb[20].mxu1 %vm1665_vm2, %v2035_v41 }
 0x64b   :  { %4248 = vmatpush3.bf16.xpose.msra.mxu1 %v2135_v32  ;;  %4249 = vmatprep.mubr.msk.bf16.mxu1 %vm4937_vm0, %v4936_v0 }
 0x64c   :  { %4259 = vmatprep.subr.bf16.mxu1 %v4936_v0 }
 0x656   :  { %4250 = vmatmul.mubr.msk.bf16.vlgmr.msra.gmra.mrb[20].mxu1 %vm1665_vm2, %v1984_v25 }
 0x657   :  { %4261 = vmatprep.mubr.msk.bf16.mxu1 %vm4937_vm0, %v4936_v0 }
 0x6fd   :  { %v5682_v61 = vpop.f32.mrb[8].mxu0 }
 0x6fe   :  { %v4221_v57 = vpop.f32.mrb[9].mxu0 }
 0x6ff   :  { %v1930_v5 = vpop.f32.mrb[10].mxu0 }
 0x700   :  { %v4222_v59 = vpop.f32.mrb[11].mxu0 }
 0x701   :  { %v1611_v59 = vmul.f32 %v5328_v39, %v5328_v39 }
 0x715   :  { %v5684_v63 = vpop.f32.mrb[16].mxu1 }
 0x716   :  { %v4227_v3 = vpop.f32.mrb[17].mxu1 }
 0x717   :  { %v1978_v6 = vpop.f32.mrb[18].mxu1  ;;  %v1615_v3 = vmul.f32 %v1611_v59, %v5328_v39 }
 0x718   :  { %v4228_v48 = vpop.f32.mrb[19].mxu1 }
 0x719   :  { %v1619_v6 = vmul.f32 0.044715, %v1615_v3 }
 0x71a   :  { %v2122_v4 = vpop.f32.mrb[12].mxu0 }
 0x71b   :  { %v4245_v8 = vpop.f32.mrb[13].mxu0  ;;  %v2177_v10 = vsel %vm1859_vm9, %v2122_v4, -inf }
 0x71c   :  { %2178 = vmax.xlane.f32.xlu1 %v2177_v10  ;;  %v2125_v18 = vpop.f32.mrb[14].mxu0  ;;  %v1613_v8 = vmul.f32 %v5337_v47, %v5337_v47 }
 0x71d   :  { %v4246_v17 = vpop.f32.mrb[15].mxu0 }
 0x71e   :  { %v1617_v18 = vmul.f32 %v1613_v8, %v5337_v47 }
 0x729   :  { %v2171_v11 = vpop.f32.mrb[20].mxu1 }
 0x72a   :  { %v4251_v62 = vpop.f32.mrb[21].mxu1  ;;  %v2180_v27 = vsel %vm1859_vm9, %v2171_v11, -inf }
 0x72b   :  { %2181 = vmax.xlane.f32.xlu0 %v2180_v27  ;;  %v2174_v49 = vpop.f32.mrb[22].mxu1  ;;  %v1621_v62 = vmul.f32 0.044715, %v1617_v18 }
 0x72c   :  { %v4252_v13 = vpop.f32.mrb[23].mxu1 }
 0x72d   :  { %v1625_v13 = vadd.f32 %v1621_v62, %v5337_v47 }
 0x72f   :  { %v1629_v23 = vmul.f32 0.7978846, %v1625_v13 }
 0x7a9   :  { %v2179_v43 = vpop.xlane.xlu1 %2178 }
 0x7aa   :  { %v2183_v19 = vsub.f32 %v2122_v4, %v2179_v43 }
 0x7ac   :  { %v2185_v14 = vmul.f32 1.442695, %v2183_v19 }
 0x7ae   :  { %4631 = vpow2.f32 %v2185_v14 }
 0x7b8   :  { %v4632_v58 = vpop.eup %4631  ;;  %v2182_v20 = vpop.xlane.xlu0 %2181 }
 0x7b9   :  { %v2184_v15 = vsub.f32 %v2171_v11, %v2182_v20  ;;  %v2189_v38 = vsel %vm1859_vm9, %v4632_v58, 0.0 }
 0x7ba   :  { %2190 = vadd.xlane.f32.xlu0 %v2189_v38 }
 0x7bb   :  { %v2187_v12 = vmul.f32 1.442695, %v2184_v15 }
 0x7bd   :  { %4633 = vpow2.f32 %v2187_v12 }
 0x7be   :  { %4635 = vtanh.f32 %v1628_v2 }
 0x7bf   :  { %4637 = vtanh.f32 %v1626_v30 }
 0x7c7   :  { %v4634_v52 = vpop.eup %4633 }
 0x7c8   :  { %v2192_v33 = vsel %vm1859_vm9, %v4634_v52, 0.0  ;;  %v4636_v41 = vpop.eup %4635 }
 0x7c9   :  { %2193 = vadd.xlane.f32.xlu1 %v2192_v33  ;;  %v1636_v51 = vadd.f32 1.0, %v4636_v41  ;;  %v4638_v45 = vpop.eup %4637 }
 0x7ca   :  { %v1634_v57 = vadd.f32 1.0, %v4638_v45 }
 0x7cb   :  { %v5701_v32 = vmul.f32 %v1636_v51, %v1608_v35  ;;  %v1609_v51 = vmul.f32 0.5, %v5337_v47 }
 0x7cd   :  { %v5707_v25 = vpack.c.bf16 %v5701_v32, %v5701_v32  ;;  %v2298_v45 = vmul.f32 0.01686028, %v5701_v32 }
 0x7d0   :  { %2201 = vrot.lane.b32.xlu0 %v5646_v54, %s4922_s18  ;;  %v1606_v54 = vmul.f32 0.5, %v5323_v36 }
 0x7d2   :  { %v1638_v26 = vmul.f32 %v1634_v57, %v1606_v54  ;;  %v2300_v54 = vpack.c.bf16 %v2298_v45, %v2298_v45 }
 0x7d4   :  { %2348 = vrot.lane.b32.xlu0 %v5448_v50, %s4922_s18  ;;  %v5716_v5 = vpack.c.bf16 %v1638_v26, %v1638_v26  ;;  %v2297_v12 = vmul.f32 0.01686028, %v1638_v26 }
 0x7d6   :  { %v5750_v9 = vpack.c.bf16 %v2297_v12, %v2297_v12 }
 0x7d8   :  { %2443 = vrot.lane.b32.xlu0 %v5707_v25, %s4922_s18 }
 0x7da   :  { %2249 = vrot.lane.b32.xlu1 %v5637_v55, %s4922_s18  ;;  %v1623_v55 = vadd.f32 %v1619_v6, %v5328_v39 }
 0x7dc   :  { %v1627_v10 = vmul.f32 0.7978846, %v1623_v55 }
 0x7de   :  { %2303 = vrot.lane.b32.xlu1 %v5433_v29, %s4922_s18 }
 0x7e2   :  { %2394 = vrot.lane.b32.xlu1 %v5716_v5, %s4922_s18 }
 0x847   :  { %v2191_v48 = vpop.xlane.xlu0 %2190 }
 0x848   :  { %4639 = vrcp.f32 %v2191_v48 }
 0x849   :  { %4641 = vtanh.f32 %v1627_v10 }
 0x84b   :  { %v2202_v36 = vpop.permute.xlu0 %2201 }
 0x84c   :  { %v2207_v4 = vsel %vm1889_vm15, %v2202_v36, 0 }
 0x84d   :  { %4254 = vmatpush3.bf16.msra.mxu0 %v2207_v4 }
 0x84e   :  { %4265 = vmatprep.subr.bf16.mxu0 %v4936_v0 }
 0x84f   :  { %v2349_v2 = vpop.permute.xlu0 %2348 }
 0x852   :  { %v4640_v17 = vpop.eup %4639 }
 0x853   :  { %v2197_v11 = vmul.f32 %v4640_v17, %v4632_v58  ;;  %v4642_v14 = vpop.eup %4641  ;;  %v1607_v58 = vmul.f32 0.5, %v5328_v39 }
 0x854   :  { %v1635_v42 = vadd.f32 1.0, %v4642_v14 }
 0x855   :  { %v2199_v27 = vpack.c.bf16 %v2197_v11, %v2197_v11 }
 0x856   :  { %v2194_v49 = vpop.xlane.xlu1 %2193  ;;  %v1639_v38 = vmul.f32 %v1635_v42, %v1607_v58 }
 0x857   :  { %4643 = vrcp.f32 %v2194_v49  ;;  %4256 = vmatmul.mubr.msk.bf16.vlgmr.msra.gmra.mrb[16].mxu0 %vm1859_vm9, %v2199_v27 }
 0x858   :  { %4266 = vmatpush3.bf16.xpose.msra.mxu0 %v5407_v7  ;;  %4267 = vmatprep.mubr.msk.bf16.mxu0 %vm4937_vm0, %v4936_v0  ;;  %4645 = vtanh.f32 %v1629_v23  ;;  %v5747_v39 = vpack.c.bf16 %v1639_v38, %v1639_v38 }
 0x859   :  { %4277 = vmatprep.subr.bf16.mxu0 %v4936_v0 }
 0x85a   :  { %v2250_v43 = vpop.permute.xlu1 %2249  ;;  %v2521_v30 = vsel %vm1889_vm15, %v5747_v39, 0 }
 0x85b   :  { %v2255_v19 = vsel %vm1889_vm15, %v2250_v43, 0 }
 0x85c   :  { %4260 = vmatpush3.bf16.msra.mxu1 %v2255_v19 }
 0x85d   :  { %4271 = vmatprep.subr.bf16.mxu1 %v4936_v0 }
 0x85e   :  { %v2304_v16 = vpop.permute.xlu1 %2303 }
 0x85f   :  { %4268 = vmatmul.mubr.msk.bf16.vlgmr.msra.gmra.mrb[20].mxu0 %vm1665_vm2, %v2304_v16 }
 0x860   :  { %4279 = vmatprep.mubr.msk.bf16.mxu0 %vm4937_vm0, %v4936_v0 }
 0x861   :  { %v4644_v21 = vpop.eup %4643 }
 0x862   :  { %v2198_v20 = vmul.f32 %v4644_v21, %v4634_v52  ;;  %v2395_v46 = vpop.permute.xlu1 %2394  ;;  %v4646_v40 = vpop.eup %4645 }
 0x863   :  { %v2400_v15 = vsel %vm1665_vm2, %v2395_v46, 0  ;;  %v2444_v52 = vpop.permute.xlu0 %2443  ;;  %v1637_v41 = vadd.f32 1.0, %v4646_v40 }
 0x864   :  { %v2200_v56 = vpack.c.bf16 %v2198_v20, %v2198_v20  ;;  %4278 = vmatpush3.bf16.xpose.msra.mxu0 %v2400_v15  ;;  %v2449_v33 = vsel %vm1665_vm2, %v2444_v52, 0 }
 0x865   :  { %4289 = vmatprep.subr.bf16.mxu0 %v4936_v0  ;;  %v1641_v35 = vmul.f32 %v1637_v41, %v1609_v51 }
 0x866   :  { %4262 = vmatmul.mubr.msk.bf16.vlgmr.msra.gmra.mrb[24].mxu1 %vm1859_vm9, %v2200_v56 }
 0x867   :  { %4272 = vmatpush3.bf16.xpose.msra.mxu1 %v5436_v53  ;;  %4273 = vmatprep.mubr.msk.bf16.mxu1 %vm4937_vm0, %v4936_v0  ;;  %v5766_v57 = vpack.c.bf16 %v1641_v35, %v1641_v35 }
 0x868   :  { %4283 = vmatprep.subr.bf16.mxu1 %v4936_v0 }
 0x869   :  { %v2567_v26 = vsel %vm1889_vm15, %v5766_v57, 0 }
 0x86b   :  { %4280 = vmatmul.mubr.msk.bf16.vlgmr.msra.gmra.mrb[20].mxu0 %vm1665_vm2, %v5750_v9 }
 0x86c   :  { %4290 = vmatpush3.bf16.msra.mxu0 %v2521_v30  ;;  %4291 = vmatprep.mubr.msk.bf16.mxu0 %vm4937_vm0, %v4936_v0 }
 0x86d   :  { %4301 = vmatprep.subr.bf16.mxu0 %v4936_v0 }
 0x86e   :  { %4274 = vmatmul.mubr.msk.bf16.vlgmr.msra.gmra.mrb[28].mxu1 %vm1665_vm2, %v2349_v2 }
 0x86f   :  { %4284 = vmatpush3.bf16.xpose.msra.mxu1 %v2449_v33  ;;  %4285 = vmatprep.mubr.msk.bf16.mxu1 %vm4937_vm0, %v4936_v0 }
 0x870   :  { %4295 = vmatprep.subr.bf16.mxu1 %v4936_v0 }
 0x87a   :  { %4286 = vmatmul.mubr.msk.bf16.vlgmr.msra.gmra.mrb[28].mxu1 %vm1665_vm2, %v2300_v54 }
 0x87b   :  { %4296 = vmatpush3.bf16.msra.mxu1 %v2567_v26  ;;  %4297 = vmatprep.mubr.msk.bf16.mxu1 %vm4937_vm0, %v4936_v0 }
 0x87c   :  { %4307 = vmatprep.subr.bf16.mxu1 %v4936_v0 }
 0x92a   :  { %v5774_v47 = vpop.f32.mrb[16].mxu0 }
 0x92b   :  { %v4257_v59 = vpop.f32.mrb[17].mxu0 }
 0x92c   :  { %v2246_v3 = vpop.f32.mrb[18].mxu0 }
 0x92d   :  { %v4258_v6 = vpop.f32.mrb[19].mxu0 }
 0x939   :  { %v5776_v32 = vpop.f32.mrb[24].mxu1 }
 0x93a   :  { %v4448_v48 = vpack.i.bf16 %v5776_v32, %v5774_v47  ;;  %v4263_v55 = vpop.f32.mrb[25].mxu1 }
 0x93b   :  { %v2294_v36 = vpop.f32.mrb[26].mxu1 }
 0x93c   :  { %v4264_v4 = vpop.f32.mrb[27].mxu1 }
 0x93e   :  { %v2436_v8 = vpop.f32.mrb[20].mxu0 }
 0x93f   :  { %v4281_v10 = vpop.f32.mrb[21].mxu0  ;;  %v2491_v18 = vsel %vm1859_vm9, %v2436_v8, -inf }
 0x940   :  { %2492 = vmax.xlane.f32.xlu1 %v2491_v18  ;;  %v2439_v17 = vpop.f32.mrb[22].mxu0 }
 0x941   :  { %v4282_v11 = vpop.f32.mrb[23].mxu0 }
 0x94d   :  { %v2485_v62 = vpop.f32.mrb[28].mxu1 }
 0x94e   :  { %v4287_v27 = vpop.f32.mrb[29].mxu1  ;;  %v2494_v49 = vsel %vm1859_vm9, %v2485_v62, -inf }
 0x94f   :  { %2495 = vmax.xlane.f32.xlu0 %v2494_v49  ;;  %v2488_v13 = vpop.f32.mrb[30].mxu1 }
 0x950   :  { %v4288_v43 = vpop.f32.mrb[31].mxu1 }
 0x9cd   :  { %v2493_v19 = vpop.xlane.xlu1 %2492 }
 0x9ce   :  { %v2497_v14 = vsub.f32 %v2436_v8, %v2493_v19 }
 0x9d0   :  { %v2499_v23 = vmul.f32 1.442695, %v2497_v14 }
 0x9d2   :  { %4647 = vpow2.f32 %v2499_v23 }
 0x9dc   :  { %v4648_v16 = vpop.eup %4647  ;;  %v2496_v42 = vpop.xlane.xlu0 %2495 }
 0x9dd   :  { %v2498_v21 = vsub.f32 %v2485_v62, %v2496_v42  ;;  %v2503_v58 = vsel %vm1859_vm9, %v4648_v16, 0.0 }
 0x9de   :  { %2504 = vadd.xlane.f32.xlu0 %v2503_v58 }
 0x9df   :  { %v2501_v20 = vmul.f32 1.442695, %v2498_v21 }
 0x9e1   :  { %4649 = vpow2.f32 %v2501_v20 }
 0x9eb   :  { %v4650_v46 = vpop.eup %4649 }
 0x9ec   :  { %v2506_v15 = vsel %vm1859_vm9, %v4650_v46, 0.0 }
 0x9ed   :  { %2507 = vadd.xlane.f32.xlu1 %v2506_v15 }
 0x9f4   :  { %2609 = vrot.lane.b32.xlu0 %v5433_v29, %s4946_s5 }
 0x9f8   :  { %2753 = vrot.lane.b32.xlu0 %v5707_v25, %s4946_s5 }
 0x9fc   :  { %2751 = vrot.lane.b32.xlu0 %v2300_v54, %s4938_s0 }
 0x9fe   :  { %2654 = vrot.lane.b32.xlu1 %v5448_v50, %s4946_s5 }
 0xa02   :  { %2702 = vrot.lane.b32.xlu1 %v5716_v5, %s4946_s5 }
 0xa06   :  { %2700 = vrot.lane.b32.xlu1 %v5750_v9, %s4938_s0 }
 0xa6b   :  { %v2505_v38 = vpop.xlane.xlu0 %2504 }
 0xa6c   :  { %4651 = vrcp.f32 %v2505_v38 }
 0xa6f   :  { %v2610_v25 = vpop.permute.xlu0 %2609 }
 0xa73   :  { %v2754_v33 = vpop.permute.xlu0 %2753 }
 0xa74   :  { %v2759_v41 = vsel %vm1665_vm2, %v2754_v33, 0 }
 0xa76   :  { %v4652_v56 = vpop.eup %4651 }
 0xa77   :  { %v2511_v12 = vmul.f32 %v4652_v56, %v4648_v16 }
 0xa79   :  { %v2513_v2 = vpack.c.bf16 %v2511_v12, %v2511_v12 }
 0xa7a   :  { %v2508_v29 = vpop.xlane.xlu1 %2507 }
 0xa7b   :  { %4653 = vrcp.f32 %v2508_v29  ;;  %4292 = vmatmul.mubr.msk.bf16.vlgmr.msra.gmra.mrb[24].mxu0 %vm1859_vm9, %v2513_v2 }
 0xa7c   :  { %4302 = vmatpush3.bf16.xpose.msra.mxu0 %v5407_v7  ;;  %4303 = vmatprep.mubr.msk.bf16.mxu0 %vm4937_vm0, %v4936_v0 }
 0xa7d   :  { %4313 = vmatprep.subr.bf16.mxu0 %v4936_v0 }
 0xa7e   :  { %v2655_v50 = vpop.permute.xlu1 %2654 }
 0xa82   :  { %v2703_v5 = vpop.permute.xlu1 %2702 }
 0xa83   :  { %v2708_v9 = vsel %vm1665_vm2, %v2703_v5, 0  ;;  %4304 = vmatmul.mubr.msk.bf16.vlgmr.msra.gmra.mrb[28].mxu0 %vm1665_vm2, %v2610_v25  ;;  %v4544_v25 = vld [vmem:[#allocation13 + $0x8] sm:$0xff]   ;;  %v4545_v5 = vld [vmem:[#allocation13 + $0x10] sm:$0xff]  }
 0xa84   :  { %4314 = vmatpush3.bf16.xpose.msra.mxu0 %v2708_v9  ;;  %4315 = vmatprep.mubr.msk.bf16.mxu0 %vm4937_vm0, %v4936_v0  ;;  %v4546_v9 = vld [vmem:[#allocation13 + $0x18] sm:$0xff]  }
 0xa85   :  { %v4654_v40 = vpop.eup %4653  ;;  %4325 = vmatprep.subr.bf16.mxu0 %v4936_v0 }
 0xa86   :  { %v2512_v7 = vmul.f32 %v4654_v40, %v4650_v46  ;;  %v2701_v30 = vpop.permute.xlu1 %2700  ;;  %v4547_v40 = vld [vmem:[#allocation13 + $0x20] sm:$0xff]  }
 0xa88   :  { %v2514_v52 = vpack.c.bf16 %v2512_v7, %v2512_v7  ;;  %v4548_v7 = vld [vmem:[#allocation13 + $0x28] sm:$0xff]  }
 0xa8a   :  { %4298 = vmatmul.mubr.msk.bf16.vlgmr.msra.gmra.mrb[32].mxu1 %vm1859_vm9, %v2514_v52 }
 0xa8b   :  { %4308 = vmatpush3.bf16.xpose.msra.mxu1 %v5436_v53  ;;  %4309 = vmatprep.mubr.msk.bf16.mxu1 %vm4937_vm0, %v4936_v0  ;;  %v2752_v53 = vpop.permute.xlu0 %2751 }
 0xa8c   :  { %4319 = vmatprep.subr.bf16.mxu1 %v4936_v0 }
 0xa8f   :  { %4316 = vmatmul.mubr.msk.bf16.vlgmr.msra.gmra.mrb[28].mxu0 %vm1665_vm2, %v2701_v30 }
 0xa90   :  { %4327 = vmatprep.mubr.msk.bf16.mxu0 %vm4937_vm0, %v4936_v0 }
 0xa92   :  { %4310 = vmatmul.mubr.msk.bf16.vlgmr.msra.gmra.mrb[36].mxu1 %vm1665_vm2, %v2655_v50  ;;  %v4543_v50 = vld [vmem:[#allocation13] sm:$0xff]  }
 0xa93   :  { %4320 = vmatpush3.bf16.xpose.msra.mxu1 %v2759_v41  ;;  %4321 = vmatprep.mubr.msk.bf16.mxu1 %vm4937_vm0, %v4936_v0 }
 0xa94   :  { %4331 = vmatprep.subr.bf16.mxu1 %v4936_v0 }
 0xa9e   :  { %4322 = vmatmul.mubr.msk.bf16.vlgmr.msra.gmra.mrb[36].mxu1 %vm1665_vm2, %v2752_v53  ;;  %v4550_v53 = vld [vmem:[#allocation13 + $0x38] sm:$0xff]  }
 0xa9f   :  { %4333 = vmatprep.mubr.msk.bf16.mxu1 %vm4937_vm0, %v4936_v0 }
 0xb4e   :  { %v2557_v51 = vpop.f32.mrb[24].mxu0 }
 0xb4f   :  { %v4293_v35 = vpop.f32.mrb[25].mxu0 }
 0xb50   :  { %v2560_v45 = vpop.f32.mrb[26].mxu0 }
 0xb51   :  { %v4294_v54 = vpop.f32.mrb[27].mxu0 }
 0xb5d   :  { %v2603_v26 = vpop.f32.mrb[32].mxu1 }
 0xb5e   :  { %v4453_v59 = vpack.i.bf16 %v2603_v26, %v2557_v51  ;;  %v4299_v3 = vpop.f32.mrb[33].mxu1 }
 0xb5f   :  { %v2606_v6 = vpop.f32.mrb[34].mxu1 }
 0xb60   :  { %v4300_v55 = vpop.f32.mrb[35].mxu1 }
 0xb62   :  { %v2744_v36 = vpop.f32.mrb[28].mxu0 }
 0xb63   :  { %v4317_v4 = vpop.f32.mrb[29].mxu0  ;;  %v2801_v8 = vsel %vm1859_vm9, %v2744_v36, -inf }
 0xb64   :  { %2802 = vmax.xlane.f32.xlu1 %v2801_v8  ;;  %v2747_v10 = vpop.f32.mrb[30].mxu0 }
 0xb65   :  { %v4318_v18 = vpop.f32.mrb[31].mxu0 }
 0xb71   :  { %v2795_v17 = vpop.f32.mrb[36].mxu1 }
 0xb72   :  { %v4323_v11 = vpop.f32.mrb[37].mxu1  ;;  %v2804_v62 = vsel %vm1859_vm9, %v2795_v17, -inf }
 0xb73   :  { %2805 = vmax.xlane.f32.xlu0 %v2804_v62  ;;  %v2798_v27 = vpop.f32.mrb[38].mxu1 }
 0xb74   :  { %v4324_v49 = vpop.f32.mrb[39].mxu1 }
 0xbf1   :  { %v2803_v13 = vpop.xlane.xlu1 %2802 }
 0xbf2   :  { %v2807_v43 = vsub.f32 %v2744_v36, %v2803_v13 }
 0xbf4   :  { %v2809_v19 = vmul.f32 1.442695, %v2807_v43  ;;  %v4551_v43 = vld [vmem:[#allocation14] ss:$8 sps:$4 sm:$0xff]  }
 0xbf6   :  { %4655 = vpow2.f32 %v2809_v19  ;;  %v4553_v19 = vld [vmem:[#allocation14 + $0x4] ss:$8 sps:$4 sm:$0xff]  }
 0xc00   :  { %v4656_v14 = vpop.eup %4655  ;;  %v2806_v23 = vpop.xlane.xlu0 %2805 }
 0xc01   :  { %v2808_v16 = vsub.f32 %v2795_v17, %v2806_v23  ;;  %v2813_v42 = vsel %vm1859_vm9, %v4656_v14, 0.0  ;;  %v4557_v23 = vld [vmem:[#allocation14 + $0x20] ss:$8 sps:$4 sm:$0xff]  }
 0xc02   :  { %2814 = vadd.xlane.f32.xlu0 %v2813_v42 }
 0xc03   :  { %v2811_v21 = vmul.f32 1.442695, %v2808_v16 }
 0xc05   :  { %4657 = vpow2.f32 %v2811_v21 }
 0xc0f   :  { %v4658_v58 = vpop.eup %4657 }
 0xc10   :  { %v2816_v20 = vsel %vm1859_vm9, %v4658_v58, 0.0 }
 0xc11   :  { %2817 = vadd.xlane.f32.xlu1 %v2816_v20 }
 0xc18   :  { %2826 = vrot.lane.b32.xlu0 %v5747_v39, %s4938_s0 }
 0xc1c   :  { %4454 = vrot.lane.b32.xlu0 %v4453_v59, %s4922_s18 }
 0xc22   :  { %2875 = vrot.lane.b32.xlu1 %v5766_v57, %s4938_s0 }
 0xc26   :  { %4449 = vrot.lane.b32.xlu1 %v4448_v48, %s4946_s5 }
 0xc8f   :  { %v2815_v46 = vpop.xlane.xlu0 %2814 }
 0xc90   :  { %4659 = vrcp.f32 %v2815_v46 }
 0xc93   :  { %v2827_v15 = vpop.permute.xlu0 %2826 }
 0xc94   :  { %v2832_v38 = vsel %vm1889_vm15, %v2827_v15, 0 }
 0xc95   :  { %4326 = vmatpush3.bf16.msra.mxu0 %v2832_v38 }
 0xc96   :  { %4337 = vmatprep.subr.bf16.mxu0 %v4936_v0 }
 0xc97   :  { %v4455_v55 = vpop.permute.xlu0 %4454 }
 0xc98   :  { %v4457_v4 = vunpack.i.h.bf16 %v4455_v55  ;;  %v4456_v8 = vunpack.i.l.bf16 %v4455_v55 }
 0xc9a   :  { %v4660_v56 = vpop.eup %4659 }
 0xc9b   :  { %v2821_v39 = vmul.f32 %v4660_v56, %v4656_v14  ;;  %v4556_v14 = vld [vmem:[#allocation14 + $0x14] ss:$8 sps:$4 sm:$0xff]  }
 0xc9d   :  { %v2823_v12 = vpack.c.bf16 %v2821_v39, %v2821_v39 }
 0xc9e   :  { %v2818_v2 = vpop.xlane.xlu1 %2817 }
 0xc9f   :  { %4661 = vrcp.f32 %v2818_v2  ;;  %4328 = vmatmul.mubr.msk.bf16.vlgmr.msra.gmra.mrb[32].mxu0 %vm1859_vm9, %v2823_v12 }
 0xca0   :  { %4353 = vmatprep.mubr.msk.bf16.mxu0 %vm4937_vm0, %v4936_v0  ;;  %4338 = vmatpush3.bf16.msra.mxu0 %v4543_v50  ;;  %vm2949_vm0 = vcmask 523264  }
 0xca1   :  { %4339 = vmatprep.subr.bf16.mxu0 %v4936_v0 }
 0xca2   :  { %v2876_v57 = vpop.permute.xlu1 %2875 }
 0xca3   :  { %v2881_v47 = vsel %vm1889_vm15, %v2876_v57, 0 }
 0xca4   :  { %4332 = vmatpush3.bf16.msra.mxu1 %v2881_v47  ;;  %4340 = vmatpush3.bf16.msra.mxu0 %v4544_v25 }
 0xca5   :  { %4341 = vmatprep.subr.bf16.mxu0 %v4936_v0  ;;  %3631 = vmatprep.subr.bf16.mxu1 %v4553_v19 }
 0xca6   :  { %v4450_v59 = vpop.permute.xlu1 %4449 }
 0xca7   :  { %v4452_v3 = vunpack.i.h.bf16 %v4450_v59  ;;  %v4451_v6 = vunpack.i.l.bf16 %v4450_v59 }
 0xca8   :  { %4342 = vmatpush3.bf16.msra.mxu0 %v4545_v5 }
 0xca9   :  { %v4662_v32 = vpop.eup %4661  ;;  %4343 = vmatprep.subr.bf16.mxu0 %v4936_v0  ;;  %v2947_v36 = vsel %vm1665_vm2, %v5682_v61, %v4451_v6  ;;  %v4559_v61 = vld [vmem:[#allocation14 + $0x24] ss:$8 sps:$4 sm:$0xff]  }
 0xcaa   :  { %v2822_v48 = vmul.f32 %v4662_v32, %v4658_v58  ;;  %v2950_v11 = vsel %vm2949_vm0, %v2947_v36, %v4456_v8 }
 0xcac   :  { %v2824_v29 = vpack.c.bf16 %v2822_v48, %v2822_v48  ;;  %4344 = vmatpush3.bf16.msra.mxu0 %v4546_v9 }
 0xcad   :  { %4345 = vmatprep.subr.bf16.mxu0 %v4936_v0 }
 0xcae   :  { %4334 = vmatmul.mubr.msk.bf16.vlgmr.msra.gmra.mrb[40].mxu1 %vm1859_vm9, %v2824_v29  ;;  %vm2952_vm9 = vcmask 785408  }
 0xcaf   :  { %3663 = vmatprep.mubr.bf16.mxu1 %v4939_v60  ;;  %v4549_v60 = vld [vmem:[#allocation13 + $0x30] sm:$0xff]   ;;  %3632 = vmatpush1.bf16.msra.mxu1 %v4551_v43 }
 0xcb0   :  { %4346 = vmatpush3.bf16.msra.mxu0 %v4547_v40  ;;  %3633 = vmatprep.subr.bf16.mxu1 %v4556_v14 }
 0xcb1   :  { %4347 = vmatprep.subr.bf16.mxu0 %v4936_v0 }
 0xcb4   :  { %4348 = vmatpush3.bf16.msra.mxu0 %v4548_v7 }
 0xcb5   :  { %4349 = vmatprep.subr.bf16.mxu0 %v4936_v0 }
 0xcb8   :  { %4350 = vmatpush3.bf16.msra.mxu0 %v4549_v60 }
 0xcb9   :  { %4351 = vmatprep.subr.bf16.mxu0 %v4936_v0  ;;  %v2948_v0 = vsel %vm1665_vm2, %v5684_v63, %v4452_v3  ;;  %v4554_v63 = vld [vmem:[#allocation14 + $0x10] ss:$8 sps:$4 sm:$0xff]  }
 0xcba   :  { %v2951_v62 = vsel %vm2949_vm0, %v2948_v0, %v4457_v4  ;;  %3634 = vmatpush1.bf16.msra.mxu1 %v4554_v63 }
 0xcbb   :  { %3635 = vmatprep.subr.bf16.mxu1 %v4559_v61 }
 0xcbc   :  { %4352 = vmatpush3.bf16.msra.mxu0 %v4550_v53 }
 0xcbe   :  { %3636 = vmatpush1.bf16.msra.mxu1 %v4557_v23 }
 0xd72   :  { %v2868_v52 = vpop.f32.mrb[32].mxu0 }
 0xd73   :  { %v4329_v30 = vpop.f32.mrb[33].mxu0 }
 0xd74   :  { %v2871_v33 = vpop.f32.mrb[34].mxu0 }
 0xd75   :  { %v4330_v41 = vpop.f32.mrb[35].mxu0 }
 0xd81   :  { %v2917_v51 = vpop.f32.mrb[40].mxu1 }
 0xd82   :  { %v4458_v35 = vpack.i.bf16 %v2917_v51, %v2868_v52  ;;  %v4335_v45 = vpop.f32.mrb[41].mxu1 }
 0xd83   :  { %v2920_v54 = vpop.f32.mrb[42].mxu1 }
 0xd84   :  { %4459 = vrot.lane.b32.xlu1 %v4458_v35, %s4938_s0  ;;  %v4336_v26 = vpop.f32.mrb[43].mxu1 }
 0xdf6   :  { %v4460_v10 = vpop.permute.xlu1 %4459 }
 0xdf7   :  { %v4462_v18 = vunpack.i.h.bf16 %v4460_v10  ;;  %v4461_v17 = vunpack.i.l.bf16 %v4460_v10 }
 0xdf9   :  { %v2954_v27 = vsel %vm2952_vm9, %v2951_v62, %v4462_v18  ;;  %v2953_v49 = vsel %vm2952_vm9, %v2950_v11, %v4461_v17 }
 0xdfa   :  { %v2971_v13 = vpack.c.bf16 %v2954_v27, %v2953_v49 }
 0xdfc   :  { %4354 = vmatmul.mubr.bf16.vlgmr.msra.gmra.mrb[36].mxu0 %v2971_v13 }
 0xecf   :  { %v5854_v16 = vpop.f32.mrb[36].mxu0 }
 0xed0   :  { %v3061_v42 = vand.u32 2147483647, %v5854_v16  ;;  %v3064_v21 = vand.u32 2139095040, %v5854_v16  ;;  %v4355_v58 = vpop.f32.mrb[37].mxu0 }
 0xed1   :  { %v5858_v20 = vpop.f32.mrb[38].mxu0 }
 0xed2   :  { %v3065_v46 = vshrl.u32 %v3064_v21, 23  ;;  %v3068_v15 = vand.u32 8388607, %v3061_v42  ;;  %v3167_v38 = vand.u32 2139095040, %v5858_v20  ;;  %v4356_v56 = vpop.f32.mrb[39].mxu0 }
 0xed3   :  { %v3164_v12 = vand.u32 2147483647, %v5858_v20 }
 0xed4   :  { %v4035_v39 = vadd.s32 4294967169, %v3065_v46  ;;  %v3168_v2 = vshrl.u32 %v3167_v38, 23  ;;  %v3069_v47 = vor.u32 8388608, %v3068_v15 }
 0xed5   :  { %v3171_v48 = vand.u32 8388607, %v3164_v12 }
 0xed6   :  { %v3071_v57 = vadd.s32 1, %v4035_v39  ;;  %v4039_v32 = vadd.s32 4294967169, %v3168_v2  ;;  %v5866_v9 = vshll.u32 %v3069_v47, 8 }
 0xed7   :  { %v3172_v60 = vor.u32 8388608, %v3171_v48 }
 0xed8   :  { %vm3072_vm2 = vcmp.gt.s32.totalorder %v3071_v57, 0  ;;  %v3174_v50 = vadd.s32 1, %v4039_v32 }
 0xed9   :  { %v3073_v29 = vsel %vm3072_vm2, %v3071_v57, 0  ;;  %v3212_v19 = vshll.u32 %v3172_v60, 8  ;;  %vm3063_vm2 = vcmp.lt.s32.totalorder %v5854_v16, 0 }
 0xeda   :  { %v3074_v25 = vshrl.u32 %v3073_v29, 5  ;;  %v3075_v5 = vand.u32 31, %v3073_v29  ;;  %vm3175_vm1 = vcmp.gt.s32.totalorder %v3174_v50, 0 }
 0xedb   :  { %v3176_v55 = vsel %vm3175_vm1, %v3174_v50, 0  ;;  %vm3062_vm1 = vcmp.le.f32.partialorder %v3061_v42, 0.7853982 }
 0xedc   :  { %v3076_v40 = vsub.s32 32, %v3075_v5  ;;  %v3078_v7 = vshll.u32 %v4940_v22, %v3075_v5  ;;  %v3081_v52 = vshll.u32 %v4941_v24, %v3075_v5  ;;  %v3084_v30 = vshll.u32 %v4942_v28, %v3075_v5 }
 0xedd   :  { %v3087_v33 = vshll.u32 %v4943_v31, %v3075_v5  ;;  %v3090_v41 = vshll.u32 %v4944_v34, %v3075_v5  ;;  %vm3093_vm4 = vcmp.lt.s32.totalorder %v3074_v25, 1  ;;  %vm3095_vm5 = vcmp.lt.s32.totalorder %v3074_v25, 3 }
 0xede   :  { %v3079_v53 = vshrl.u32 %v4941_v24, %v3076_v40  ;;  %v3082_v51 = vshrl.u32 %v4942_v28, %v3076_v40  ;;  %v3085_v35 = vshrl.u32 %v4943_v31, %v3076_v40  ;;  %v3077_v45 = vshrl.u32 %v4940_v22, %v3076_v40 }
 0xedf   :  { %v3088_v54 = vshrl.u32 %v4944_v34, %v3076_v40  ;;  %v3091_v26 = vshrl.u32 %v4945_v37, %v3076_v40  ;;  %vm3096_vm6 = vcmp.lt.s32.totalorder %v3074_v25, 4  ;;  %v3178_v4 = vand.u32 31, %v3176_v55 }
 0xee0   :  { %v3080_v59 = vor.u32 %v3079_v53, %v3078_v7  ;;  %v3083_v3 = vor.u32 %v3082_v51, %v3081_v52  ;;  %v3086_v6 = vor.u32 %v3085_v35, %v3084_v30  ;;  %vm3094_vm7 = vcmp.lt.s32.totalorder %v3074_v25, 2 }
 0xee1   :  { %v3089_v0 = vor.u32 %v3088_v54, %v3087_v33  ;;  %v3092_v36 = vor.u32 %v3091_v26, %v3090_v41  ;;  %v3179_v49 = vsub.s32 32, %v3178_v4  ;;  %v3177_v23 = vshrl.u32 %v3176_v55, 5 }
 0xee2   :  { %v3097_v8 = vsel %vm3093_vm4, %v3077_v45, %v3080_v59  ;;  %v3098_v10 = vsel %vm3096_vm6, %v3086_v6, 2102212464  ;;  %v3101_v18 = vsel %vm3093_vm4, %v3080_v59, %v3083_v3  ;;  %v3105_v17 = vsel %vm3093_vm4, %v3083_v3, %v3086_v6 }
 0xee3   :  { %v3099_v11 = vsel %vm3095_vm5, %v3083_v3, %v3098_v10  ;;  %v3102_v62 = vsel %vm3096_vm6, %v3089_v0, 920167782  ;;  %v3106_v27 = vsel %vm3096_vm6, %v3092_v36, 1326507024  ;;  %v3181_v38 = vshll.u32 %v4940_v22, %v3178_v4 }
 0xee4   :  { %v3103_v13 = vsel %vm3095_vm5, %v3086_v6, %v3102_v62  ;;  %v3107_v43 = vsel %vm3095_vm5, %v3089_v0, %v3106_v27  ;;  %v3100_v14 = vsel %vm3094_vm7, %v3097_v8, %v3099_v11  ;;  %v3182_v56 = vshrl.u32 %v4941_v24, %v3179_v49 }
 0xee5   :  { %v3104_v63 = vsel %vm3094_vm7, %v3101_v18, %v3103_v13  ;;  %v3108_v61 = vsel %vm3094_vm7, %v3105_v17, %v3107_v43  ;;  %v3184_v39 = vshll.u32 %v4941_v24, %v3178_v4  ;;  %v3185_v2 = vshrl.u32 %v4942_v28, %v3179_v49 }
 0xee6   :  { %v5887_v21 = vmul.u32.u64.low %v5866_v9, %v3108_v61  ;;  %v5888_v58 = vmul.u32.u64.high %v5866_v9, %v3108_v61, %v5887_v21  ;;  %v5891_v46 = vmul.u32.u64.low %v5866_v9, %v3104_v63  ;;  %v5892_v15 = vmul.u32.u64.high %v5866_v9, %v3104_v63, %v5891_v46 }
 0xee7   :  { %v3187_v57 = vshll.u32 %v4942_v28, %v3178_v4  ;;  %v3188_v47 = vshrl.u32 %v4943_v31, %v3179_v49  ;;  %v3190_v32 = vshll.u32 %v4943_v31, %v3178_v4  ;;  %v3191_v48 = vshrl.u32 %v4944_v34, %v3179_v49 }
 0xee8   :  { %v3183_v29 = vor.u32 %v3182_v56, %v3181_v38  ;;  %v3186_v50 = vor.u32 %v3185_v2, %v3184_v39  ;;  %v3193_v25 = vshll.u32 %v4944_v34, %v3178_v4  ;;  %v3194_v5 = vshrl.u32 %v4945_v37, %v3179_v49 }
 0xee9   :  { %v3116_v40 = vmul.u32 %v5866_v9, %v3100_v14  ;;  %vm3118_vm8 = vc.u32 %v5888_v58, %v5891_v46  ;;  %v3119_v24 = vadd.s32 1, %v5892_v15  ;;  %v3189_v28 = vor.u32 %v3188_v47, %v3187_v57 }
 0xeea   :  { %v3180_v7 = vshrl.u32 %v4940_v22, %v3179_v49  ;;  %v3192_v60 = vor.u32 %v3191_v48, %v3190_v32  ;;  %v3195_v31 = vor.u32 %v3194_v5, %v3193_v25  ;;  %vm3196_vm10 = vcmp.lt.s32.totalorder %v3177_v23, 1 }
 0xeeb   :  { %v3120_v52 = vsel %vm3118_vm8, %v3119_v24, %v5892_v15  ;;  %vm3198_vm11 = vcmp.lt.s32.totalorder %v3177_v23, 3  ;;  %vm3199_vm13 = vcmp.lt.s32.totalorder %v3177_v23, 4  ;;  %v3204_v34 = vsel %vm3196_vm10, %v3183_v29, %v3186_v50 }
 0xeec   :  { %v3121_v30 = vadd.s32 %v3120_v52, %v3116_v40  ;;  %v3201_v37 = vsel %vm3199_vm13, %v3189_v28, 2102212464  ;;  %v3205_v33 = vsel %vm3199_vm13, %v3192_v60, 920167782  ;;  %v3208_v9 = vsel %vm3196_vm10, %v3186_v50, %v3189_v28 }
 0xeed   :  { %vm3197_vm14 = vcmp.lt.s32.totalorder %v3177_v23, 2  ;;  %v3200_v41 = vsel %vm3196_vm10, %v3180_v7, %v3183_v29  ;;  %v3206_v53 = vsel %vm3198_vm11, %v3189_v28, %v3205_v33  ;;  %v3209_v51 = vsel %vm3199_vm13, %v3195_v31, 1326507024 }
 0xeee   :  { %v3122_v35 = vadd.s32 536870912, %v3121_v30  ;;  %v3202_v45 = vsel %vm3198_vm11, %v3186_v50, %v3201_v37  ;;  %v3207_v54 = vsel %vm3197_vm14, %v3204_v34, %v3206_v53  ;;  %v3210_v22 = vsel %vm3198_vm11, %v3192_v60, %v3209_v51 }
 0xeef   :  { %v3211_v26 = vsel %vm3197_vm14, %v3208_v9, %v3210_v22  ;;  %v5911_v59 = vmul.u32.u64.low %v3212_v19, %v3207_v54  ;;  %v5912_v3 = vmul.u32.u64.high %v3212_v19, %v3207_v54, %v5911_v59  ;;  %v3203_v36 = vsel %vm3197_vm14, %v3200_v41, %v3202_v45 }
 0xef0   :  { %v5914_v6 = vshrl.u32 %v3122_v35, 30  ;;  %v5916_v55 = vmul.u32.u64.low %v3212_v19, %v3211_v26  ;;  %v5917_v0 = vmul.u32.u64.high %v3212_v19, %v3211_v26, %v5916_v55  ;;  %v3219_v18 = vmul.u32 %v3212_v19, %v3203_v36 }
 0xef1   :  { %v3222_v8 = vadd.s32 1, %v5912_v3  ;;  %v3479_v13 = vmul.f32 %v5854_v16, %v5854_v16  ;;  %v3117_v15 = vadd.s32 %v5891_v46, %v5888_v58  ;;  %v3480_v29 = vmul.f32 %v5858_v20, %v5858_v20 }
 0xef2   :  { %v3124_v4 = vshll.u32 %v5914_v6, 30  ;;  %vm3221_vm15 = vc.u32 %v5917_v0, %v5911_v59  ;;  %v3147_v31 = vsub.s32 4, %v5914_v6  ;;  %vm3166_vm4 = vcmp.lt.s32.totalorder %v5858_v20, 0 }
 0xef3   :  { %v3223_v17 = vsel %vm3221_vm15, %v3222_v8, %v5912_v3  ;;  %v3481_v23 = vmul.f32 %v3479_v13, %v5854_v16  ;;  %v3482_v58 = vmul.f32 %v3480_v29, %v5858_v20  ;;  %vm3165_vm5 = vcmp.le.f32.partialorder %v3164_v12, 0.7853982  ;;  %v4051_v29 = vld [vmem:[%s6006_s8] ss:$0 sm:$0xff] }
 0xef4   :  { %v3125_v10 = vsub.s32 %v3121_v30, %v3124_v4  ;;  %v3224_v62 = vadd.s32 %v3223_v17, %v3219_v18  ;;  %v3220_v30 = vadd.s32 %v5911_v59, %v5917_v0  ;;  %v3148_v26 = vsel %vm3063_vm2, %v3147_v31, %v5914_v6 }
 0xef5   :  { %v3483_v2 = vmul.f32 0.044715, %v3481_v23  ;;  %v3484_v9 = vmul.f32 0.044715, %v3482_v58  ;;  %v3150_v0 = vsel %vm3062_vm1, 0, %v3148_v26  ;;  %vm3153_vm14 = vweird.f32 %v5854_v16 }
 0xef6   :  { %v3127_v11 = vsub.s32 0, %v3125_v10  ;;  %v3225_v49 = vadd.s32 536870912, %v3224_v62  ;;  %v3360_v18 = vadd.s32 3, %v3150_v0  ;;  %v3478_v31 = vmul.f32 0.5, %v5858_v20 }
 0xef7   :  { %v3485_v40 = vadd.f32 %v3483_v2, %v5854_v16  ;;  %v3486_v3 = vadd.f32 %v3484_v9, %v5858_v20 }
 0xef8   :  { %v4036_v27 = vmin.u32 %v3127_v11, %v3125_v10  ;;  %v5925_v14 = vshrl.u32 %v3225_v49, 30 }
 0xef9   :  { %v3487_v52 = vmul.f32 0.7978846, %v3485_v40  ;;  %v3488_v8 = vmul.f32 0.7978846, %v3486_v3  ;;  %v4688_v3 = vld [vmem:[#allocation2 + $0x8] sm:$0xff] }
 0xefa   :  { %v3129_v43 = vclz %v4036_v27  ;;  %v3227_v61 = vshll.u32 %v5925_v14, 30  ;;  %v3250_v42 = vsub.s32 4, %v5925_v14  ;;  %v3361_v27 = vand.u32 3, %v3360_v18  ;;  %v4566_v18 = vld [vmem:[#allocation14 + $0x50] ss:$8 sps:$4 sm:$0xff]  }
 0xefb   :  { %4663 = vtanh.f32 %v3487_v52 }
 0xefc   :  { %v4037_v63 = vadd.s32 4294967294, %v3129_v43  ;;  %v3228_v19 = vsub.s32 %v3224_v62, %v3227_v61  ;;  %v3154_v62 = vand.u32 3, %v3150_v0  ;;  %v3251_v49 = vsel %vm3166_vm4, %v3250_v42, %v5925_v14  ;;  %v4569_v42 = vld [vmem:[#allocation14 + $0x60] ss:$8 sps:$4 sm:$0xff]  }
 0xefd   :  { %vm3366_vm8 = vcmp.eq.s32.totalorder %v3361_v27, 2  ;;  %vm3363_vm11 = vcmp.eq.s32.totalorder %v3361_v27, 0  ;;  %vm3362_vm13 = vcmp.lt.s32.totalorder %v3361_v27, 2 }
 0xefe   :  { %vm4038_vm0 = vcmp.lt.s32.totalorder %v4037_v63, 0  ;;  %v3230_v39 = vsub.s32 0, %v3228_v19  ;;  %vm3155_vm6 = vcmp.lt.s32.totalorder %v3154_v62, 2  ;;  %vm3159_vm7 = vcmp.eq.s32.totalorder %v3154_v62, 2 }
 0xeff   :  { %v3132_v21 = vsel %vm4038_vm0, 0, %v4037_v63  ;;  %v3477_v63 = vmul.f32 0.5, %v5854_v16  ;;  %vm3156_vm10 = vcmp.eq.s32.totalorder %v3154_v62, 0 }
 0xf00   :  { %v3133_v38 = vsub.s32 32, %v3132_v21  ;;  %v3137_v56 = vsub.s32 4294967266, %v3132_v21  ;;  %v3134_v57 = vshll.u32 %v3125_v10, %v3132_v21  ;;  %v4040_v48 = vmin.u32 %v3230_v39, %v3228_v19 }
 0xf01   :  { %v3253_v21 = vsel %vm3165_vm5, 0, %v3251_v49 }
 0xf02   :  { %v3135_v47 = vshrl.u32 %v3117_v15, %v3133_v38  ;;  %v3138_v32 = vadd.s32 127, %v3137_v56  ;;  %v3232_v5 = vclz %v4040_v48  ;;  %v3464_v39 = vadd.s32 3, %v3253_v21 }
 0xf03   :  { %v3257_v40 = vand.u32 3, %v3253_v21 }
 0xf04   :  { %v3136_v50 = vor.u32 %v3135_v47, %v3134_v57  ;;  %v3139_v25 = vshll.u32 %v3138_v32, 23  ;;  %v4041_v28 = vadd.s32 4294967294, %v3232_v5 }
 0xf05   :  { %v4664_v11 = vpop.eup %4663  ;;  %vm3259_vm15 = vcmp.eq.s32.totalorder %v3257_v40, 0  ;;  %vm3262_vm0 = vcmp.eq.s32.totalorder %v3257_v40, 2 }
 0xf06   :  { %v3140_v24 = vor.u32 4788187, %v3139_v25  ;;  %v3143_v7 = vcvt.s32.f32 %v3136_v50  ;;  %vm4042_vm9 = vcmp.lt.s32.totalorder %v4041_v28, 0 }
 0xf07   :  { %v3235_v60 = vsel %vm4042_vm9, 0, %v4041_v28 }
 0xf08   :  { %v3141_v46 = vand.u32 2147483647, %v3140_v24  ;;  %v3236_v37 = vsub.s32 32, %v3235_v60  ;;  %v3240_v33 = vsub.s32 4294967266, %v3235_v60  ;;  %v3237_v53 = vshll.u32 %v3228_v19, %v3235_v60 }
 0xf09   :  { %v3491_v19 = vadd.f32 1.0, %v4664_v11  ;;  %v3465_v24 = vand.u32 3, %v3464_v39  ;;  %v4572_v11 = vld [vmem:[#allocation14 + $0x70] ss:$8 sps:$4 sm:$0xff]  }
 0xf0a   :  { %v3144_v34 = vmul.f32 %v3143_v7, %v3141_v46  ;;  %v3238_v51 = vshrl.u32 %v3220_v30, %v3236_v37  ;;  %v3241_v35 = vadd.s32 127, %v3240_v33  ;;  %v4687_v46 = vld [vmem:[#allocation2] sm:$0xff]  ;;  %v4580_v39 = vld [vmem:[#allocation16 + $0x10] sm:$0xff]  }
 0xf0b   :  { %v3493_v48 = vmul.f32 %v3491_v19, %v3477_v63  ;;  %vm3470_vm9 = vcmp.eq.s32.totalorder %v3465_v24, 2 }
 0xf0c   :  { %v3145_v41 = vxor.u32 2147483648, %v3144_v34  ;;  %v3239_v54 = vor.u32 %v3238_v51, %v3237_v53  ;;  %v3242_v22 = vshll.u32 %v3241_v35, 23 }
 0xf0e   :  { %v3146_v45 = vsel %vm3063_vm2, %v3145_v41, %v3144_v34  ;;  %v3243_v55 = vor.u32 4788187, %v3242_v22  ;;  %v3246_v4 = vcvt.s32.f32 %v3239_v54  ;;  %vm3467_vm2 = vcmp.eq.s32.totalorder %v3465_v24, 0 }
 0xf0f   :  { %v3149_v59 = vsel %vm3062_vm1, %v5854_v16, %v3146_v45  ;;  %vm3258_vm1 = vcmp.lt.s32.totalorder %v3257_v40, 2  ;;  %v4590_v40 = vld [vmem:[#allocation16 + $0x38] sm:$0xff]  }
 0xf10   :  { %4665 = vcosq.f32 %v3149_v59  ;;  %v3244_v36 = vand.u32 2147483647, %v3243_v55 }
 0xf11   :  { %4667 = vsinq.f32 %v3149_v59 }
 0xf12   :  { %v3247_v10 = vmul.f32 %v3246_v4, %v3244_v36  ;;  %4669 = vtanh.f32 %v3488_v8  ;;  %v4562_v36 = vld [vmem:[#allocation14 + $0x34] ss:$8 sps:$4 sm:$0xff]   ;;  %v4563_v4 = vld [vmem:[#allocation14 + $0x40] ss:$8 sps:$4 sm:$0xff]   ;;  %v4565_v8 = vld [vmem:[#allocation14 + $0x44] ss:$8 sps:$4 sm:$0xff]  }
 0xf13   :  { %3637 = vmatprep.subr.bf16.mxu1 %v4562_v36 }
 0xf14   :  { %v3248_v17 = vxor.u32 2147483648, %v3247_v10 }
 0xf16   :  { %v3249_v6 = vsel %vm3166_vm4, %v3248_v17, %v3247_v10  ;;  %vm3466_vm4 = vcmp.lt.s32.totalorder %v3465_v24, 2  ;;  %v4568_v10 = vld [vmem:[#allocation14 + $0x54] ss:$8 sps:$4 sm:$0xff]   ;;  %v3542_v24 = vshrl.u32 %v168_v44, 7 }
 0xf17   :  { %v3252_v13 = vsel %vm3165_vm5, %v5858_v20, %v3249_v6  ;;  %vm3256_vm5 = vweird.f32 %v5858_v20  ;;  %v4560_v20 = vld [vmem:[#allocation14 + $0x30] ss:$8 sps:$4 sm:$0xff]   ;;  %v4574_v17 = vld [vmem:[#allocation14 + $0x74] ss:$8 sps:$4 sm:$0xff]  }
 0xf18   :  { %4671 = vcosq.f32 %v3252_v13  ;;  %3638 = vmatpush1.bf16.msra.mxu1 %v4560_v20 }
 0xf19   :  { %4673 = vsinq.f32 %v3252_v13  ;;  %3639 = vmatprep.subr.bf16.mxu1 %v4565_v8 }
 0xf1a   :  { %v4666_v43 = vpop.eup %4665 }
 0xf1b   :  { %v4668_v61 = vpop.eup %4667  ;;  %v3160_v23 = vxor.u32 2147483648, %v4666_v43 }
 0xf1c   :  { %v3157_v15 = vxor.u32 2147483648, %v4668_v61  ;;  %v4670_v50 = vpop.eup %4669  ;;  %3640 = vmatpush1.bf16.msra.mxu1 %v4563_v4 }
 0xf1d   :  { %v3161_v12 = vsel %vm3159_vm7, %v3160_v23, %v4668_v61  ;;  %v3368_v38 = vsel %vm3366_vm8, %v3160_v23, %v4668_v61  ;;  %v3492_v52 = vadd.f32 1.0, %v4670_v50  ;;  %3641 = vmatprep.subr.bf16.mxu1 %v4568_v10  ;;  %v4587_v50 = vld [vmem:[#allocation16 + $0x70] sm:$0xff]  }
 0xf1e   :  { %v3158_v14 = vsel %vm3156_vm10, %v4666_v43, %v3157_v15  ;;  %v3365_v56 = vsel %vm3363_vm11, %v4666_v43, %v3157_v15  ;;  %v4575_v15 = vld [vmem:[#allocation16 + $0x40] sm:$0xff]  }
 0xf1f   :  { %v3162_v2 = vsel %vm3155_vm6, %v3158_v14, %v3161_v12  ;;  %v3369_v57 = vsel %vm3362_vm13, %v3365_v56, %v3368_v38  ;;  %v3494_v54 = vmul.f32 %v3492_v52, %v3478_v31  ;;  %v4576_v12 = vld [vmem:[#allocation16] sm:$0xff]   ;;  %v4577_v38 = vld [vmem:[#allocation16 + $0x48] sm:$0xff]   ;;  %4151 = vmatprep.subr.bf16.mxu0 %v4575_v15  ;;  %v4579_v56 = vld [vmem:[#allocation16 + $0x50] sm:$0xff]  }
 0xf20   :  { %v3163_v47 = vsel %vm3153_vm14, nan, %v3162_v2  ;;  %v3370_v32 = vsel %vm3153_vm14, nan, %v3369_v57  ;;  %3642 = vmatpush1.bf16.msra.mxu1 %v4566_v18  ;;  %4152 = vmatpush3.bf16.msra.mxu0 %v4576_v12  ;;  %v4578_v14 = vld [vmem:[#allocation16 + $0x8] sm:$0xff]   ;;  %v4581_v2 = vld [vmem:[#allocation16 + $0x58] sm:$0xff]  }
 0xf21   :  { %v3475_v25 = vsel %vm712_vm12, %v3163_v47, %v3370_v32  ;;  %3643 = vmatprep.subr.bf16.mxu1 %v4571_v1  ;;  %4153 = vmatprep.subr.bf16.mxu0 %v4577_v38  ;;  %v4582_v57 = vld [vmem:[#allocation16 + $0x18] sm:$0xff]   ;;  %v4583_v47 = vld [vmem:[#allocation16 + $0x60] sm:$0xff]  }
 0xf22   :  { %v3495_v5 = vsel %vm713_vm3, %v3475_v25, %v3493_v48  ;;  %v4672_v16 = vpop.eup %4671  ;;  %v4584_v32 = vld [vmem:[#allocation16 + $0x20] sm:$0xff]   ;;  %v4585_v48 = vld [vmem:[#allocation16 + $0x68] sm:$0xff]   ;;  %v4588_v25 = vld [vmem:[#allocation16 + $0x30] sm:$0xff]  }
 0xf23   :  { %v3504_v28 = vmul.f32 %v4051_v29, %v3495_v5  ;;  %v4674_v58 = vpop.eup %4673  ;;  %v3263_v60 = vxor.u32 2147483648, %v4672_v16  ;;  %v4589_v5 = vld [vmem:[#allocation16 + $0x78] sm:$0xff]  }
 0xf24   :  { %v3260_v34 = vxor.u32 2147483648, %v4674_v58  ;;  %3644 = vmatpush1.bf16.msra.mxu1 %v4569_v42  ;;  %4154 = vmatpush3.bf16.msra.mxu0 %v4578_v14 }
 0xf25   :  { %v5958_v7 = vadd.f32 %v4687_v46, %v3504_v28  ;;  %v3264_v37 = vsel %vm3262_vm0, %v3263_v60, %v4674_v58  ;;  %v3472_v33 = vsel %vm3470_vm9, %v3263_v60, %v4674_v58  ;;  %3645 = vmatprep.subr.bf16.mxu1 %v4574_v17  ;;  %4155 = vmatprep.subr.bf16.mxu0 %v4579_v56  ;;  %v3543_v28 = vsub.s32 0, %v3542_v24 }
 0xf26   :  { %v3261_v9 = vsel %vm3259_vm15, %v4672_v16, %v3260_v34  ;;  %v3469_v41 = vsel %vm3467_vm2, %v4672_v16, %v3260_v34  ;;  %v3539_v16 = vld [vmem:[%s6008_s10] sm:$0x3]  ;;  %v3547_v58 = vsub.s32 1, %v3542_v24 }
 0xf27   :  { %v3508_v30 = vmul.f32 %v5958_v7, %v5958_v7  ;;  %v3265_v53 = vsel %vm3258_vm1, %v3261_v9, %v3264_v37  ;;  %v3473_v51 = vsel %vm3466_vm4, %v3469_v41, %v3472_v33  ;;  %v3544_v46 = vrot.slane %v3539_v16, %v3543_v28 }
 0xf28   :  { %v3266_v35 = vsel %vm3256_vm5, nan, %v3265_v53  ;;  %v3474_v45 = vsel %vm3256_vm5, nan, %v3473_v51  ;;  %3646 = vmatpush1.bf16.msra.mxu1 %v4572_v11  ;;  %4156 = vmatpush3.bf16.msra.mxu0 %v4580_v39  ;;  %v3548_v60 = vrot.slane %v3539_v16, %v3547_v58 }
 0xf29   :  { %3510 = vadd.xlane.f32.xlu0 %v3508_v30  ;;  %v3476_v22 = vsel %vm712_vm12, %v3266_v35, %v3474_v45  ;;  %4157 = vmatprep.subr.bf16.mxu0 %v4581_v2 }
 0xf2a   :  { %v3496_v26 = vsel %vm713_vm3, %v3476_v22, %v3494_v54 }
 0xf2b   :  { %v3505_v59 = vmul.f32 %v4051_v29, %v3496_v26  ;;  %v4586_v29 = vld [vmem:[#allocation16 + $0x28] sm:$0xff]  }
 0xf2c   :  { %4158 = vmatpush3.bf16.msra.mxu0 %v4582_v57 }
 0xf2d   :  { %v5968_v55 = vadd.f32 %v4688_v3, %v3505_v59  ;;  %4159 = vmatprep.subr.bf16.mxu0 %v4583_v47 }
 0xf2f   :  { %v3509_v0 = vmul.f32 %v5968_v55, %v5968_v55 }
 0xf30   :  { %4160 = vmatpush3.bf16.msra.mxu0 %v4584_v32 }
 0xf31   :  { %3512 = vadd.xlane.f32.xlu1 %v3509_v0  ;;  %4161 = vmatprep.subr.bf16.mxu0 %v4585_v48  ;;  %v4084_v48 = vld [vmem:[%s6010_s12] ss:$0 sm:$0xff] }
 0xf34   :  { %4162 = vmatpush3.bf16.msra.mxu0 %v4586_v29 }
 0xf35   :  { %4163 = vmatprep.subr.bf16.mxu0 %v4587_v50 }
 0xf38   :  { %4164 = vmatpush3.bf16.msra.mxu0 %v4588_v25 }
 0xf39   :  { %4165 = vmatprep.subr.bf16.mxu0 %v4589_v5 }
 0xf3c   :  { %4166 = vmatpush3.bf16.msra.mxu0 %v4590_v40 }
 0xfb6   :  { %v3511_v6 = vpop.xlane.xlu0 %3510 }
 0xfb7   :  { %v3514_v62 = vmul.f32 0.0078125, %v3511_v6 }
 0xfb9   :  { %v3516_v27 = vadd.f32 1e-06, %v3514_v62 }
 0xfbb   :  { %4675 = vrsqrt.f32 %v3516_v27 }
 0xfbe   :  { %v3513_v49 = vpop.xlane.xlu1 %3512 }
 0xfbf   :  { %v3515_v13 = vmul.f32 0.0078125, %v3513_v49 }
 0xfc1   :  { %v3517_v43 = vadd.f32 1e-06, %v3515_v13 }
 0xfc3   :  { %4677 = vrsqrt.f32 %v3517_v43 }
 0xfc5   :  { %v4676_v63 = vpop.eup %4675 }
 0xfc6   :  { %v3520_v23 = vmul.f32 %v4676_v63, %v5958_v7 }
 0xfcd   :  { %v4678_v61 = vpop.eup %4677 }
 0xfce   :  { %v3521_v19 = vmul.f32 %v4678_v61, %v5968_v55 }
 0xfd0   :  { %v3538_v21 = vpack.c.bf16 %v3521_v19, %v3520_v23 }
 0xfd2   :  { %3664 = vmatmul.mubr.bf16.vlgmr.msra.gmra.mrb[44].mxu1 %v3538_v21 }
0x10a5   :  { %v3665_v31 = vpop.f32.mrb[44].mxu1 }
0x10a6   :  { %v3666_v52 = vadd.f32 %v3665_v31, %v3544_v46  ;;  %v3667_v34 = vpop.f32.mrb[45].mxu1 }
0x10a7   :  { %v3668_v30 = vadd.f32 %v3667_v34, %v3548_v60  ;;  %v3669_v37 = vpop.f32.mrb[46].mxu1 }
0x10a8   :  { %v3678_v33 = vmul.f32 %v3666_v52, %v3666_v52  ;;  %v3670_v9 = vadd.f32 %v3669_v37, %v3544_v46  ;;  %v3671_v41 = vpop.f32.mrb[47].mxu1  ;;  %v3674_v43 = vmul.f32 0.5, %v3666_v52 }
0x10a9   :  { %v3679_v53 = vmul.f32 %v3668_v30, %v3668_v30  ;;  %v3672_v51 = vadd.f32 %v3671_v41, %v3548_v60  ;;  %v3675_v23 = vmul.f32 0.5, %v3668_v30 }
0x10aa   :  { %v3682_v35 = vmul.f32 %v3678_v33, %v3666_v52  ;;  %v3680_v44 = vmul.f32 %v3670_v9, %v3670_v9  ;;  %v3676_v63 = vmul.f32 0.5, %v3670_v9 }
0x10ab   :  { %v3683_v45 = vmul.f32 %v3679_v53, %v3668_v30  ;;  %v3681_v54 = vmul.f32 %v3672_v51, %v3672_v51  ;;  %v3677_v19 = vmul.f32 0.5, %v3672_v51 }
0x10ac   :  { %v3686_v22 = vmul.f32 0.044715, %v3682_v35  ;;  %v3684_v26 = vmul.f32 %v3680_v44, %v3670_v9 }
0x10ad   :  { %v3687_v59 = vmul.f32 0.044715, %v3683_v45  ;;  %v3685_v3 = vmul.f32 %v3681_v54, %v3672_v51 }
0x10ae   :  { %v3690_v0 = vadd.f32 %v3686_v22, %v3666_v52  ;;  %v3688_v20 = vmul.f32 0.044715, %v3684_v26 }
0x10af   :  { %v3691_v36 = vadd.f32 %v3687_v59, %v3668_v30  ;;  %v3689_v4 = vmul.f32 0.044715, %v3685_v3 }
0x10b0   :  { %v3694_v8 = vmul.f32 0.7978846, %v3690_v0  ;;  %v3692_v10 = vadd.f32 %v3688_v20, %v3670_v9 }
0x10b1   :  { %v3695_v18 = vmul.f32 0.7978846, %v3691_v36  ;;  %v3693_v1 = vadd.f32 %v3689_v4, %v3672_v51 }
0x10b2   :  { %4679 = vtanh.f32 %v3694_v8  ;;  %v3696_v42 = vmul.f32 0.7978846, %v3692_v10 }
0x10b3   :  { %4681 = vtanh.f32 %v3695_v18  ;;  %v3697_v17 = vmul.f32 0.7978846, %v3693_v1 }
0x10b4   :  { %4683 = vtanh.f32 %v3696_v42 }
0x10b5   :  { %4685 = vtanh.f32 %v3697_v17 }
0x10bc   :  { %v4680_v11 = vpop.eup %4679 }
0x10bd   :  { %v4682_v6 = vpop.eup %4681  ;;  %v3702_v62 = vadd.f32 1.0, %v4680_v11 }
0x10be   :  { %v4684_v27 = vpop.eup %4683  ;;  %v3703_v49 = vadd.f32 1.0, %v4682_v6 }
0x10bf   :  { %v4686_v13 = vpop.eup %4685  ;;  %v3704_v61 = vadd.f32 1.0, %v4684_v27  ;;  %v3706_v15 = vmul.f32 %v3702_v62, %v3674_v43 }
0x10c0   :  { %v3705_v21 = vadd.f32 1.0, %v4686_v13  ;;  %v3707_v38 = vmul.f32 %v3703_v49, %v3675_v23 }
0x10c1   :  { %v3708_v12 = vmul.f32 %v3704_v61, %v3676_v63 }
0x10c2   :  { %v3709_v14 = vmul.f32 %v3705_v21, %v3677_v19 }
0x10c3   :  { %v3742_v56 = vpack.c.bf16 %v3708_v12, %v3706_v15 }
0x10c4   :  { %v3743_v39 = vpack.c.bf16 %v3709_v14, %v3707_v38 }
0x10c6   :  { %3872 = vmatprep.mubr.bf16.mxu0 %v3743_v39 }
0x10c7   :  { %3873 = vmatmul.mubr.bf16.vlgmr.msra.gmra.mrb[40].mxu0 %v3742_v56 }
0x119a   :  { %v4167_v2 = vpop.f32.mrb[40].mxu0 }
0x119b   :  { %v4168_v57 = vpop.f32.mrb[41].mxu0 }
0x119c   :  { %v4169_v47 = vadd.f32 %v4168_v57, %v4167_v2  ;;  %v4170_v32 = vpop.f32.mrb[42].mxu0 }
0x119d   :  { %v4171_v29 = vpop.f32.mrb[43].mxu0 }
0x119e   :  { %v3881_v50 = vadd.f32 %v4169_v47, %v5958_v7  ;;  %v4172_v25 = vadd.f32 %v4171_v29, %v4170_v32 }
0x11a0   :  { %v3890_v5 = vadd.f32 %v4084_v48, %v3881_v50  ;;  %v3882_v40 = vadd.f32 %v4172_v25, %v5968_v55 }
0x11a2   :  { %3892 = vst [vmem:[#allocation17] sm:$0xff] %v3890_v5  ;;  %v3891_v24 = vadd.f32 %v4084_v48, %v3882_v40 }
0x11a4   :  { %3893 = vst [vmem:[#allocation17 + $0x8] sm:$0xff] %v3891_v24 }
0x11a5   :  { %4898 = shalt.err (!%p4895_p6)
}
0x11a6   :  { %s4899_s6 = scalar_lea.hbm %s6011_s13, 256 }
0x11a7   :  { %p4900_p7 = scmp.ne.s32.totalorder %s6011_s13, %s4899_s6  ;;  %p4903_p8 = scmp.lt.u32.totalorder %s4899_s6, %s6011_s13 }
0x11a9   :  { %p4905_p9 = pnand %p4903_p8, %p4900_p7 }
0x11ab   :  { %4908 = shalt.err (!%p4905_p9)
}
0x11ac   :  { %3905 = dma.vmem_to_hbm [thread:$0]  %s3900_s4, 256, %s6011_s13, [#allocation4], %s4926_s26, %s4926_s26, %s4927_s17  }
0x11ad   :  { %4919 = dma.done.wait [#allocation4], 256  }
0x11ae   :  { %4920 = vsyncadd [#allocation4], 4294967040 }
0x11af   :  { %3909 = vsyncpa [#allocation3], 1 }
0x11b0   :  { %3910 = vsyncpa [#allocation6], 1 }
0x11b1   :  { %3911 = vsyncpa [#allocation9], 1 }
0x11b2   :  { %3912 = vsyncpa [#allocation12], 1 }
0x11b3   :  { %3913 = vsyncpa [#allocation15], 1 }
0x11b4   :  { %3914 = vsyncpa [#allocation4], 1 }

</bundles_post_ra>
